<compile_context>
chip_gen: v7x
topology: tpu7x:2x2x1
jax: 0.10.0
libtpu: 0.0.40
codegen_flags: <defaults>
</compile_context>

<pallas_src>
import math
from functools import partial

import jax
import jax.numpy as jnp
from jax import lax
from jax.experimental import pallas as pl
from jax.experimental.pallas import tpu as pltpu


def _sigmoid(x):
    return 1.0 / (1.0 + jnp.exp(-x))


def _softplus(x):
    return jnp.maximum(x, 0.0) + jnp.log(1.0 + jnp.exp(-jnp.abs(x)))


def _vmem_limit_bytes():
    """Generation-aware VMEM limit (leave ~1/8 headroom for Mosaic scratch)."""
    cap = 64 * 1024 * 1024
    try:
        cap = int(pltpu.get_tpu_info().vmem_capacity_bytes)
    except Exception:
        pass
    return int(cap - max(cap // 8, 8 * 1024 * 1024))


def _const_spec(shape, index_map):
    """BlockSpec for grid-constant operands; single-buffered when supported."""
    try:
        return pl.BlockSpec(shape, index_map, pipeline_mode=pl.Buffered(1))
    except Exception:
        return pl.BlockSpec(shape, index_map)


def _hint(v, m):
    if isinstance(v, int) or m <= 1:
        return v
    return pl.multiple_of(v, m)


def _pick_row_tile(M, row_bytes, limit):
    """Largest multiple-of-8 divisor of M whose double-buffered tile fits."""
    budget = max(limit // 2, 4 << 20)
    cap = max(8, min(2048, budget // max(2 * row_bytes, 1)))
    hi = (min(M, cap) // 8) * 8
    for d in range(hi, 0, -8):
        if M % d == 0:
            return d
    # TODO(synk): pad M to a multiple of 8 instead of a single full-M tile.
    return M


def _pick_scan_chunk(L, D, N, budget_bytes):
    """Largest chunk length whose per-direction scratches fit the budget."""
    per_row = 4 * (D + 2 * N) * 4            # delta(D) + B(N) + C(N), f32, 4 dirs
    cands = [c for c in (1024, 512, 256, 128, 64, 32, 16, 8) if L % c == 0]
    if not cands:
        return L
    for c in cands:
        if c * per_row <= budget_bytes:
            return c
    return cands[-1]


# ---------------------------------------------------------------------------
# Kernel 1: ln_1 (eps=1e-6) + in_proj, tiled over B*L rows, split x/z outputs
# ---------------------------------------------------------------------------
def ln_inproj_kernel(x_ref, g_ref, b_ref, w_ref, ox_ref, oz_ref):
    x = x_ref[...]                                     # (TM, C) f32
    mu = jnp.mean(x, axis=-1, keepdims=True)
    xc = x - mu
    var = jnp.mean(xc * xc, axis=-1, keepdims=True)
    xn = xc * lax.rsqrt(var + 1e-6) * g_ref[...] + b_ref[...]
    xz = jnp.dot(xn.astype(jnp.bfloat16), w_ref[...],
                 preferred_element_type=jnp.float32)   # (TM, 2*Di)
    Di = ox_ref.shape[1]
    ox_ref[...] = xz[:, :Di]
    oz_ref[...] = xz[:, Di:]


def ln_inproj(x2d, g1, b1, w_in):
    M, C = x2d.shape
    Do = w_in.shape[1]
    Di = Do // 2
    limit = _vmem_limit_bytes()
    TM = _pick_row_tile(M, (C + Do) * 4, limit)
    return pl.pallas_call(
        ln_inproj_kernel,
        out_shape=(jax.ShapeDtypeStruct((M, Di), jnp.float32),
                   jax.ShapeDtypeStruct((M, Di), jnp.float32)),
        grid=(M // TM,),
        in_specs=[
            pl.BlockSpec((TM, C), lambda i: (i, 0)),
            pl.BlockSpec((1, C), lambda i: (0, 0)),
            pl.BlockSpec((1, C), lambda i: (0, 0)),
            _const_spec((C, Do), lambda i: (0, 0)),
        ],
        out_specs=(pl.BlockSpec((TM, Di), lambda i: (i, 0)),
                   pl.BlockSpec((TM, Di), lambda i: (i, 0))),
        compiler_params=pltpu.CompilerParams(
            dimension_semantics=("parallel",), vmem_limit_bytes=limit),
    )(x2d, g1, b1, w_in)


# ---------------------------------------------------------------------------
# Kernel 2: depthwise 3x3 conv (pre-padded input) + bias + SiLU
# TODO(synk): H-strip tiling with a 2-row halo for very large H*W*d_inner.
# ---------------------------------------------------------------------------
def dwconv_silu_kernel(xp_ref, w_ref, b_ref, o_ref):
    Hc, Wc, Cc = o_ref.shape
    w = w_ref[...]                                     # (9, C)
    # hoist the 3 sublane (kw) shifts; kh row selections from them are cheap
    cols = [xp_ref[:, kw:kw + Wc, :] for kw in range(3)]
    acc = jnp.zeros((Hc, Wc, Cc), jnp.float32) + b_ref[...]
    for kh in range(3):
        for kw in range(3):
            acc = acc + cols[kw][kh:kh + Hc] * w[kh * 3 + kw]
    o_ref[...] = acc * _sigmoid(acc)                   # SiLU


def dwconv_silu(x_pad, w9, bconv, H, W):
    B = x_pad.shape[0]
    D = x_pad.shape[-1]
    limit = _vmem_limit_bytes()
    return pl.pallas_call(
        dwconv_silu_kernel,
        out_shape=jax.ShapeDtypeStruct((B, H, W, D), jnp.float32),
        grid=(B,),
        in_specs=[
            pl.BlockSpec((None, H + 2, W + 2, D), lambda b: (b, 0, 0, 0)),
            _const_spec((9, D), lambda b: (0, 0)),
            pl.BlockSpec((1, D), lambda b: (0, 0)),
        ],
        out_specs=pl.BlockSpec((None, H, W, D), lambda b: (b, 0, 0, 0)),
        compiler_params=pltpu.CompilerParams(
            dimension_semantics=("parallel",), vmem_limit_bytes=limit),
    )(x_pad, w9, bconv)


# ---------------------------------------------------------------------------
# Kernel 3: fused x_proj + dt_proj + selective scan, all 4 directions / batch
#
#   u0_ref   : (L, D)  row-major sequence (dirs 0 fwd / 2 rev)
#   u1_ref   : (L, D)  col-major sequence (dirs 1 fwd / 3 rev)
#   wp_ref   : (4, D, D+2N) bf16  [W_delta | W_B | W_C] packed per direction
#   a_ref    : (4, N, D)  f32   A.T per direction (A = -exp(A_logs))
#   dv_ref   : (4, 1, D)  f32   Ds
#   bias_ref : (4, 1, D)  f32   dt_projs_bias
#   y0/y1    : (L, D)  merged fwd+rev scan outputs per layout (incl. D*u)
#   scratches: delta (4,Lc,D), B (4,Lc,N), C (4,Lc,N)  -- no (L,N,D) buffers
# ---------------------------------------------------------------------------
def ss_scan_kernel(u0_ref, u1_ref, wp_ref, a_ref, dv_ref, bias_ref,
                   y0_ref, y1_ref, delta_ref, bm_ref, cm_ref, *, Lc, R):
    L, D = u0_ref.shape
    N = a_ref.shape[1]
    NC = L // Lc
    NB = Lc // R
    u_refs = (u0_ref, u1_ref)
    y_refs = (y0_ref, y1_ref)

    a_vals = [a_ref[k] for k in range(4)]              # (N, D) each, hoisted

    # --- init outputs with the skip term D*u (fwd+rev per layout) ---
    y0_ref[...] = u0_ref[...] * (dv_ref[0] + dv_ref[2])
    y1_ref[...] = u1_ref[...] * (dv_ref[1] + dv_ref[3])

    def chunk_body(c, hs):
        starts = []
        # ---- prologue: ONE packed MXU matmul per direction ----
        for k in range(4):
            s = k % 2
            start = c * Lc if k < 2 else (NC - 1 - c) * Lc
            start = _hint(start, Lc)
            starts.append(start)
            u = u_refs[s][pl.ds(start, Lc), :]                       # (Lc, D)
            res = jnp.dot(u.astype(jnp.bfloat16), wp_ref[k],
                          preferred_element_type=jnp.float32)        # (Lc, D+2N)
            delta_ref[k] = _softplus(res[:, :D] + bias_ref[k])
            bm_ref[k] = res[:, D:D + N]
            cm_ref[k] = res[:, D + N:]

        # ---- recurrence in blocks of R steps, all 4 directions per iter ----
        def block_body(bi, hs):
            t0 = bi * R
            new_hs = list(hs)
            for k in range(4):
                s = k % 2
                rev = k >= 2
                local0 = t0 if not rev else Lc - R - t0
                local0 = _hint(local0, R)
                row0 = _hint(starts[k] + local0, R)
                d_blk = delta_ref[k, pl.ds(local0, R), :]             # (R, D)
                b_blk = bm_ref[k, pl.ds(local0, R), :]                # (R, N)
                c_blk = cm_ref[k, pl.ds(local0, R), :]                # (R, N)
                u_blk = u_refs[s][pl.ds(row0, R), :]                  # (R, D)
                dA = jnp.exp(d_blk[:, None, :] * a_vals[k])           # (R, N, D)
                dBu = (d_blk * u_blk)[:, None, :] * b_blk[:, :, None]  # (R,N,D)
                h = new_hs[k]
                steps = []
                order = range(R) if not rev else range(R - 1, -1, -1)
                for r in order:
                    h = dA[r] * h + dBu[r]
                    steps.append(h)
                if rev:
                    steps = steps[::-1]
                hb = jnp.stack(steps, axis=0)                          # (R, N, D)
                yb = jnp.sum(hb * c_blk[:, :, None], axis=1)           # (R, D)
                rows = pl.ds(row0, R)
                y_refs[s][rows, :] = y_refs[s][rows, :] + yb
                new_hs[k] = h
            return tuple(new_hs)

        return lax.fori_loop(0, NB, block_body, hs)

    h_init = tuple(jnp.zeros((N, D), jnp.float32) for _ in range(4))
    if NC == 1:
        chunk_body(0, h_init)          # fully static chunk indexing
    else:
        lax.fori_loop(0, NC, chunk_body, h_init)


def ss_scan(u_row, u_col, w_pack, A_t, D_t, dt_bias):
    B, L, D = u_row.shape
    K, _, P = w_pack.shape
    N = A_t.shape[1]
    limit = _vmem_limit_bytes()
    io_bytes = (4 * 2 * L * D * 4            # u0/u1/y0/y1 double-buffered
                + K * D * P * 2 + K * N * D * 4 + 2 * K * D * 4)
    budget = max(limit - io_bytes - (8 << 20), 2 << 20)
    Lc = _pick_scan_chunk(L, D, N, budget)
    R = next(r for r in (8, 4, 2, 1) if Lc % r == 0)
    kernel = partial(ss_scan_kernel, Lc=Lc, R=R)
    return pl.pallas_call(
        kernel,
        out_shape=(jax.ShapeDtypeStruct((B, L, D), jnp.float32),
                   jax.ShapeDtypeStruct((B, L, D), jnp.float32)),
        grid=(B,),
        in_specs=[
            pl.BlockSpec((None, L, D), lambda b: (b, 0, 0)),
            pl.BlockSpec((None, L, D), lambda b: (b, 0, 0)),
            _const_spec((K, D, P), lambda b: (0, 0, 0)),
            _const_spec((K, N, D), lambda b: (0, 0, 0)),
            _const_spec((K, 1, D), lambda b: (0, 0, 0)),
            _const_spec((K, 1, D), lambda b: (0, 0, 0)),
        ],
        out_specs=(pl.BlockSpec((None, L, D), lambda b: (b, 0, 0)),
                   pl.BlockSpec((None, L, D), lambda b: (b, 0, 0))),
        scratch_shapes=[
            pltpu.VMEM((K, Lc, D), jnp.float32),   # softplus(delta)
            pltpu.VMEM((K, Lc, N), jnp.float32),   # B projection
            pltpu.VMEM((K, Lc, N), jnp.float32),   # C projection
        ],
        compiler_params=pltpu.CompilerParams(
            dimension_semantics=("parallel",),
            vmem_limit_bytes=limit),
    )(u_row, u_col, w_pack, A_t, D_t, dt_bias)


# ---------------------------------------------------------------------------
# Kernel 4: out_norm LN (eps=1e-5) + (y_row + y_col) + y*silu(z) + out_proj
#           + residual add, tiled over B*L rows
# ---------------------------------------------------------------------------
def outnorm_gate_proj_kernel(y1_ref, y2_ref, z_ref, r_ref, g_ref, b_ref,
                             w_ref, o_ref):
    y = y1_ref[...] + y2_ref[...]                      # merge the two layouts
    mu = jnp.mean(y, axis=-1, keepdims=True)
    yc = y - mu
    var = jnp.mean(yc * yc, axis=-1, keepdims=True)
    yn = yc * lax.rsqrt(var + 1e-5) * g_ref[...] + b_ref[...]
    z = z_ref[...]
    gated = yn * (z * _sigmoid(z))
    o_ref[...] = (jnp.dot(gated.astype(jnp.bfloat16), w_ref[...],
                          preferred_element_type=jnp.float32) + r_ref[...])


def outnorm_gate_proj(y1, y2, z2d, res2d, g2, b2, w_out):
    M, D = y1.shape
    C = w_out.shape[1]
    limit = _vmem_limit_bytes()
    TM = _pick_row_tile(M, (3 * D + 2 * C) * 4, limit)
    return pl.pallas_call(
        outnorm_gate_proj_kernel,
        out_shape=jax.ShapeDtypeStruct((M, C), jnp.float32),
        grid=(M // TM,),
        in_specs=[
            pl.BlockSpec((TM, D), lambda i: (i, 0)),
            pl.BlockSpec((TM, D), lambda i: (i, 0)),
            pl.BlockSpec((TM, D), lambda i: (i, 0)),
            pl.BlockSpec((TM, C), lambda i: (i, 0)),
            pl.BlockSpec((1, D), lambda i: (0, 0)),
            pl.BlockSpec((1, D), lambda i: (0, 0)),
            _const_spec((D, C), lambda i: (0, 0)),
        ],
        out_specs=pl.BlockSpec((TM, C), lambda i: (i, 0)),
        compiler_params=pltpu.CompilerParams(
            dimension_semantics=("parallel",), vmem_limit_bytes=limit),
    )(y1, y2, z2d, res2d, g2, b2, w_out)


# ---------------------------------------------------------------------------
# VSSBlock forward (channels-last glue around the kernels)
# ---------------------------------------------------------------------------
def vss_block_forward(x, params):
    B, H, W, C = x.shape
    L = H * W
    d_inner = params["w_out"].shape[0]

    x_flat = x.reshape(B * L, C).astype(jnp.float32)

    # ln_1 + in_proj -> x, z (two outputs, no slice copies)
    x_in2d, z2d = ln_inproj(x_flat, params["ln1_g"], params["ln1_b"],
                            params["w_in"])

    # depthwise conv 3x3 (padding=1) + SiLU (NHWC)
    x_hw = x_in2d.reshape(B, H, W, d_inner)
    x_pad = jnp.pad(x_hw, ((0, 0), (1, 1), (1, 1), (0, 0)))
    x_conv = dwconv_silu(x_pad, params["conv_w"], params["conv_b"], H, W)

    # row-major and col-major scan inputs; reverse directions are in-kernel.
    u_row = x_conv.reshape(B, L, d_inner)
    u_col = jnp.transpose(x_conv, (0, 2, 1, 3)).reshape(B, L, d_inner)

    y_row, y_col = ss_scan(u_row, u_col, params["w_pack"],
                           params["A_t"], params["D_t"], params["dt_bias"])

    # col-major results back to row-major; the add is fused into kernel 4
    y_colr = jnp.transpose(y_col.reshape(B, W, H, d_inner),
                           (0, 2, 1, 3)).reshape(B * L, d_inner)

    out = outnorm_gate_proj(y_row.reshape(B * L, d_inner), y_colr, z2d,
                            x_flat, params["ln2_g"], params["ln2_b"],
                            params["w_out"])
    return out.reshape(B, H, W, C)


# ---------------------------------------------------------------------------
# Deterministic parameter init (shapes follow SS2D.__init__; no checkpoint)
# ---------------------------------------------------------------------------
def init_params(key, d_model, d_state=8, d_conv=3, expand=2):
    d_inner = int(expand * d_model)
    dt_rank = math.ceil(d_model / 16)
    K = 4
    keys = jax.random.split(key, 7)

    k_in = 1.0 / math.sqrt(d_model)
    w_in = jax.random.uniform(keys[0], (d_model, 2 * d_inner), jnp.float32,
                              -k_in, k_in)

    k_conv = 1.0 / math.sqrt(d_conv * d_conv)
    conv_w = jax.random.uniform(keys[1], (9, d_inner), jnp.float32, -k_conv, k_conv)
    conv_b = jax.random.uniform(keys[2], (1, d_inner), jnp.float32, -k_conv, k_conv)

    k_x = 1.0 / math.sqrt(d_inner)
    xproj_t = jax.random.uniform(keys[3], (K, d_inner, dt_rank + 2 * d_state),
                                 jnp.float32, -k_x, k_x)     # x_proj_weight[k].T

    dt_init_std = dt_rank ** (-0.5)
    dtw_t = jax.random.uniform(keys[4], (K, dt_rank, d_inner), jnp.float32,
                               -dt_init_std, dt_init_std)    # dt_projs_weight[k].T

    dt_min, dt_max = 1e-3, 1e-1
    dt = jnp.exp(jax.random.uniform(keys[5], (K, 1, d_inner)) *
                 (math.log(dt_max) - math.log(dt_min)) + math.log(dt_min))
    dt = jnp.clip(dt, 1e-4)
    dt_bias = dt + jnp.log(-jnp.expm1(-dt))       # inverse-softplus of dt

    # A_logs = log(arange(1..N)) per channel; A = -exp(A_logs)
    A = -jnp.exp(jnp.log(jnp.arange(1, d_state + 1, dtype=jnp.float32)))   # (N,)
    A_t = jnp.broadcast_to(A[None, :, None], (K, d_state, d_inner))
    D_t = jnp.ones((K, 1, d_inner), jnp.float32)

    k_out = 1.0 / math.sqrt(d_inner)
    w_out = jax.random.uniform(keys[6], (d_inner, d_model), jnp.float32,
                               -k_out, k_out)

    # fold dt_proj into x_proj (delta path) and pack [W_delta | W_B | W_C]
    # per direction into a single bf16 matmul weight (accumulation stays f32).
    w_delta = jnp.einsum('kdr,kre->kde', xproj_t[:, :, :dt_rank], dtw_t)
    w_B = xproj_t[:, :, dt_rank:dt_rank + d_state]
    w_C = xproj_t[:, :, dt_rank + d_state:]
    w_pack = jnp.concatenate([w_delta, w_B, w_C], axis=-1)   # (K, D, D+2N)

    return dict(
        ln1_g=jnp.ones((1, d_model), jnp.float32),
        ln1_b=jnp.zeros((1, d_model), jnp.float32),
        w_in=w_in.astype(jnp.bfloat16),
        conv_w=conv_w, conv_b=conv_b,
        w_pack=w_pack.astype(jnp.bfloat16),
        A_t=A_t, D_t=D_t, dt_bias=dt_bias,
        ln2_g=jnp.ones((1, d_inner), jnp.float32),
        ln2_b=jnp.zeros((1, d_inner), jnp.float32),
        w_out=w_out.astype(jnp.bfloat16),
    )


if __name__ == "__main__":
    key = jax.random.PRNGKey(0)
    B, H, W, C = 2, 8, 8, 16          # hidden_dim = 16, d_state = 8 -> d_inner = 32
    k_params, k_x = jax.random.split(key)
    params = init_params(k_params, d_model=C, d_state=8)
    x = jax.random.normal(k_x, (B, H, W, C), jnp.float32)

    fwd = jax.jit(vss_block_forward)
    out = jax.block_until_ready(fwd(x, params))

    assert out.shape == (B, H, W, C)
    assert bool(jnp.all(jnp.isfinite(out)))
    print("KERNEL_OK")
</pallas_src>

<mosaic_0001>
module attributes {stable_mosaic.version = 11 : i64} {
  func.func @dwconv_silu_kernel(%arg0: i32, %arg1: memref<1x10x10x32xf32, #tpu.memory_space<vmem>>, %arg2: memref<9x32xf32, #tpu.memory_space<vmem>>, %arg3: memref<1x32xf32, #tpu.memory_space<vmem>>, %arg4: memref<1x8x8x32xf32, #tpu.memory_space<vmem>>) attributes {dimension_semantics = [#tpu.dimension_semantics<parallel>], iteration_bounds = array<i64: 2>, scalar_prefetch = 0 : i64, scratch_operands = 0 : i64, tpu.core_type = #tpu.core_type<tc>, window_params = [{transform_indices = @transform_0, window_bounds = array<i64: 1, 10, 10, 32>}, {pipeline_mode = #tpu.pipeline_mode<synchronous>, transform_indices = @transform_1, window_bounds = array<i64: 9, 32>}, {pipeline_mode = #tpu.pipeline_mode<synchronous>, transform_indices = @transform_2, window_bounds = array<i64: 1, 32>}, {transform_indices = @transform_3, window_bounds = array<i64: 1, 8, 8, 32>}]} {
    %c0 = arith.constant 0 : index
    %c0_0 = arith.constant 0 : index
    %0 = vector.load %arg2[%c0, %c0_0] : memref<9x32xf32, #tpu.memory_space<vmem>>, vector<9x32xf32>
    %c0_1 = arith.constant 0 : index
    %c0_2 = arith.constant 0 : index
    %c0_3 = arith.constant 0 : index
    %c0_4 = arith.constant 0 : index
    %1 = vector.load %arg1[%c0_1, %c0_2, %c0_3, %c0_4] : memref<1x10x10x32xf32, #tpu.memory_space<vmem>>, vector<1x10x8x32xf32>
    %2 = vector.shape_cast %1 : vector<1x10x8x32xf32> to vector<10x8x32xf32>
    %c0_5 = arith.constant 0 : index
    %c0_6 = arith.constant 0 : index
    %c1 = arith.constant 1 : index
    %c0_7 = arith.constant 0 : index
    %3 = vector.load %arg1[%c0_5, %c0_6, %c1, %c0_7] : memref<1x10x10x32xf32, #tpu.memory_space<vmem>>, vector<1x10x8x32xf32>
    %4 = vector.shape_cast %3 : vector<1x10x8x32xf32> to vector<10x8x32xf32>
    %c0_8 = arith.constant 0 : index
    %c0_9 = arith.constant 0 : index
    %c2 = arith.constant 2 : index
    %c0_10 = arith.constant 0 : index
    %5 = vector.load %arg1[%c0_8, %c0_9, %c2, %c0_10] : memref<1x10x10x32xf32, #tpu.memory_space<vmem>>, vector<1x10x8x32xf32>
    %6 = vector.shape_cast %5 : vector<1x10x8x32xf32> to vector<10x8x32xf32>
    %cst = arith.constant 0.000000e+00 : f32
    %7 = vector.broadcast %cst : f32 to vector<8x8x32xf32>
    %c0_11 = arith.constant 0 : index
    %c0_12 = arith.constant 0 : index
    %8 = vector.load %arg3[%c0_11, %c0_12] : memref<1x32xf32, #tpu.memory_space<vmem>>, vector<1x32xf32>
    %9 = vector.shape_cast %8 : vector<1x32xf32> to vector<1x1x32xf32>
    %10 = vector.broadcast %9 : vector<1x1x32xf32> to vector<8x8x32xf32>
    %11 = arith.addf %7, %10 : vector<8x8x32xf32>
    %12 = vector.extract_strided_slice %2 {offsets = [0, 0, 0], sizes = [8, 8, 32], strides = [1, 1, 1]} : vector<10x8x32xf32> to vector<8x8x32xf32>
    %13 = vector.extract_strided_slice %0 {offsets = [0, 0], sizes = [1, 32], strides = [1, 1]} : vector<9x32xf32> to vector<1x32xf32>
    %14 = vector.shape_cast %13 : vector<1x32xf32> to vector<32xf32>
    %15 = vector.shape_cast %14 : vector<32xf32> to vector<1x1x32xf32>
    %16 = vector.broadcast %15 : vector<1x1x32xf32> to vector<8x8x32xf32>
    %17 = arith.mulf %12, %16 : vector<8x8x32xf32>
    %18 = arith.addf %11, %17 : vector<8x8x32xf32>
    %19 = vector.extract_strided_slice %4 {offsets = [0, 0, 0], sizes = [8, 8, 32], strides = [1, 1, 1]} : vector<10x8x32xf32> to vector<8x8x32xf32>
    %20 = vector.extract_strided_slice %0 {offsets = [1, 0], sizes = [1, 32], strides = [1, 1]} : vector<9x32xf32> to vector<1x32xf32>
    %21 = vector.shape_cast %20 : vector<1x32xf32> to vector<32xf32>
    %22 = vector.shape_cast %21 : vector<32xf32> to vector<1x1x32xf32>
    %23 = vector.broadcast %22 : vector<1x1x32xf32> to vector<8x8x32xf32>
    %24 = arith.mulf %19, %23 : vector<8x8x32xf32>
    %25 = arith.addf %18, %24 : vector<8x8x32xf32>
    %26 = vector.extract_strided_slice %6 {offsets = [0, 0, 0], sizes = [8, 8, 32], strides = [1, 1, 1]} : vector<10x8x32xf32> to vector<8x8x32xf32>
    %27 = vector.extract_strided_slice %0 {offsets = [2, 0], sizes = [1, 32], strides = [1, 1]} : vector<9x32xf32> to vector<1x32xf32>
    %28 = vector.shape_cast %27 : vector<1x32xf32> to vector<32xf32>
    %29 = vector.shape_cast %28 : vector<32xf32> to vector<1x1x32xf32>
    %30 = vector.broadcast %29 : vector<1x1x32xf32> to vector<8x8x32xf32>
    %31 = arith.mulf %26, %30 : vector<8x8x32xf32>
    %32 = arith.addf %25, %31 : vector<8x8x32xf32>
    %33 = vector.extract_strided_slice %2 {offsets = [1, 0, 0], sizes = [8, 8, 32], strides = [1, 1, 1]} : vector<10x8x32xf32> to vector<8x8x32xf32>
    %34 = vector.extract_strided_slice %0 {offsets = [3, 0], sizes = [1, 32], strides = [1, 1]} : vector<9x32xf32> to vector<1x32xf32>
    %35 = vector.shape_cast %34 : vector<1x32xf32> to vector<32xf32>
    %36 = vector.shape_cast %35 : vector<32xf32> to vector<1x1x32xf32>
    %37 = vector.broadcast %36 : vector<1x1x32xf32> to vector<8x8x32xf32>
    %38 = arith.mulf %33, %37 : vector<8x8x32xf32>
    %39 = arith.addf %32, %38 : vector<8x8x32xf32>
    %40 = vector.extract_strided_slice %4 {offsets = [1, 0, 0], sizes = [8, 8, 32], strides = [1, 1, 1]} : vector<10x8x32xf32> to vector<8x8x32xf32>
    %41 = vector.extract_strided_slice %0 {offsets = [4, 0], sizes = [1, 32], strides = [1, 1]} : vector<9x32xf32> to vector<1x32xf32>
    %42 = vector.shape_cast %41 : vector<1x32xf32> to vector<32xf32>
    %43 = vector.shape_cast %42 : vector<32xf32> to vector<1x1x32xf32>
    %44 = vector.broadcast %43 : vector<1x1x32xf32> to vector<8x8x32xf32>
    %45 = arith.mulf %40, %44 : vector<8x8x32xf32>
    %46 = arith.addf %39, %45 : vector<8x8x32xf32>
    %47 = vector.extract_strided_slice %6 {offsets = [1, 0, 0], sizes = [8, 8, 32], strides = [1, 1, 1]} : vector<10x8x32xf32> to vector<8x8x32xf32>
    %48 = vector.extract_strided_slice %0 {offsets = [5, 0], sizes = [1, 32], strides = [1, 1]} : vector<9x32xf32> to vector<1x32xf32>
    %49 = vector.shape_cast %48 : vector<1x32xf32> to vector<32xf32>
    %50 = vector.shape_cast %49 : vector<32xf32> to vector<1x1x32xf32>
    %51 = vector.broadcast %50 : vector<1x1x32xf32> to vector<8x8x32xf32>
    %52 = arith.mulf %47, %51 : vector<8x8x32xf32>
    %53 = arith.addf %46, %52 : vector<8x8x32xf32>
    %54 = vector.extract_strided_slice %2 {offsets = [2, 0, 0], sizes = [8, 8, 32], strides = [1, 1, 1]} : vector<10x8x32xf32> to vector<8x8x32xf32>
    %55 = vector.extract_strided_slice %0 {offsets = [6, 0], sizes = [1, 32], strides = [1, 1]} : vector<9x32xf32> to vector<1x32xf32>
    %56 = vector.shape_cast %55 : vector<1x32xf32> to vector<32xf32>
    %57 = vector.shape_cast %56 : vector<32xf32> to vector<1x1x32xf32>
    %58 = vector.broadcast %57 : vector<1x1x32xf32> to vector<8x8x32xf32>
    %59 = arith.mulf %54, %58 : vector<8x8x32xf32>
    %60 = arith.addf %53, %59 : vector<8x8x32xf32>
    %61 = vector.extract_strided_slice %4 {offsets = [2, 0, 0], sizes = [8, 8, 32], strides = [1, 1, 1]} : vector<10x8x32xf32> to vector<8x8x32xf32>
    %62 = vector.extract_strided_slice %0 {offsets = [7, 0], sizes = [1, 32], strides = [1, 1]} : vector<9x32xf32> to vector<1x32xf32>
    %63 = vector.shape_cast %62 : vector<1x32xf32> to vector<32xf32>
    %64 = vector.shape_cast %63 : vector<32xf32> to vector<1x1x32xf32>
    %65 = vector.broadcast %64 : vector<1x1x32xf32> to vector<8x8x32xf32>
    %66 = arith.mulf %61, %65 : vector<8x8x32xf32>
    %67 = arith.addf %60, %66 : vector<8x8x32xf32>
    %68 = vector.extract_strided_slice %6 {offsets = [2, 0, 0], sizes = [8, 8, 32], strides = [1, 1, 1]} : vector<10x8x32xf32> to vector<8x8x32xf32>
    %69 = vector.extract_strided_slice %0 {offsets = [8, 0], sizes = [1, 32], strides = [1, 1]} : vector<9x32xf32> to vector<1x32xf32>
    %70 = vector.shape_cast %69 : vector<1x32xf32> to vector<32xf32>
    %71 = vector.shape_cast %70 : vector<32xf32> to vector<1x1x32xf32>
    %72 = vector.broadcast %71 : vector<1x1x32xf32> to vector<8x8x32xf32>
    %73 = arith.mulf %68, %72 : vector<8x8x32xf32>
    %74 = arith.addf %67, %73 : vector<8x8x32xf32>
    %cst_13 = arith.constant 0.000000e+00 : f32
    %75 = vector.broadcast %cst_13 : f32 to vector<8x8x32xf32>
    %76 = arith.subf %75, %74 : vector<8x8x32xf32>
    %77 = math.exp %76 : vector<8x8x32xf32>
    %cst_14 = arith.constant 1.000000e+00 : f32
    %78 = vector.broadcast %cst_14 : f32 to vector<8x8x32xf32>
    %79 = arith.addf %78, %77 : vector<8x8x32xf32>
    %cst_15 = arith.constant 1.000000e+00 : f32
    %80 = vector.broadcast %cst_15 : f32 to vector<8x8x32xf32>
    %81 = arith.divf %80, %79 : vector<8x8x32xf32>
    %82 = arith.mulf %74, %81 : vector<8x8x32xf32>
    %c0_16 = arith.constant 0 : index
    %c0_17 = arith.constant 0 : index
    %c0_18 = arith.constant 0 : index
    %c0_19 = arith.constant 0 : index
    %83 = vector.load %arg4[%c0_16, %c0_17, %c0_18, %c0_19] : memref<1x8x8x32xf32, #tpu.memory_space<vmem>>, vector<1x8x8x32xf32>
    %84 = vector.shape_cast %83 : vector<1x8x8x32xf32> to vector<8x8x32xf32>
    %85 = vector.shape_cast %82 : vector<8x8x32xf32> to vector<1x8x8x32xf32>
    tpu.vector_store %arg4[%c0_16, %c0_17, %c0_18, %c0_19], %85 {strides = array<i32>} : memref<1x8x8x32xf32, #tpu.memory_space<vmem>>, vector<1x8x8x32xf32>,
    return
  }
  func.func @transform_0(%arg0: i32) -> (i32, i32, i32, i32) {
    %c0_i32 = arith.constant 0 : i32
    %c0_i32_0 = arith.constant 0 : i32
    %c0_i32_1 = arith.constant 0 : i32
    %c0_i32_2 = arith.constant 0 : i32
    return %arg0, %c0_i32, %c0_i32_0, %c0_i32_1 : i32, i32, i32, i32
  }
  func.func @transform_1(%arg0: i32) -> (i32, i32) {
    %c0_i32 = arith.constant 0 : i32
    %c0_i32_0 = arith.constant 0 : i32
    %c0_i32_1 = arith.constant 0 : i32
    return %c0_i32, %c0_i32_0 : i32, i32
  }
  func.func @transform_2(%arg0: i32) -> (i32, i32) {
    %c0_i32 = arith.constant 0 : i32
    %c0_i32_0 = arith.constant 0 : i32
    %c0_i32_1 = arith.constant 0 : i32
    return %c0_i32, %c0_i32_0 : i32, i32
  }
  func.func @transform_3(%arg0: i32) -> (i32, i32, i32, i32) {
    %c0_i32 = arith.constant 0 : i32
    %c0_i32_0 = arith.constant 0 : i32
    %c0_i32_1 = arith.constant 0 : i32
    %c0_i32_2 = arith.constant 0 : i32
    return %arg0, %c0_i32, %c0_i32_0, %c0_i32_1 : i32, i32, i32, i32
  }
}

module attributes {stable_mosaic.version = 11 : i64} {
  func.func @ln_inproj_kernel(%arg0: i32, %arg1: memref<128x16xf32, #tpu.memory_space<vmem>>, %arg2: memref<1x16xf32, #tpu.memory_space<vmem>>, %arg3: memref<1x16xf32, #tpu.memory_space<vmem>>, %arg4: memref<16x64xbf16, #tpu.memory_space<vmem>>, %arg5: memref<128x32xf32, #tpu.memory_space<vmem>>, %arg6: memref<128x32xf32, #tpu.memory_space<vmem>>) attributes {dimension_semantics = [#tpu.dimension_semantics<parallel>], iteration_bounds = array<i64: 1>, scalar_prefetch = 0 : i64, scratch_operands = 0 : i64, tpu.core_type = #tpu.core_type<tc>, window_params = [{transform_indices = @transform_0, window_bounds = array<i64: 128, 16>}, {pipeline_mode = #tpu.pipeline_mode<synchronous>, transform_indices = @transform_1, window_bounds = array<i64: 1, 16>}, {pipeline_mode = #tpu.pipeline_mode<synchronous>, transform_indices = @transform_2, window_bounds = array<i64: 1, 16>}, {pipeline_mode = #tpu.pipeline_mode<synchronous>, transform_indices = @transform_3, window_bounds = array<i64: 16, 64>}, {transform_indices = @transform_4, window_bounds = array<i64: 128, 32>}, {transform_indices = @transform_5, window_bounds = array<i64: 128, 32>}]} {
    %c0 = arith.constant 0 : index
    %c0_0 = arith.constant 0 : index
    %0 = vector.load %arg1[%c0, %c0_0] : memref<128x16xf32, #tpu.memory_space<vmem>>, vector<128x16xf32>
    %cst = arith.constant dense<0.000000e+00> : vector<128xf32>
    %1 = vector.multi_reduction <add>, %0, %cst [1] : vector<128x16xf32> to vector<128xf32>
    %2 = vector.shape_cast %1 : vector<128xf32> to vector<128x1xf32>
    %cst_1 = arith.constant 1.600000e+01 : f32
    %3 = vector.broadcast %cst_1 : f32 to vector<128x1xf32>
    %4 = arith.divf %2, %3 : vector<128x1xf32>
    %5 = vector.broadcast %4 : vector<128x1xf32> to vector<128x16xf32>
    %6 = arith.subf %0, %5 : vector<128x16xf32>
    %7 = arith.mulf %6, %6 : vector<128x16xf32>
    %cst_2 = arith.constant dense<0.000000e+00> : vector<128xf32>
    %8 = vector.multi_reduction <add>, %7, %cst_2 [1] : vector<128x16xf32> to vector<128xf32>
    %9 = vector.shape_cast %8 : vector<128xf32> to vector<128x1xf32>
    %cst_3 = arith.constant 1.600000e+01 : f32
    %10 = vector.broadcast %cst_3 : f32 to vector<128x1xf32>
    %11 = arith.divf %9, %10 : vector<128x1xf32>
    %cst_4 = arith.constant 9.99999997E-7 : f32
    %12 = vector.broadcast %cst_4 : f32 to vector<128x1xf32>
    %13 = arith.addf %11, %12 : vector<128x1xf32>
    %14 = math.rsqrt %13 : vector<128x1xf32>
    %15 = vector.broadcast %14 : vector<128x1xf32> to vector<128x16xf32>
    %16 = arith.mulf %6, %15 : vector<128x16xf32>
    %c0_5 = arith.constant 0 : index
    %c0_6 = arith.constant 0 : index
    %17 = vector.load %arg2[%c0_5, %c0_6] : memref<1x16xf32, #tpu.memory_space<vmem>>, vector<1x16xf32>
    %18 = vector.broadcast %17 : vector<1x16xf32> to vector<128x16xf32>
    %19 = arith.mulf %16, %18 : vector<128x16xf32>
    %c0_7 = arith.constant 0 : index
    %c0_8 = arith.constant 0 : index
    %20 = vector.load %arg3[%c0_7, %c0_8] : memref<1x16xf32, #tpu.memory_space<vmem>>, vector<1x16xf32>
    %21 = vector.broadcast %20 : vector<1x16xf32> to vector<128x16xf32>
    %22 = arith.addf %19, %21 : vector<128x16xf32>
    %23 = arith.truncf %22 : vector<128x16xf32> to vector<128x16xbf16>
    %c0_9 = arith.constant 0 : index
    %c0_10 = arith.constant 0 : index
    %24 = vector.load %arg4[%c0_9, %c0_10] : memref<16x64xbf16, #tpu.memory_space<vmem>>, vector<16x64xbf16>
    %cst_11 = arith.constant dense<0.000000e+00> : vector<128x64xf32>
    %25 = tpu.matmul %23, %24, %cst_11 {dimension_numbers = #tpu.dot_dimension_numbers<[1], [0], [0], [1], [0, 0, 1, 1], [], []>} : vector<128x16xbf16>, vector<16x64xbf16>, vector<128x64xf32> -> vector<128x64xf32>
    %26 = vector.extract_strided_slice %25 {offsets = [0, 0], sizes = [128, 32], strides = [1, 1]} : vector<128x64xf32> to vector<128x32xf32>
    %c0_12 = arith.constant 0 : index
    %c0_13 = arith.constant 0 : index
    %27 = vector.load %arg5[%c0_12, %c0_13] : memref<128x32xf32, #tpu.memory_space<vmem>>, vector<128x32xf32>
    tpu.vector_store %arg5[%c0_12, %c0_13], %26 {strides = array<i32>} : memref<128x32xf32, #tpu.memory_space<vmem>>, vector<128x32xf32>,
    %28 = vector.extract_strided_slice %25 {offsets = [0, 32], sizes = [128, 32], strides = [1, 1]} : vector<128x64xf32> to vector<128x32xf32>
    %c0_14 = arith.constant 0 : index
    %c0_15 = arith.constant 0 : index
    %29 = vector.load %arg6[%c0_14, %c0_15] : memref<128x32xf32, #tpu.memory_space<vmem>>, vector<128x32xf32>
    tpu.vector_store %arg6[%c0_14, %c0_15], %28 {strides = array<i32>} : memref<128x32xf32, #tpu.memory_space<vmem>>, vector<128x32xf32>,
    return
  }
  func.func @transform_0(%arg0: i32) -> (i32, i32) {
    %c0_i32 = arith.constant 0 : i32
    %c0_i32_0 = arith.constant 0 : i32
    return %arg0, %c0_i32 : i32, i32
  }
  func.func @transform_1(%arg0: i32) -> (i32, i32) {
    %c0_i32 = arith.constant 0 : i32
    %c0_i32_0 = arith.constant 0 : i32
    %c0_i32_1 = arith.constant 0 : i32
    return %c0_i32, %c0_i32_0 : i32, i32
  }
  func.func @transform_2(%arg0: i32) -> (i32, i32) {
    %c0_i32 = arith.constant 0 : i32
    %c0_i32_0 = arith.constant 0 : i32
    %c0_i32_1 = arith.constant 0 : i32
    return %c0_i32, %c0_i32_0 : i32, i32
  }
  func.func @transform_3(%arg0: i32) -> (i32, i32) {
    %c0_i32 = arith.constant 0 : i32
    %c0_i32_0 = arith.constant 0 : i32
    %c0_i32_1 = arith.constant 0 : i32
    return %c0_i32, %c0_i32_0 : i32, i32
  }
  func.func @transform_4(%arg0: i32) -> (i32, i32) {
    %c0_i32 = arith.constant 0 : i32
    %c0_i32_0 = arith.constant 0 : i32
    return %arg0, %c0_i32 : i32, i32
  }
  func.func @transform_5(%arg0: i32) -> (i32, i32) {
    %c0_i32 = arith.constant 0 : i32
    %c0_i32_0 = arith.constant 0 : i32
    return %arg0, %c0_i32 : i32, i32
  }
}

module attributes {stable_mosaic.version = 11 : i64} {
  func.func @ss_scan_kernel(%arg0: i32, %arg1: memref<1x64x32xf32, #tpu.memory_space<vmem>>, %arg2: memref<1x64x32xf32, #tpu.memory_space<vmem>>, %arg3: memref<4x32x48xbf16, #tpu.memory_space<vmem>>, %arg4: memref<4x8x32xf32, #tpu.memory_space<vmem>>, %arg5: memref<4x1x32xf32, #tpu.memory_space<vmem>>, %arg6: memref<4x1x32xf32, #tpu.memory_space<vmem>>, %arg7: memref<1x64x32xf32, #tpu.memory_space<vmem>>, %arg8: memref<1x64x32xf32, #tpu.memory_space<vmem>>, %arg9: memref<4x64x32xf32, #tpu.memory_space<vmem>>, %arg10: memref<4x64x8xf32, #tpu.memory_space<vmem>>, %arg11: memref<4x64x8xf32, #tpu.memory_space<vmem>>) attributes {dimension_semantics = [#tpu.dimension_semantics<parallel>], iteration_bounds = array<i64: 2>, scalar_prefetch = 0 : i64, scratch_operands = 3 : i64, tpu.core_type = #tpu.core_type<tc>, window_params = [{transform_indices = @transform_0, window_bounds = array<i64: 1, 64, 32>}, {transform_indices = @transform_1, window_bounds = array<i64: 1, 64, 32>}, {pipeline_mode = #tpu.pipeline_mode<synchronous>, transform_indices = @transform_2, window_bounds = array<i64: 4, 32, 48>}, {pipeline_mode = #tpu.pipeline_mode<synchronous>, transform_indices = @transform_3, window_bounds = array<i64: 4, 8, 32>}, {pipeline_mode = #tpu.pipeline_mode<synchronous>, transform_indices = @transform_4, window_bounds = array<i64: 4, 1, 32>}, {pipeline_mode = #tpu.pipeline_mode<synchronous>, transform_indices = @transform_5, window_bounds = array<i64: 4, 1, 32>}, {transform_indices = @transform_6, window_bounds = array<i64: 1, 64, 32>}, {transform_indices = @transform_7, window_bounds = array<i64: 1, 64, 32>}]} {
    %c0 = arith.constant 0 : index
    %c0_0 = arith.constant 0 : index
    %c0_1 = arith.constant 0 : index
    %0 = vector.load %arg4[%c0, %c0_0, %c0_1] : memref<4x8x32xf32, #tpu.memory_space<vmem>>, vector<1x8x32xf32>
    %1 = vector.shape_cast %0 : vector<1x8x32xf32> to vector<8x32xf32>
    %c1 = arith.constant 1 : index
    %c0_2 = arith.constant 0 : index
    %c0_3 = arith.constant 0 : index
    %2 = vector.load %arg4[%c1, %c0_2, %c0_3] : memref<4x8x32xf32, #tpu.memory_space<vmem>>, vector<1x8x32xf32>
    %3 = vector.shape_cast %2 : vector<1x8x32xf32> to vector<8x32xf32>
    %c2 = arith.constant 2 : index
    %c0_4 = arith.constant 0 : index
    %c0_5 = arith.constant 0 : index
    %4 = vector.load %arg4[%c2, %c0_4, %c0_5] : memref<4x8x32xf32, #tpu.memory_space<vmem>>, vector<1x8x32xf32>
    %5 = vector.shape_cast %4 : vector<1x8x32xf32> to vector<8x32xf32>
    %c3 = arith.constant 3 : index
    %c0_6 = arith.constant 0 : index
    %c0_7 = arith.constant 0 : index
    %6 = vector.load %arg4[%c3, %c0_6, %c0_7] : memref<4x8x32xf32, #tpu.memory_space<vmem>>, vector<1x8x32xf32>
    %7 = vector.shape_cast %6 : vector<1x8x32xf32> to vector<8x32xf32>
    %c0_8 = arith.constant 0 : index
    %c0_9 = arith.constant 0 : index
    %c0_10 = arith.constant 0 : index
    %8 = vector.load %arg1[%c0_8, %c0_9, %c0_10] : memref<1x64x32xf32, #tpu.memory_space<vmem>>, vector<1x64x32xf32>
    %9 = vector.shape_cast %8 : vector<1x64x32xf32> to vector<64x32xf32>
    %c0_11 = arith.constant 0 : index
    %c0_12 = arith.constant 0 : index
    %c0_13 = arith.constant 0 : index
    %10 = vector.load %arg5[%c0_11, %c0_12, %c0_13] : memref<4x1x32xf32, #tpu.memory_space<vmem>>, vector<1x1x32xf32>
    %11 = vector.shape_cast %10 : vector<1x1x32xf32> to vector<1x32xf32>
    %c2_14 = arith.constant 2 : index
    %c0_15 = arith.constant 0 : index
    %c0_16 = arith.constant 0 : index
    %12 = vector.load %arg5[%c2_14, %c0_15, %c0_16] : memref<4x1x32xf32, #tpu.memory_space<vmem>>, vector<1x1x32xf32>
    %13 = vector.shape_cast %12 : vector<1x1x32xf32> to vector<1x32xf32>
    %14 = arith.addf %11, %13 : vector<1x32xf32>
    %15 = vector.broadcast %14 : vector<1x32xf32> to vector<64x32xf32>
    %16 = arith.mulf %9, %15 : vector<64x32xf32>
    %c0_17 = arith.constant 0 : index
    %c0_18 = arith.constant 0 : index
    %c0_19 = arith.constant 0 : index
    %17 = vector.load %arg7[%c0_17, %c0_18, %c0_19] : memref<1x64x32xf32, #tpu.memory_space<vmem>>, vector<1x64x32xf32>
    %18 = vector.shape_cast %17 : vector<1x64x32xf32> to vector<64x32xf32>
    %19 = vector.shape_cast %16 : vector<64x32xf32> to vector<1x64x32xf32>
    tpu.vector_store %arg7[%c0_17, %c0_18, %c0_19], %19 {strides = array<i32>} : memref<1x64x32xf32, #tpu.memory_space<vmem>>, vector<1x64x32xf32>,
    %c0_20 = arith.constant 0 : index
    %c0_21 = arith.constant 0 : index
    %c0_22 = arith.constant 0 : index
    %20 = vector.load %arg2[%c0_20, %c0_21, %c0_22] : memref<1x64x32xf32, #tpu.memory_space<vmem>>, vector<1x64x32xf32>
    %21 = vector.shape_cast %20 : vector<1x64x32xf32> to vector<64x32xf32>
    %c1_23 = arith.constant 1 : index
    %c0_24 = arith.constant 0 : index
    %c0_25 = arith.constant 0 : index
    %22 = vector.load %arg5[%c1_23, %c0_24, %c0_25] : memref<4x1x32xf32, #tpu.memory_space<vmem>>, vector<1x1x32xf32>
    %23 = vector.shape_cast %22 : vector<1x1x32xf32> to vector<1x32xf32>
    %c3_26 = arith.constant 3 : index
    %c0_27 = arith.constant 0 : index
    %c0_28 = arith.constant 0 : index
    %24 = vector.load %arg5[%c3_26, %c0_27, %c0_28] : memref<4x1x32xf32, #tpu.memory_space<vmem>>, vector<1x1x32xf32>
    %25 = vector.shape_cast %24 : vector<1x1x32xf32> to vector<1x32xf32>
    %26 = arith.addf %23, %25 : vector<1x32xf32>
    %27 = vector.broadcast %26 : vector<1x32xf32> to vector<64x32xf32>
    %28 = arith.mulf %21, %27 : vector<64x32xf32>
    %c0_29 = arith.constant 0 : index
    %c0_30 = arith.constant 0 : index
    %c0_31 = arith.constant 0 : index
    %29 = vector.load %arg8[%c0_29, %c0_30, %c0_31] : memref<1x64x32xf32, #tpu.memory_space<vmem>>, vector<1x64x32xf32>
    %30 = vector.shape_cast %29 : vector<1x64x32xf32> to vector<64x32xf32>
    %31 = vector.shape_cast %28 : vector<64x32xf32> to vector<1x64x32xf32>
    tpu.vector_store %arg8[%c0_29, %c0_30, %c0_31], %31 {strides = array<i32>} : memref<1x64x32xf32, #tpu.memory_space<vmem>>, vector<1x64x32xf32>,
    %cst = arith.constant 0.000000e+00 : f32
    %32 = vector.broadcast %cst : f32 to vector<8x32xf32>
    %cst_32 = arith.constant 0.000000e+00 : f32
    %33 = vector.broadcast %cst_32 : f32 to vector<8x32xf32>
    %cst_33 = arith.constant 0.000000e+00 : f32
    %34 = vector.broadcast %cst_33 : f32 to vector<8x32xf32>
    %cst_34 = arith.constant 0.000000e+00 : f32
    %35 = vector.broadcast %cst_34 : f32 to vector<8x32xf32>
    %c0_35 = arith.constant 0 : index
    %c0_36 = arith.constant 0 : index
    %c0_37 = arith.constant 0 : index
    %36 = vector.load %arg1[%c0_35, %c0_36, %c0_37] : memref<1x64x32xf32, #tpu.memory_space<vmem>>, vector<1x64x32xf32>
    %37 = vector.shape_cast %36 : vector<1x64x32xf32> to vector<64x32xf32>
    %38 = arith.truncf %37 : vector<64x32xf32> to vector<64x32xbf16>
    %c0_38 = arith.constant 0 : index
    %c0_39 = arith.constant 0 : index
    %c0_40 = arith.constant 0 : index
    %39 = vector.load %arg3[%c0_38, %c0_39, %c0_40] : memref<4x32x48xbf16, #tpu.memory_space<vmem>>, vector<1x32x48xbf16>
    %40 = vector.shape_cast %39 : vector<1x32x48xbf16> to vector<32x48xbf16>
    %cst_41 = arith.constant dense<0.000000e+00> : vector<64x48xf32>
    %41 = tpu.matmul %38, %40, %cst_41 {dimension_numbers = #tpu.dot_dimension_numbers<[1], [0], [0], [1], [0, 0, 1, 1], [], []>} : vector<64x32xbf16>, vector<32x48xbf16>, vector<64x48xf32> -> vector<64x48xf32>
    %42 = vector.extract_strided_slice %41 {offsets = [0, 0], sizes = [64, 32], strides = [1, 1]} : vector<64x48xf32> to vector<64x32xf32>
    %c0_42 = arith.constant 0 : index
    %c0_43 = arith.constant 0 : index
    %c0_44 = arith.constant 0 : index
    %43 = vector.load %arg6[%c0_42, %c0_43, %c0_44] : memref<4x1x32xf32, #tpu.memory_space<vmem>>, vector<1x1x32xf32>
    %44 = vector.shape_cast %43 : vector<1x1x32xf32> to vector<1x32xf32>
    %45 = vector.broadcast %44 : vector<1x32xf32> to vector<64x32xf32>
    %46 = arith.addf %42, %45 : vector<64x32xf32>
    %cst_45 = arith.constant 0.000000e+00 : f32
    %47 = vector.broadcast %cst_45 : f32 to vector<64x32xf32>
    %48 = arith.maximumf %46, %47 : vector<64x32xf32>
    %49 = math.absf %46 : vector<64x32xf32>
    %cst_46 = arith.constant 0.000000e+00 : f32
    %50 = vector.broadcast %cst_46 : f32 to vector<64x32xf32>
    %51 = arith.subf %50, %49 : vector<64x32xf32>
    %52 = math.exp %51 : vector<64x32xf32>
    %cst_47 = arith.constant 1.000000e+00 : f32
    %53 = vector.broadcast %cst_47 : f32 to vector<64x32xf32>
    %54 = arith.addf %53, %52 : vector<64x32xf32>
    %55 = math.log %54 : vector<64x32xf32>
    %56 = arith.addf %48, %55 : vector<64x32xf32>
    %c0_48 = arith.constant 0 : index
    %c0_49 = arith.constant 0 : index
    %c0_50 = arith.constant 0 : index
    %57 = vector.load %arg9[%c0_48, %c0_49, %c0_50] : memref<4x64x32xf32, #tpu.memory_space<vmem>>, vector<1x64x32xf32>
    %58 = vector.shape_cast %57 : vector<1x64x32xf32> to vector<64x32xf32>
    %59 = vector.shape_cast %56 : vector<64x32xf32> to vector<1x64x32xf32>
    tpu.vector_store %arg9[%c0_48, %c0_49, %c0_50], %59 {strides = array<i32>} : memref<4x64x32xf32, #tpu.memory_space<vmem>>, vector<1x64x32xf32>,
    %60 = vector.extract_strided_slice %41 {offsets = [0, 32], sizes = [64, 8], strides = [1, 1]} : vector<64x48xf32> to vector<64x8xf32>
    %c0_51 = arith.constant 0 : index
    %c0_52 = arith.constant 0 : index
    %c0_53 = arith.constant 0 : index
    %61 = vector.load %arg10[%c0_51, %c0_52, %c0_53] : memref<4x64x8xf32, #tpu.memory_space<vmem>>, vector<1x64x8xf32>
    %62 = vector.shape_cast %61 : vector<1x64x8xf32> to vector<64x8xf32>
    %63 = vector.shape_cast %60 : vector<64x8xf32> to vector<1x64x8xf32>
    tpu.vector_store %arg10[%c0_51, %c0_52, %c0_53], %63 {strides = array<i32>} : memref<4x64x8xf32, #tpu.memory_space<vmem>>, vector<1x64x8xf32>,
    %64 = vector.extract_strided_slice %41 {offsets = [0, 40], sizes = [64, 8], strides = [1, 1]} : vector<64x48xf32> to vector<64x8xf32>
    %c0_54 = arith.constant 0 : index
    %c0_55 = arith.constant 0 : index
    %c0_56 = arith.constant 0 : index
    %65 = vector.load %arg11[%c0_54, %c0_55, %c0_56] : memref<4x64x8xf32, #tpu.memory_space<vmem>>, vector<1x64x8xf32>
    %66 = vector.shape_cast %65 : vector<1x64x8xf32> to vector<64x8xf32>
    %67 = vector.shape_cast %64 : vector<64x8xf32> to vector<1x64x8xf32>
    tpu.vector_store %arg11[%c0_54, %c0_55, %c0_56], %67 {strides = array<i32>} : memref<4x64x8xf32, #tpu.memory_space<vmem>>, vector<1x64x8xf32>,
    %c0_57 = arith.constant 0 : index
    %c0_58 = arith.constant 0 : index
    %c0_59 = arith.constant 0 : index
    %68 = vector.load %arg2[%c0_57, %c0_58, %c0_59] : memref<1x64x32xf32, #tpu.memory_space<vmem>>, vector<1x64x32xf32>
    %69 = vector.shape_cast %68 : vector<1x64x32xf32> to vector<64x32xf32>
    %70 = arith.truncf %69 : vector<64x32xf32> to vector<64x32xbf16>
    %c1_60 = arith.constant 1 : index
    %c0_61 = arith.constant 0 : index
    %c0_62 = arith.constant 0 : index
    %71 = vector.load %arg3[%c1_60, %c0_61, %c0_62] : memref<4x32x48xbf16, #tpu.memory_space<vmem>>, vector<1x32x48xbf16>
    %72 = vector.shape_cast %71 : vector<1x32x48xbf16> to vector<32x48xbf16>
    %cst_63 = arith.constant dense<0.000000e+00> : vector<64x48xf32>
    %73 = tpu.matmul %70, %72, %cst_63 {dimension_numbers = #tpu.dot_dimension_numbers<[1], [0], [0], [1], [0, 0, 1, 1], [], []>} : vector<64x32xbf16>, vector<32x48xbf16>, vector<64x48xf32> -> vector<64x48xf32>
    %74 = vector.extract_strided_slice %73 {offsets = [0, 0], sizes = [64, 32], strides = [1, 1]} : vector<64x48xf32> to vector<64x32xf32>
    %c1_64 = arith.constant 1 : index
    %c0_65 = arith.constant 0 : index
    %c0_66 = arith.constant 0 : index
    %75 = vector.load %arg6[%c1_64, %c0_65, %c0_66] : memref<4x1x32xf32, #tpu.memory_space<vmem>>, vector<1x1x32xf32>
    %76 = vector.shape_cast %75 : vector<1x1x32xf32> to vector<1x32xf32>
    %77 = vector.broadcast %76 : vector<1x32xf32> to vector<64x32xf32>
    %78 = arith.addf %74, %77 : vector<64x32xf32>
    %cst_67 = arith.constant 0.000000e+00 : f32
    %79 = vector.broadcast %cst_67 : f32 to vector<64x32xf32>
    %80 = arith.maximumf %78, %79 : vector<64x32xf32>
    %81 = math.absf %78 : vector<64x32xf32>
    %cst_68 = arith.constant 0.000000e+00 : f32
    %82 = vector.broadcast %cst_68 : f32 to vector<64x32xf32>
    %83 = arith.subf %82, %81 : vector<64x32xf32>
    %84 = math.exp %83 : vector<64x32xf32>
    %cst_69 = arith.constant 1.000000e+00 : f32
    %85 = vector.broadcast %cst_69 : f32 to vector<64x32xf32>
    %86 = arith.addf %85, %84 : vector<64x32xf32>
    %87 = math.log %86 : vector<64x32xf32>
    %88 = arith.addf %80, %87 : vector<64x32xf32>
    %c1_70 = arith.constant 1 : index
    %c0_71 = arith.constant 0 : index
    %c0_72 = arith.constant 0 : index
    %89 = vector.load %arg9[%c1_70, %c0_71, %c0_72] : memref<4x64x32xf32, #tpu.memory_space<vmem>>, vector<1x64x32xf32>
    %90 = vector.shape_cast %89 : vector<1x64x32xf32> to vector<64x32xf32>
    %91 = vector.shape_cast %88 : vector<64x32xf32> to vector<1x64x32xf32>
    tpu.vector_store %arg9[%c1_70, %c0_71, %c0_72], %91 {strides = array<i32>} : memref<4x64x32xf32, #tpu.memory_space<vmem>>, vector<1x64x32xf32>,
    %92 = vector.extract_strided_slice %73 {offsets = [0, 32], sizes = [64, 8], strides = [1, 1]} : vector<64x48xf32> to vector<64x8xf32>
    %c1_73 = arith.constant 1 : index
    %c0_74 = arith.constant 0 : index
    %c0_75 = arith.constant 0 : index
    %93 = vector.load %arg10[%c1_73, %c0_74, %c0_75] : memref<4x64x8xf32, #tpu.memory_space<vmem>>, vector<1x64x8xf32>
    %94 = vector.shape_cast %93 : vector<1x64x8xf32> to vector<64x8xf32>
    %95 = vector.shape_cast %92 : vector<64x8xf32> to vector<1x64x8xf32>
    tpu.vector_store %arg10[%c1_73, %c0_74, %c0_75], %95 {strides = array<i32>} : memref<4x64x8xf32, #tpu.memory_space<vmem>>, vector<1x64x8xf32>,
    %96 = vector.extract_strided_slice %73 {offsets = [0, 40], sizes = [64, 8], strides = [1, 1]} : vector<64x48xf32> to vector<64x8xf32>
    %c1_76 = arith.constant 1 : index
    %c0_77 = arith.constant 0 : index
    %c0_78 = arith.constant 0 : index
    %97 = vector.load %arg11[%c1_76, %c0_77, %c0_78] : memref<4x64x8xf32, #tpu.memory_space<vmem>>, vector<1x64x8xf32>
    %98 = vector.shape_cast %97 : vector<1x64x8xf32> to vector<64x8xf32>
    %99 = vector.shape_cast %96 : vector<64x8xf32> to vector<1x64x8xf32>
    tpu.vector_store %arg11[%c1_76, %c0_77, %c0_78], %99 {strides = array<i32>} : memref<4x64x8xf32, #tpu.memory_space<vmem>>, vector<1x64x8xf32>,
    %c0_79 = arith.constant 0 : index
    %c0_80 = arith.constant 0 : index
    %c0_81 = arith.constant 0 : index
    %100 = vector.load %arg1[%c0_79, %c0_80, %c0_81] : memref<1x64x32xf32, #tpu.memory_space<vmem>>, vector<1x64x32xf32>
    %101 = vector.shape_cast %100 : vector<1x64x32xf32> to vector<64x32xf32>
    %102 = arith.truncf %101 : vector<64x32xf32> to vector<64x32xbf16>
    %c2_82 = arith.constant 2 : index
    %c0_83 = arith.constant 0 : index
    %c0_84 = arith.constant 0 : index
    %103 = vector.load %arg3[%c2_82, %c0_83, %c0_84] : memref<4x32x48xbf16, #tpu.memory_space<vmem>>, vector<1x32x48xbf16>
    %104 = vector.shape_cast %103 : vector<1x32x48xbf16> to vector<32x48xbf16>
    %cst_85 = arith.constant dense<0.000000e+00> : vector<64x48xf32>
    %105 = tpu.matmul %102, %104, %cst_85 {dimension_numbers = #tpu.dot_dimension_numbers<[1], [0], [0], [1], [0, 0, 1, 1], [], []>} : vector<64x32xbf16>, vector<32x48xbf16>, vector<64x48xf32> -> vector<64x48xf32>
    %106 = vector.extract_strided_slice %105 {offsets = [0, 0], sizes = [64, 32], strides = [1, 1]} : vector<64x48xf32> to vector<64x32xf32>
    %c2_86 = arith.constant 2 : index
    %c0_87 = arith.constant 0 : index
    %c0_88 = arith.constant 0 : index
    %107 = vector.load %arg6[%c2_86, %c0_87, %c0_88] : memref<4x1x32xf32, #tpu.memory_space<vmem>>, vector<1x1x32xf32>
    %108 = vector.shape_cast %107 : vector<1x1x32xf32> to vector<1x32xf32>
    %109 = vector.broadcast %108 : vector<1x32xf32> to vector<64x32xf32>
    %110 = arith.addf %106, %109 : vector<64x32xf32>
    %cst_89 = arith.constant 0.000000e+00 : f32
    %111 = vector.broadcast %cst_89 : f32 to vector<64x32xf32>
    %112 = arith.maximumf %110, %111 : vector<64x32xf32>
    %113 = math.absf %110 : vector<64x32xf32>
    %cst_90 = arith.constant 0.000000e+00 : f32
    %114 = vector.broadcast %cst_90 : f32 to vector<64x32xf32>
    %115 = arith.subf %114, %113 : vector<64x32xf32>
    %116 = math.exp %115 : vector<64x32xf32>
    %cst_91 = arith.constant 1.000000e+00 : f32
    %117 = vector.broadcast %cst_91 : f32 to vector<64x32xf32>
    %118 = arith.addf %117, %116 : vector<64x32xf32>
    %119 = math.log %118 : vector<64x32xf32>
    %120 = arith.addf %112, %119 : vector<64x32xf32>
    %c2_92 = arith.constant 2 : index
    %c0_93 = arith.constant 0 : index
    %c0_94 = arith.constant 0 : index
    %121 = vector.load %arg9[%c2_92, %c0_93, %c0_94] : memref<4x64x32xf32, #tpu.memory_space<vmem>>, vector<1x64x32xf32>
    %122 = vector.shape_cast %121 : vector<1x64x32xf32> to vector<64x32xf32>
    %123 = vector.shape_cast %120 : vector<64x32xf32> to vector<1x64x32xf32>
    tpu.vector_store %arg9[%c2_92, %c0_93, %c0_94], %123 {strides = array<i32>} : memref<4x64x32xf32, #tpu.memory_space<vmem>>, vector<1x64x32xf32>,
    %124 = vector.extract_strided_slice %105 {offsets = [0, 32], sizes = [64, 8], strides = [1, 1]} : vector<64x48xf32> to vector<64x8xf32>
    %c2_95 = arith.constant 2 : index
    %c0_96 = arith.constant 0 : index
    %c0_97 = arith.constant 0 : index
    %125 = vector.load %arg10[%c2_95, %c0_96, %c0_97] : memref<4x64x8xf32, #tpu.memory_space<vmem>>, vector<1x64x8xf32>
    %126 = vector.shape_cast %125 : vector<1x64x8xf32> to vector<64x8xf32>
    %127 = vector.shape_cast %124 : vector<64x8xf32> to vector<1x64x8xf32>
    tpu.vector_store %arg10[%c2_95, %c0_96, %c0_97], %127 {strides = array<i32>} : memref<4x64x8xf32, #tpu.memory_space<vmem>>, vector<1x64x8xf32>,
    %128 = vector.extract_strided_slice %105 {offsets = [0, 40], sizes = [64, 8], strides = [1, 1]} : vector<64x48xf32> to vector<64x8xf32>
    %c2_98 = arith.constant 2 : index
    %c0_99 = arith.constant 0 : index
    %c0_100 = arith.constant 0 : index
    %129 = vector.load %arg11[%c2_98, %c0_99, %c0_100] : memref<4x64x8xf32, #tpu.memory_space<vmem>>, vector<1x64x8xf32>
    %130 = vector.shape_cast %129 : vector<1x64x8xf32> to vector<64x8xf32>
    %131 = vector.shape_cast %128 : vector<64x8xf32> to vector<1x64x8xf32>
    tpu.vector_store %arg11[%c2_98, %c0_99, %c0_100], %131 {strides = array<i32>} : memref<4x64x8xf32, #tpu.memory_space<vmem>>, vector<1x64x8xf32>,
    %c0_101 = arith.constant 0 : index
    %c0_102 = arith.constant 0 : index
    %c0_103 = arith.constant 0 : index
    %132 = vector.load %arg2[%c0_101, %c0_102, %c0_103] : memref<1x64x32xf32, #tpu.memory_space<vmem>>, vector<1x64x32xf32>
    %133 = vector.shape_cast %132 : vector<1x64x32xf32> to vector<64x32xf32>
    %134 = arith.truncf %133 : vector<64x32xf32> to vector<64x32xbf16>
    %c3_104 = arith.constant 3 : index
    %c0_105 = arith.constant 0 : index
    %c0_106 = arith.constant 0 : index
    %135 = vector.load %arg3[%c3_104, %c0_105, %c0_106] : memref<4x32x48xbf16, #tpu.memory_space<vmem>>, vector<1x32x48xbf16>
    %136 = vector.shape_cast %135 : vector<1x32x48xbf16> to vector<32x48xbf16>
    %cst_107 = arith.constant dense<0.000000e+00> : vector<64x48xf32>
    %137 = tpu.matmul %134, %136, %cst_107 {dimension_numbers = #tpu.dot_dimension_numbers<[1], [0], [0], [1], [0, 0, 1, 1], [], []>} : vector<64x32xbf16>, vector<32x48xbf16>, vector<64x48xf32> -> vector<64x48xf32>
    %138 = vector.extract_strided_slice %137 {offsets = [0, 0], sizes = [64, 32], strides = [1, 1]} : vector<64x48xf32> to vector<64x32xf32>
    %c3_108 = arith.constant 3 : index
    %c0_109 = arith.constant 0 : index
    %c0_110 = arith.constant 0 : index
    %139 = vector.load %arg6[%c3_108, %c0_109, %c0_110] : memref<4x1x32xf32, #tpu.memory_space<vmem>>, vector<1x1x32xf32>
    %140 = vector.shape_cast %139 : vector<1x1x32xf32> to vector<1x32xf32>
    %141 = vector.broadcast %140 : vector<1x32xf32> to vector<64x32xf32>
    %142 = arith.addf %138, %141 : vector<64x32xf32>
    %cst_111 = arith.constant 0.000000e+00 : f32
    %143 = vector.broadcast %cst_111 : f32 to vector<64x32xf32>
    %144 = arith.maximumf %142, %143 : vector<64x32xf32>
    %145 = math.absf %142 : vector<64x32xf32>
    %cst_112 = arith.constant 0.000000e+00 : f32
    %146 = vector.broadcast %cst_112 : f32 to vector<64x32xf32>
    %147 = arith.subf %146, %145 : vector<64x32xf32>
    %148 = math.exp %147 : vector<64x32xf32>
    %cst_113 = arith.constant 1.000000e+00 : f32
    %149 = vector.broadcast %cst_113 : f32 to vector<64x32xf32>
    %150 = arith.addf %149, %148 : vector<64x32xf32>
    %151 = math.log %150 : vector<64x32xf32>
    %152 = arith.addf %144, %151 : vector<64x32xf32>
    %c3_114 = arith.constant 3 : index
    %c0_115 = arith.constant 0 : index
    %c0_116 = arith.constant 0 : index
    %153 = vector.load %arg9[%c3_114, %c0_115, %c0_116] : memref<4x64x32xf32, #tpu.memory_space<vmem>>, vector<1x64x32xf32>
    %154 = vector.shape_cast %153 : vector<1x64x32xf32> to vector<64x32xf32>
    %155 = vector.shape_cast %152 : vector<64x32xf32> to vector<1x64x32xf32>
    tpu.vector_store %arg9[%c3_114, %c0_115, %c0_116], %155 {strides = array<i32>} : memref<4x64x32xf32, #tpu.memory_space<vmem>>, vector<1x64x32xf32>,
    %156 = vector.extract_strided_slice %137 {offsets = [0, 32], sizes = [64, 8], strides = [1, 1]} : vector<64x48xf32> to vector<64x8xf32>
    %c3_117 = arith.constant 3 : index
    %c0_118 = arith.constant 0 : index
    %c0_119 = arith.constant 0 : index
    %157 = vector.load %arg10[%c3_117, %c0_118, %c0_119] : memref<4x64x8xf32, #tpu.memory_space<vmem>>, vector<1x64x8xf32>
    %158 = vector.shape_cast %157 : vector<1x64x8xf32> to vector<64x8xf32>
    %159 = vector.shape_cast %156 : vector<64x8xf32> to vector<1x64x8xf32>
    tpu.vector_store %arg10[%c3_117, %c0_118, %c0_119], %159 {strides = array<i32>} : memref<4x64x8xf32, #tpu.memory_space<vmem>>, vector<1x64x8xf32>,
    %160 = vector.extract_strided_slice %137 {offsets = [0, 40], sizes = [64, 8], strides = [1, 1]} : vector<64x48xf32> to vector<64x8xf32>
    %c3_120 = arith.constant 3 : index
    %c0_121 = arith.constant 0 : index
    %c0_122 = arith.constant 0 : index
    %161 = vector.load %arg11[%c3_120, %c0_121, %c0_122] : memref<4x64x8xf32, #tpu.memory_space<vmem>>, vector<1x64x8xf32>
    %162 = vector.shape_cast %161 : vector<1x64x8xf32> to vector<64x8xf32>
    %163 = vector.shape_cast %160 : vector<64x8xf32> to vector<1x64x8xf32>
    tpu.vector_store %arg11[%c3_120, %c0_121, %c0_122], %163 {strides = array<i32>} : memref<4x64x8xf32, #tpu.memory_space<vmem>>, vector<1x64x8xf32>,
    %c0_i32 = arith.constant 0 : i32
    %c8_i32 = arith.constant 8 : i32
    %164 = arith.addi %c0_i32, %c8_i32 : i32
    %c1_i32 = arith.constant 1 : i32
    %165:4 = scf.for %arg12 = %c0_i32 to %164 step %c1_i32 iter_args(%arg13 = %32, %arg14 = %33, %arg15 = %34, %arg16 = %35) -> (vector<8x32xf32>, vector<8x32xf32>, vector<8x32xf32>, vector<8x32xf32>)  : i32 {
      %c8_i32_124 = arith.constant 8 : i32
      %166 = arith.muli %arg12, %c8_i32_124 : i32
      %167 = tpu.assume_multiple %166, 8 : i32
      %c0_i32_125 = arith.constant 0 : i32
      %168 = arith.addi %c0_i32_125, %167 : i32
      %169 = tpu.assume_multiple %168, 8 : i32
      %c0_126 = arith.constant 0 : index
      %170 = arith.index_cast %167 : i32 to index
      %c0_127 = arith.constant 0 : index
      %171 = vector.load %arg9[%c0_126, %170, %c0_127] : memref<4x64x32xf32, #tpu.memory_space<vmem>>, vector<1x8x32xf32>
      %172 = vector.shape_cast %171 : vector<1x8x32xf32> to vector<8x32xf32>
      %c0_128 = arith.constant 0 : index
      %173 = arith.index_cast %167 : i32 to index
      %c0_129 = arith.constant 0 : index
      %174 = vector.load %arg10[%c0_128, %173, %c0_129] : memref<4x64x8xf32, #tpu.memory_space<vmem>>, vector<1x8x8xf32>
      %175 = vector.shape_cast %174 : vector<1x8x8xf32> to vector<8x8xf32>
      %c0_130 = arith.constant 0 : index
      %176 = arith.index_cast %167 : i32 to index
      %c0_131 = arith.constant 0 : index
      %177 = vector.load %arg11[%c0_130, %176, %c0_131] : memref<4x64x8xf32, #tpu.memory_space<vmem>>, vector<1x8x8xf32>
      %178 = vector.shape_cast %177 : vector<1x8x8xf32> to vector<8x8xf32>
      %c0_132 = arith.constant 0 : index
      %179 = arith.index_cast %169 : i32 to index
      %c0_133 = arith.constant 0 : index
      %180 = vector.load %arg1[%c0_132, %179, %c0_133] : memref<1x64x32xf32, #tpu.memory_space<vmem>>, vector<1x8x32xf32>
      %181 = vector.shape_cast %180 : vector<1x8x32xf32> to vector<8x32xf32>
      %182 = vector.shape_cast %172 : vector<8x32xf32> to vector<8x1x32xf32>
      %183 = vector.shape_cast %1 : vector<8x32xf32> to vector<1x8x32xf32>
      %184 = vector.broadcast %182 : vector<8x1x32xf32> to vector<8x8x32xf32>
      %185 = vector.broadcast %183 : vector<1x8x32xf32> to vector<8x8x32xf32>
      %186 = arith.mulf %184, %185 : vector<8x8x32xf32>
      %187 = math.exp %186 : vector<8x8x32xf32>
      %188 = arith.mulf %172, %181 : vector<8x32xf32>
      %189 = vector.shape_cast %188 : vector<8x32xf32> to vector<8x1x32xf32>
      %190 = vector.shape_cast %175 : vector<8x8xf32> to vector<8x8x1xf32>
      %191 = vector.broadcast %189 : vector<8x1x32xf32> to vector<8x8x32xf32>
      %192 = vector.broadcast %190 : vector<8x8x1xf32> to vector<8x8x32xf32>
      %193 = arith.mulf %191, %192 : vector<8x8x32xf32>
      %194 = vector.extract_strided_slice %187 {offsets = [0, 0, 0], sizes = [1, 8, 32], strides = [1, 1, 1]} : vector<8x8x32xf32> to vector<1x8x32xf32>
      %195 = vector.shape_cast %194 : vector<1x8x32xf32> to vector<8x32xf32>
      %196 = arith.mulf %195, %arg13 : vector<8x32xf32>
      %197 = vector.extract_strided_slice %193 {offsets = [0, 0, 0], sizes = [1, 8, 32], strides = [1, 1, 1]} : vector<8x8x32xf32> to vector<1x8x32xf32>
      %198 = vector.shape_cast %197 : vector<1x8x32xf32> to vector<8x32xf32>
      %199 = arith.addf %196, %198 : vector<8x32xf32>
      %200 = vector.extract_strided_slice %187 {offsets = [1, 0, 0], sizes = [1, 8, 32], strides = [1, 1, 1]} : vector<8x8x32xf32> to vector<1x8x32xf32>
      %201 = vector.shape_cast %200 : vector<1x8x32xf32> to vector<8x32xf32>
      %202 = arith.mulf %201, %199 : vector<8x32xf32>
      %203 = vector.extract_strided_slice %193 {offsets = [1, 0, 0], sizes = [1, 8, 32], strides = [1, 1, 1]} : vector<8x8x32xf32> to vector<1x8x32xf32>
      %204 = vector.shape_cast %203 : vector<1x8x32xf32> to vector<8x32xf32>
      %205 = arith.addf %202, %204 : vector<8x32xf32>
      %206 = vector.extract_strided_slice %187 {offsets = [2, 0, 0], sizes = [1, 8, 32], strides = [1, 1, 1]} : vector<8x8x32xf32> to vector<1x8x32xf32>
      %207 = vector.shape_cast %206 : vector<1x8x32xf32> to vector<8x32xf32>
      %208 = arith.mulf %207, %205 : vector<8x32xf32>
      %209 = vector.extract_strided_slice %193 {offsets = [2, 0, 0], sizes = [1, 8, 32], strides = [1, 1, 1]} : vector<8x8x32xf32> to vector<1x8x32xf32>
      %210 = vector.shape_cast %209 : vector<1x8x32xf32> to vector<8x32xf32>
      %211 = arith.addf %208, %210 : vector<8x32xf32>
      %212 = vector.extract_strided_slice %187 {offsets = [3, 0, 0], sizes = [1, 8, 32], strides = [1, 1, 1]} : vector<8x8x32xf32> to vector<1x8x32xf32>
      %213 = vector.shape_cast %212 : vector<1x8x32xf32> to vector<8x32xf32>
      %214 = arith.mulf %213, %211 : vector<8x32xf32>
      %215 = vector.extract_strided_slice %193 {offsets = [3, 0, 0], sizes = [1, 8, 32], strides = [1, 1, 1]} : vector<8x8x32xf32> to vector<1x8x32xf32>
      %216 = vector.shape_cast %215 : vector<1x8x32xf32> to vector<8x32xf32>
      %217 = arith.addf %214, %216 : vector<8x32xf32>
      %218 = vector.extract_strided_slice %187 {offsets = [4, 0, 0], sizes = [1, 8, 32], strides = [1, 1, 1]} : vector<8x8x32xf32> to vector<1x8x32xf32>
      %219 = vector.shape_cast %218 : vector<1x8x32xf32> to vector<8x32xf32>
      %220 = arith.mulf %219, %217 : vector<8x32xf32>
      %221 = vector.extract_strided_slice %193 {offsets = [4, 0, 0], sizes = [1, 8, 32], strides = [1, 1, 1]} : vector<8x8x32xf32> to vector<1x8x32xf32>
      %222 = vector.shape_cast %221 : vector<1x8x32xf32> to vector<8x32xf32>
      %223 = arith.addf %220, %222 : vector<8x32xf32>
      %224 = vector.extract_strided_slice %187 {offsets = [5, 0, 0], sizes = [1, 8, 32], strides = [1, 1, 1]} : vector<8x8x32xf32> to vector<1x8x32xf32>
      %225 = vector.shape_cast %224 : vector<1x8x32xf32> to vector<8x32xf32>
      %226 = arith.mulf %225, %223 : vector<8x32xf32>
      %227 = vector.extract_strided_slice %193 {offsets = [5, 0, 0], sizes = [1, 8, 32], strides = [1, 1, 1]} : vector<8x8x32xf32> to vector<1x8x32xf32>
      %228 = vector.shape_cast %227 : vector<1x8x32xf32> to vector<8x32xf32>
      %229 = arith.addf %226, %228 : vector<8x32xf32>
      %230 = vector.extract_strided_slice %187 {offsets = [6, 0, 0], sizes = [1, 8, 32], strides = [1, 1, 1]} : vector<8x8x32xf32> to vector<1x8x32xf32>
      %231 = vector.shape_cast %230 : vector<1x8x32xf32> to vector<8x32xf32>
      %232 = arith.mulf %231, %229 : vector<8x32xf32>
      %233 = vector.extract_strided_slice %193 {offsets = [6, 0, 0], sizes = [1, 8, 32], strides = [1, 1, 1]} : vector<8x8x32xf32> to vector<1x8x32xf32>
      %234 = vector.shape_cast %233 : vector<1x8x32xf32> to vector<8x32xf32>
      %235 = arith.addf %232, %234 : vector<8x32xf32>
      %236 = vector.extract_strided_slice %187 {offsets = [7, 0, 0], sizes = [1, 8, 32], strides = [1, 1, 1]} : vector<8x8x32xf32> to vector<1x8x32xf32>
      %237 = vector.shape_cast %236 : vector<1x8x32xf32> to vector<8x32xf32>
      %238 = arith.mulf %237, %235 : vector<8x32xf32>
      %239 = vector.extract_strided_slice %193 {offsets = [7, 0, 0], sizes = [1, 8, 32], strides = [1, 1, 1]} : vector<8x8x32xf32> to vector<1x8x32xf32>
      %240 = vector.shape_cast %239 : vector<1x8x32xf32> to vector<8x32xf32>
      %241 = arith.addf %238, %240 : vector<8x32xf32>
      %242 = vector.shape_cast %199 : vector<8x32xf32> to vector<1x8x32xf32>
      %243 = vector.shape_cast %205 : vector<8x32xf32> to vector<1x8x32xf32>
      %244 = vector.shape_cast %211 : vector<8x32xf32> to vector<1x8x32xf32>
      %245 = vector.shape_cast %217 : vector<8x32xf32> to vector<1x8x32xf32>
      %246 = vector.shape_cast %223 : vector<8x32xf32> to vector<1x8x32xf32>
      %247 = vector.shape_cast %229 : vector<8x32xf32> to vector<1x8x32xf32>
      %248 = vector.shape_cast %235 : vector<8x32xf32> to vector<1x8x32xf32>
      %249 = vector.shape_cast %241 : vector<8x32xf32> to vector<1x8x32xf32>
      %250 = tpu.concatenate %242, %243, %244, %245, %246, %247, %248, %249 in 0 : vector<1x8x32xf32>, vector<1x8x32xf32>, vector<1x8x32xf32>, vector<1x8x32xf32>, vector<1x8x32xf32>, vector<1x8x32xf32>, vector<1x8x32xf32>, vector<1x8x32xf32> -> vector<8x8x32xf32>
      %251 = vector.shape_cast %178 : vector<8x8xf32> to vector<8x8x1xf32>
      %252 = vector.broadcast %251 : vector<8x8x1xf32> to vector<8x8x32xf32>
      %253 = arith.mulf %250, %252 : vector<8x8x32xf32>
      %cst_134 = arith.constant dense<0.000000e+00> : vector<8x32xf32>
      %254 = vector.multi_reduction <add>, %253, %cst_134 [1] : vector<8x8x32xf32> to vector<8x32xf32>
      %c0_135 = arith.constant 0 : index
      %255 = arith.index_cast %169 : i32 to index
      %c0_136 = arith.constant 0 : index
      %256 = vector.load %arg7[%c0_135, %255, %c0_136] : memref<1x64x32xf32, #tpu.memory_space<vmem>>, vector<1x8x32xf32>
      %257 = vector.shape_cast %256 : vector<1x8x32xf32> to vector<8x32xf32>
      %258 = arith.addf %257, %254 : vector<8x32xf32>
      %c0_137 = arith.constant 0 : index
      %259 = arith.index_cast %169 : i32 to index
      %c0_138 = arith.constant 0 : index
      %260 = vector.load %arg7[%c0_137, %259, %c0_138] : memref<1x64x32xf32, #tpu.memory_space<vmem>>, vector<1x8x32xf32>
      %261 = vector.shape_cast %260 : vector<1x8x32xf32> to vector<8x32xf32>
      %262 = vector.shape_cast %258 : vector<8x32xf32> to vector<1x8x32xf32>
      tpu.vector_store %arg7[%c0_137, %259, %c0_138], %262 {strides = array<i32>} : memref<1x64x32xf32, #tpu.memory_space<vmem>>, vector<1x8x32xf32>,
      %263 = tpu.assume_multiple %166, 8 : i32
      %c0_i32_139 = arith.constant 0 : i32
      %264 = arith.addi %c0_i32_139, %263 : i32
      %265 = tpu.assume_multiple %264, 8 : i32
      %c1_140 = arith.constant 1 : index
      %266 = arith.index_cast %263 : i32 to index
      %c0_141 = arith.constant 0 : index
      %267 = vector.load %arg9[%c1_140, %266, %c0_141] : memref<4x64x32xf32, #tpu.memory_space<vmem>>, vector<1x8x32xf32>
      %268 = vector.shape_cast %267 : vector<1x8x32xf32> to vector<8x32xf32>
      %c1_142 = arith.constant 1 : index
      %269 = arith.index_cast %263 : i32 to index
      %c0_143 = arith.constant 0 : index
      %270 = vector.load %arg10[%c1_142, %269, %c0_143] : memref<4x64x8xf32, #tpu.memory_space<vmem>>, vector<1x8x8xf32>
      %271 = vector.shape_cast %270 : vector<1x8x8xf32> to vector<8x8xf32>
      %c1_144 = arith.constant 1 : index
      %272 = arith.index_cast %263 : i32 to index
      %c0_145 = arith.constant 0 : index
      %273 = vector.load %arg11[%c1_144, %272, %c0_145] : memref<4x64x8xf32, #tpu.memory_space<vmem>>, vector<1x8x8xf32>
      %274 = vector.shape_cast %273 : vector<1x8x8xf32> to vector<8x8xf32>
      %c0_146 = arith.constant 0 : index
      %275 = arith.index_cast %265 : i32 to index
      %c0_147 = arith.constant 0 : index
      %276 = vector.load %arg2[%c0_146, %275, %c0_147] : memref<1x64x32xf32, #tpu.memory_space<vmem>>, vector<1x8x32xf32>
      %277 = vector.shape_cast %276 : vector<1x8x32xf32> to vector<8x32xf32>
      %278 = vector.shape_cast %268 : vector<8x32xf32> to vector<8x1x32xf32>
      %279 = vector.shape_cast %3 : vector<8x32xf32> to vector<1x8x32xf32>
      %280 = vector.broadcast %278 : vector<8x1x32xf32> to vector<8x8x32xf32>
      %281 = vector.broadcast %279 : vector<1x8x32xf32> to vector<8x8x32xf32>
      %282 = arith.mulf %280, %281 : vector<8x8x32xf32>
      %283 = math.exp %282 : vector<8x8x32xf32>
      %284 = arith.mulf %268, %277 : vector<8x32xf32>
      %285 = vector.shape_cast %284 : vector<8x32xf32> to vector<8x1x32xf32>
      %286 = vector.shape_cast %271 : vector<8x8xf32> to vector<8x8x1xf32>
      %287 = vector.broadcast %285 : vector<8x1x32xf32> to vector<8x8x32xf32>
      %288 = vector.broadcast %286 : vector<8x8x1xf32> to vector<8x8x32xf32>
      %289 = arith.mulf %287, %288 : vector<8x8x32xf32>
      %290 = vector.extract_strided_slice %283 {offsets = [0, 0, 0], sizes = [1, 8, 32], strides = [1, 1, 1]} : vector<8x8x32xf32> to vector<1x8x32xf32>
      %291 = vector.shape_cast %290 : vector<1x8x32xf32> to vector<8x32xf32>
      %292 = arith.mulf %291, %arg14 : vector<8x32xf32>
      %293 = vector.extract_strided_slice %289 {offsets = [0, 0, 0], sizes = [1, 8, 32], strides = [1, 1, 1]} : vector<8x8x32xf32> to vector<1x8x32xf32>
      %294 = vector.shape_cast %293 : vector<1x8x32xf32> to vector<8x32xf32>
      %295 = arith.addf %292, %294 : vector<8x32xf32>
      %296 = vector.extract_strided_slice %283 {offsets = [1, 0, 0], sizes = [1, 8, 32], strides = [1, 1, 1]} : vector<8x8x32xf32> to vector<1x8x32xf32>
      %297 = vector.shape_cast %296 : vector<1x8x32xf32> to vector<8x32xf32>
      %298 = arith.mulf %297, %295 : vector<8x32xf32>
      %299 = vector.extract_strided_slice %289 {offsets = [1, 0, 0], sizes = [1, 8, 32], strides = [1, 1, 1]} : vector<8x8x32xf32> to vector<1x8x32xf32>
      %300 = vector.shape_cast %299 : vector<1x8x32xf32> to vector<8x32xf32>
      %301 = arith.addf %298, %300 : vector<8x32xf32>
      %302 = vector.extract_strided_slice %283 {offsets = [2, 0, 0], sizes = [1, 8, 32], strides = [1, 1, 1]} : vector<8x8x32xf32> to vector<1x8x32xf32>
      %303 = vector.shape_cast %302 : vector<1x8x32xf32> to vector<8x32xf32>
      %304 = arith.mulf %303, %301 : vector<8x32xf32>
      %305 = vector.extract_strided_slice %289 {offsets = [2, 0, 0], sizes = [1, 8, 32], strides = [1, 1, 1]} : vector<8x8x32xf32> to vector<1x8x32xf32>
      %306 = vector.shape_cast %305 : vector<1x8x32xf32> to vector<8x32xf32>
      %307 = arith.addf %304, %306 : vector<8x32xf32>
      %308 = vector.extract_strided_slice %283 {offsets = [3, 0, 0], sizes = [1, 8, 32], strides = [1, 1, 1]} : vector<8x8x32xf32> to vector<1x8x32xf32>
      %309 = vector.shape_cast %308 : vector<1x8x32xf32> to vector<8x32xf32>
      %310 = arith.mulf %309, %307 : vector<8x32xf32>
      %311 = vector.extract_strided_slice %289 {offsets = [3, 0, 0], sizes = [1, 8, 32], strides = [1, 1, 1]} : vector<8x8x32xf32> to vector<1x8x32xf32>
      %312 = vector.shape_cast %311 : vector<1x8x32xf32> to vector<8x32xf32>
      %313 = arith.addf %310, %312 : vector<8x32xf32>
      %314 = vector.extract_strided_slice %283 {offsets = [4, 0, 0], sizes = [1, 8, 32], strides = [1, 1, 1]} : vector<8x8x32xf32> to vector<1x8x32xf32>
      %315 = vector.shape_cast %314 : vector<1x8x32xf32> to vector<8x32xf32>
      %316 = arith.mulf %315, %313 : vector<8x32xf32>
      %317 = vector.extract_strided_slice %289 {offsets = [4, 0, 0], sizes = [1, 8, 32], strides = [1, 1, 1]} : vector<8x8x32xf32> to vector<1x8x32xf32>
      %318 = vector.shape_cast %317 : vector<1x8x32xf32> to vector<8x32xf32>
      %319 = arith.addf %316, %318 : vector<8x32xf32>
      %320 = vector.extract_strided_slice %283 {offsets = [5, 0, 0], sizes = [1, 8, 32], strides = [1, 1, 1]} : vector<8x8x32xf32> to vector<1x8x32xf32>
      %321 = vector.shape_cast %320 : vector<1x8x32xf32> to vector<8x32xf32>
      %322 = arith.mulf %321, %319 : vector<8x32xf32>
      %323 = vector.extract_strided_slice %289 {offsets = [5, 0, 0], sizes = [1, 8, 32], strides = [1, 1, 1]} : vector<8x8x32xf32> to vector<1x8x32xf32>
      %324 = vector.shape_cast %323 : vector<1x8x32xf32> to vector<8x32xf32>
      %325 = arith.addf %322, %324 : vector<8x32xf32>
      %326 = vector.extract_strided_slice %283 {offsets = [6, 0, 0], sizes = [1, 8, 32], strides = [1, 1, 1]} : vector<8x8x32xf32> to vector<1x8x32xf32>
      %327 = vector.shape_cast %326 : vector<1x8x32xf32> to vector<8x32xf32>
      %328 = arith.mulf %327, %325 : vector<8x32xf32>
      %329 = vector.extract_strided_slice %289 {offsets = [6, 0, 0], sizes = [1, 8, 32], strides = [1, 1, 1]} : vector<8x8x32xf32> to vector<1x8x32xf32>
      %330 = vector.shape_cast %329 : vector<1x8x32xf32> to vector<8x32xf32>
      %331 = arith.addf %328, %330 : vector<8x32xf32>
      %332 = vector.extract_strided_slice %283 {offsets = [7, 0, 0], sizes = [1, 8, 32], strides = [1, 1, 1]} : vector<8x8x32xf32> to vector<1x8x32xf32>
      %333 = vector.shape_cast %332 : vector<1x8x32xf32> to vector<8x32xf32>
      %334 = arith.mulf %333, %331 : vector<8x32xf32>
      %335 = vector.extract_strided_slice %289 {offsets = [7, 0, 0], sizes = [1, 8, 32], strides = [1, 1, 1]} : vector<8x8x32xf32> to vector<1x8x32xf32>
      %336 = vector.shape_cast %335 : vector<1x8x32xf32> to vector<8x32xf32>
      %337 = arith.addf %334, %336 : vector<8x32xf32>
      %338 = vector.shape_cast %295 : vector<8x32xf32> to vector<1x8x32xf32>
      %339 = vector.shape_cast %301 : vector<8x32xf32> to vector<1x8x32xf32>
      %340 = vector.shape_cast %307 : vector<8x32xf32> to vector<1x8x32xf32>
      %341 = vector.shape_cast %313 : vector<8x32xf32> to vector<1x8x32xf32>
      %342 = vector.shape_cast %319 : vector<8x32xf32> to vector<1x8x32xf32>
      %343 = vector.shape_cast %325 : vector<8x32xf32> to vector<1x8x32xf32>
      %344 = vector.shape_cast %331 : vector<8x32xf32> to vector<1x8x32xf32>
      %345 = vector.shape_cast %337 : vector<8x32xf32> to vector<1x8x32xf32>
      %346 = tpu.concatenate %338, %339, %340, %341, %342, %343, %344, %345 in 0 : vector<1x8x32xf32>, vector<1x8x32xf32>, vector<1x8x32xf32>, vector<1x8x32xf32>, vector<1x8x32xf32>, vector<1x8x32xf32>, vector<1x8x32xf32>, vector<1x8x32xf32> -> vector<8x8x32xf32>
      %347 = vector.shape_cast %274 : vector<8x8xf32> to vector<8x8x1xf32>
      %348 = vector.broadcast %347 : vector<8x8x1xf32> to vector<8x8x32xf32>
      %349 = arith.mulf %346, %348 : vector<8x8x32xf32>
      %cst_148 = arith.constant dense<0.000000e+00> : vector<8x32xf32>
      %350 = vector.multi_reduction <add>, %349, %cst_148 [1] : vector<8x8x32xf32> to vector<8x32xf32>
      %c0_149 = arith.constant 0 : index
      %351 = arith.index_cast %265 : i32 to index
      %c0_150 = arith.constant 0 : index
      %352 = vector.load %arg8[%c0_149, %351, %c0_150] : memref<1x64x32xf32, #tpu.memory_space<vmem>>, vector<1x8x32xf32>
      %353 = vector.shape_cast %352 : vector<1x8x32xf32> to vector<8x32xf32>
      %354 = arith.addf %353, %350 : vector<8x32xf32>
      %c0_151 = arith.constant 0 : index
      %355 = arith.index_cast %265 : i32 to index
      %c0_152 = arith.constant 0 : index
      %356 = vector.load %arg8[%c0_151, %355, %c0_152] : memref<1x64x32xf32, #tpu.memory_space<vmem>>, vector<1x8x32xf32>
      %357 = vector.shape_cast %356 : vector<1x8x32xf32> to vector<8x32xf32>
      %358 = vector.shape_cast %354 : vector<8x32xf32> to vector<1x8x32xf32>
      tpu.vector_store %arg8[%c0_151, %355, %c0_152], %358 {strides = array<i32>} : memref<1x64x32xf32, #tpu.memory_space<vmem>>, vector<1x8x32xf32>,
      %c56_i32 = arith.constant 56 : i32
      %359 = arith.subi %c56_i32, %166 : i32
      %360 = tpu.assume_multiple %359, 8 : i32
      %c0_i32_153 = arith.constant 0 : i32
      %361 = arith.addi %c0_i32_153, %360 : i32
      %362 = tpu.assume_multiple %361, 8 : i32
      %c2_154 = arith.constant 2 : index
      %363 = arith.index_cast %360 : i32 to index
      %c0_155 = arith.constant 0 : index
      %364 = vector.load %arg9[%c2_154, %363, %c0_155] : memref<4x64x32xf32, #tpu.memory_space<vmem>>, vector<1x8x32xf32>
      %365 = vector.shape_cast %364 : vector<1x8x32xf32> to vector<8x32xf32>
      %c2_156 = arith.constant 2 : index
      %366 = arith.index_cast %360 : i32 to index
      %c0_157 = arith.constant 0 : index
      %367 = vector.load %arg10[%c2_156, %366, %c0_157] : memref<4x64x8xf32, #tpu.memory_space<vmem>>, vector<1x8x8xf32>
      %368 = vector.shape_cast %367 : vector<1x8x8xf32> to vector<8x8xf32>
      %c2_158 = arith.constant 2 : index
      %369 = arith.index_cast %360 : i32 to index
      %c0_159 = arith.constant 0 : index
      %370 = vector.load %arg11[%c2_158, %369, %c0_159] : memref<4x64x8xf32, #tpu.memory_space<vmem>>, vector<1x8x8xf32>
      %371 = vector.shape_cast %370 : vector<1x8x8xf32> to vector<8x8xf32>
      %c0_160 = arith.constant 0 : index
      %372 = arith.index_cast %362 : i32 to index
      %c0_161 = arith.constant 0 : index
      %373 = vector.load %arg1[%c0_160, %372, %c0_161] : memref<1x64x32xf32, #tpu.memory_space<vmem>>, vector<1x8x32xf32>
      %374 = vector.shape_cast %373 : vector<1x8x32xf32> to vector<8x32xf32>
      %375 = vector.shape_cast %365 : vector<8x32xf32> to vector<8x1x32xf32>
      %376 = vector.shape_cast %5 : vector<8x32xf32> to vector<1x8x32xf32>
      %377 = vector.broadcast %375 : vector<8x1x32xf32> to vector<8x8x32xf32>
      %378 = vector.broadcast %376 : vector<1x8x32xf32> to vector<8x8x32xf32>
      %379 = arith.mulf %377, %378 : vector<8x8x32xf32>
      %380 = math.exp %379 : vector<8x8x32xf32>
      %381 = arith.mulf %365, %374 : vector<8x32xf32>
      %382 = vector.shape_cast %381 : vector<8x32xf32> to vector<8x1x32xf32>
      %383 = vector.shape_cast %368 : vector<8x8xf32> to vector<8x8x1xf32>
      %384 = vector.broadcast %382 : vector<8x1x32xf32> to vector<8x8x32xf32>
      %385 = vector.broadcast %383 : vector<8x8x1xf32> to vector<8x8x32xf32>
      %386 = arith.mulf %384, %385 : vector<8x8x32xf32>
      %387 = vector.extract_strided_slice %380 {offsets = [7, 0, 0], sizes = [1, 8, 32], strides = [1, 1, 1]} : vector<8x8x32xf32> to vector<1x8x32xf32>
      %388 = vector.shape_cast %387 : vector<1x8x32xf32> to vector<8x32xf32>
      %389 = arith.mulf %388, %arg15 : vector<8x32xf32>
      %390 = vector.extract_strided_slice %386 {offsets = [7, 0, 0], sizes = [1, 8, 32], strides = [1, 1, 1]} : vector<8x8x32xf32> to vector<1x8x32xf32>
      %391 = vector.shape_cast %390 : vector<1x8x32xf32> to vector<8x32xf32>
      %392 = arith.addf %389, %391 : vector<8x32xf32>
      %393 = vector.extract_strided_slice %380 {offsets = [6, 0, 0], sizes = [1, 8, 32], strides = [1, 1, 1]} : vector<8x8x32xf32> to vector<1x8x32xf32>
      %394 = vector.shape_cast %393 : vector<1x8x32xf32> to vector<8x32xf32>
      %395 = arith.mulf %394, %392 : vector<8x32xf32>
      %396 = vector.extract_strided_slice %386 {offsets = [6, 0, 0], sizes = [1, 8, 32], strides = [1, 1, 1]} : vector<8x8x32xf32> to vector<1x8x32xf32>
      %397 = vector.shape_cast %396 : vector<1x8x32xf32> to vector<8x32xf32>
      %398 = arith.addf %395, %397 : vector<8x32xf32>
      %399 = vector.extract_strided_slice %380 {offsets = [5, 0, 0], sizes = [1, 8, 32], strides = [1, 1, 1]} : vector<8x8x32xf32> to vector<1x8x32xf32>
      %400 = vector.shape_cast %399 : vector<1x8x32xf32> to vector<8x32xf32>
      %401 = arith.mulf %400, %398 : vector<8x32xf32>
      %402 = vector.extract_strided_slice %386 {offsets = [5, 0, 0], sizes = [1, 8, 32], strides = [1, 1, 1]} : vector<8x8x32xf32> to vector<1x8x32xf32>
      %403 = vector.shape_cast %402 : vector<1x8x32xf32> to vector<8x32xf32>
      %404 = arith.addf %401, %403 : vector<8x32xf32>
      %405 = vector.extract_strided_slice %380 {offsets = [4, 0, 0], sizes = [1, 8, 32], strides = [1, 1, 1]} : vector<8x8x32xf32> to vector<1x8x32xf32>
      %406 = vector.shape_cast %405 : vector<1x8x32xf32> to vector<8x32xf32>
      %407 = arith.mulf %406, %404 : vector<8x32xf32>
      %408 = vector.extract_strided_slice %386 {offsets = [4, 0, 0], sizes = [1, 8, 32], strides = [1, 1, 1]} : vector<8x8x32xf32> to vector<1x8x32xf32>
      %409 = vector.shape_cast %408 : vector<1x8x32xf32> to vector<8x32xf32>
      %410 = arith.addf %407, %409 : vector<8x32xf32>
      %411 = vector.extract_strided_slice %380 {offsets = [3, 0, 0], sizes = [1, 8, 32], strides = [1, 1, 1]} : vector<8x8x32xf32> to vector<1x8x32xf32>
      %412 = vector.shape_cast %411 : vector<1x8x32xf32> to vector<8x32xf32>
      %413 = arith.mulf %412, %410 : vector<8x32xf32>
      %414 = vector.extract_strided_slice %386 {offsets = [3, 0, 0], sizes = [1, 8, 32], strides = [1, 1, 1]} : vector<8x8x32xf32> to vector<1x8x32xf32>
      %415 = vector.shape_cast %414 : vector<1x8x32xf32> to vector<8x32xf32>
      %416 = arith.addf %413, %415 : vector<8x32xf32>
      %417 = vector.extract_strided_slice %380 {offsets = [2, 0, 0], sizes = [1, 8, 32], strides = [1, 1, 1]} : vector<8x8x32xf32> to vector<1x8x32xf32>
      %418 = vector.shape_cast %417 : vector<1x8x32xf32> to vector<8x32xf32>
      %419 = arith.mulf %418, %416 : vector<8x32xf32>
      %420 = vector.extract_strided_slice %386 {offsets = [2, 0, 0], sizes = [1, 8, 32], strides = [1, 1, 1]} : vector<8x8x32xf32> to vector<1x8x32xf32>
      %421 = vector.shape_cast %420 : vector<1x8x32xf32> to vector<8x32xf32>
      %422 = arith.addf %419, %421 : vector<8x32xf32>
      %423 = vector.extract_strided_slice %380 {offsets = [1, 0, 0], sizes = [1, 8, 32], strides = [1, 1, 1]} : vector<8x8x32xf32> to vector<1x8x32xf32>
      %424 = vector.shape_cast %423 : vector<1x8x32xf32> to vector<8x32xf32>
      %425 = arith.mulf %424, %422 : vector<8x32xf32>
      %426 = vector.extract_strided_slice %386 {offsets = [1, 0, 0], sizes = [1, 8, 32], strides = [1, 1, 1]} : vector<8x8x32xf32> to vector<1x8x32xf32>
      %427 = vector.shape_cast %426 : vector<1x8x32xf32> to vector<8x32xf32>
      %428 = arith.addf %425, %427 : vector<8x32xf32>
      %429 = vector.extract_strided_slice %380 {offsets = [0, 0, 0], sizes = [1, 8, 32], strides = [1, 1, 1]} : vector<8x8x32xf32> to vector<1x8x32xf32>
      %430 = vector.shape_cast %429 : vector<1x8x32xf32> to vector<8x32xf32>
      %431 = arith.mulf %430, %428 : vector<8x32xf32>
      %432 = vector.extract_strided_slice %386 {offsets = [0, 0, 0], sizes = [1, 8, 32], strides = [1, 1, 1]} : vector<8x8x32xf32> to vector<1x8x32xf32>
      %433 = vector.shape_cast %432 : vector<1x8x32xf32> to vector<8x32xf32>
      %434 = arith.addf %431, %433 : vector<8x32xf32>
      %435 = vector.shape_cast %434 : vector<8x32xf32> to vector<1x8x32xf32>
      %436 = vector.shape_cast %428 : vector<8x32xf32> to vector<1x8x32xf32>
      %437 = vector.shape_cast %422 : vector<8x32xf32> to vector<1x8x32xf32>
      %438 = vector.shape_cast %416 : vector<8x32xf32> to vector<1x8x32xf32>
      %439 = vector.shape_cast %410 : vector<8x32xf32> to vector<1x8x32xf32>
      %440 = vector.shape_cast %404 : vector<8x32xf32> to vector<1x8x32xf32>
      %441 = vector.shape_cast %398 : vector<8x32xf32> to vector<1x8x32xf32>
      %442 = vector.shape_cast %392 : vector<8x32xf32> to vector<1x8x32xf32>
      %443 = tpu.concatenate %435, %436, %437, %438, %439, %440, %441, %442 in 0 : vector<1x8x32xf32>, vector<1x8x32xf32>, vector<1x8x32xf32>, vector<1x8x32xf32>, vector<1x8x32xf32>, vector<1x8x32xf32>, vector<1x8x32xf32>, vector<1x8x32xf32> -> vector<8x8x32xf32>
      %444 = vector.shape_cast %371 : vector<8x8xf32> to vector<8x8x1xf32>
      %445 = vector.broadcast %444 : vector<8x8x1xf32> to vector<8x8x32xf32>
      %446 = arith.mulf %443, %445 : vector<8x8x32xf32>
      %cst_162 = arith.constant dense<0.000000e+00> : vector<8x32xf32>
      %447 = vector.multi_reduction <add>, %446, %cst_162 [1] : vector<8x8x32xf32> to vector<8x32xf32>
      %c0_163 = arith.constant 0 : index
      %448 = arith.index_cast %362 : i32 to index
      %c0_164 = arith.constant 0 : index
      %449 = vector.load %arg7[%c0_163, %448, %c0_164] : memref<1x64x32xf32, #tpu.memory_space<vmem>>, vector<1x8x32xf32>
      %450 = vector.shape_cast %449 : vector<1x8x32xf32> to vector<8x32xf32>
      %451 = arith.addf %450, %447 : vector<8x32xf32>
      %c0_165 = arith.constant 0 : index
      %452 = arith.index_cast %362 : i32 to index
      %c0_166 = arith.constant 0 : index
      %453 = vector.load %arg7[%c0_165, %452, %c0_166] : memref<1x64x32xf32, #tpu.memory_space<vmem>>, vector<1x8x32xf32>
      %454 = vector.shape_cast %453 : vector<1x8x32xf32> to vector<8x32xf32>
      %455 = vector.shape_cast %451 : vector<8x32xf32> to vector<1x8x32xf32>
      tpu.vector_store %arg7[%c0_165, %452, %c0_166], %455 {strides = array<i32>} : memref<1x64x32xf32, #tpu.memory_space<vmem>>, vector<1x8x32xf32>,
      %c56_i32_167 = arith.constant 56 : i32
      %456 = arith.subi %c56_i32_167, %166 : i32
      %457 = tpu.assume_multiple %456, 8 : i32
      %c0_i32_168 = arith.constant 0 : i32
      %458 = arith.addi %c0_i32_168, %457 : i32
      %459 = tpu.assume_multiple %458, 8 : i32
      %c3_169 = arith.constant 3 : index
      %460 = arith.index_cast %457 : i32 to index
      %c0_170 = arith.constant 0 : index
      %461 = vector.load %arg9[%c3_169, %460, %c0_170] : memref<4x64x32xf32, #tpu.memory_space<vmem>>, vector<1x8x32xf32>
      %462 = vector.shape_cast %461 : vector<1x8x32xf32> to vector<8x32xf32>
      %c3_171 = arith.constant 3 : index
      %463 = arith.index_cast %457 : i32 to index
      %c0_172 = arith.constant 0 : index
      %464 = vector.load %arg10[%c3_171, %463, %c0_172] : memref<4x64x8xf32, #tpu.memory_space<vmem>>, vector<1x8x8xf32>
      %465 = vector.shape_cast %464 : vector<1x8x8xf32> to vector<8x8xf32>
      %c3_173 = arith.constant 3 : index
      %466 = arith.index_cast %457 : i32 to index
      %c0_174 = arith.constant 0 : index
      %467 = vector.load %arg11[%c3_173, %466, %c0_174] : memref<4x64x8xf32, #tpu.memory_space<vmem>>, vector<1x8x8xf32>
      %468 = vector.shape_cast %467 : vector<1x8x8xf32> to vector<8x8xf32>
      %c0_175 = arith.constant 0 : index
      %469 = arith.index_cast %459 : i32 to index
      %c0_176 = arith.constant 0 : index
      %470 = vector.load %arg2[%c0_175, %469, %c0_176] : memref<1x64x32xf32, #tpu.memory_space<vmem>>, vector<1x8x32xf32>
      %471 = vector.shape_cast %470 : vector<1x8x32xf32> to vector<8x32xf32>
      %472 = vector.shape_cast %462 : vector<8x32xf32> to vector<8x1x32xf32>
      %473 = vector.shape_cast %7 : vector<8x32xf32> to vector<1x8x32xf32>
      %474 = vector.broadcast %472 : vector<8x1x32xf32> to vector<8x8x32xf32>
      %475 = vector.broadcast %473 : vector<1x8x32xf32> to vector<8x8x32xf32>
      %476 = arith.mulf %474, %475 : vector<8x8x32xf32>
      %477 = math.exp %476 : vector<8x8x32xf32>
      %478 = arith.mulf %462, %471 : vector<8x32xf32>
      %479 = vector.shape_cast %478 : vector<8x32xf32> to vector<8x1x32xf32>
      %480 = vector.shape_cast %465 : vector<8x8xf32> to vector<8x8x1xf32>
      %481 = vector.broadcast %479 : vector<8x1x32xf32> to vector<8x8x32xf32>
      %482 = vector.broadcast %480 : vector<8x8x1xf32> to vector<8x8x32xf32>
      %483 = arith.mulf %481, %482 : vector<8x8x32xf32>
      %484 = vector.extract_strided_slice %477 {offsets = [7, 0, 0], sizes = [1, 8, 32], strides = [1, 1, 1]} : vector<8x8x32xf32> to vector<1x8x32xf32>
      %485 = vector.shape_cast %484 : vector<1x8x32xf32> to vector<8x32xf32>
      %486 = arith.mulf %485, %arg16 : vector<8x32xf32>
      %487 = vector.extract_strided_slice %483 {offsets = [7, 0, 0], sizes = [1, 8, 32], strides = [1, 1, 1]} : vector<8x8x32xf32> to vector<1x8x32xf32>
      %488 = vector.shape_cast %487 : vector<1x8x32xf32> to vector<8x32xf32>
      %489 = arith.addf %486, %488 : vector<8x32xf32>
      %490 = vector.extract_strided_slice %477 {offsets = [6, 0, 0], sizes = [1, 8, 32], strides = [1, 1, 1]} : vector<8x8x32xf32> to vector<1x8x32xf32>
      %491 = vector.shape_cast %490 : vector<1x8x32xf32> to vector<8x32xf32>
      %492 = arith.mulf %491, %489 : vector<8x32xf32>
      %493 = vector.extract_strided_slice %483 {offsets = [6, 0, 0], sizes = [1, 8, 32], strides = [1, 1, 1]} : vector<8x8x32xf32> to vector<1x8x32xf32>
      %494 = vector.shape_cast %493 : vector<1x8x32xf32> to vector<8x32xf32>
      %495 = arith.addf %492, %494 : vector<8x32xf32>
      %496 = vector.extract_strided_slice %477 {offsets = [5, 0, 0], sizes = [1, 8, 32], strides = [1, 1, 1]} : vector<8x8x32xf32> to vector<1x8x32xf32>
      %497 = vector.shape_cast %496 : vector<1x8x32xf32> to vector<8x32xf32>
      %498 = arith.mulf %497, %495 : vector<8x32xf32>
      %499 = vector.extract_strided_slice %483 {offsets = [5, 0, 0], sizes = [1, 8, 32], strides = [1, 1, 1]} : vector<8x8x32xf32> to vector<1x8x32xf32>
      %500 = vector.shape_cast %499 : vector<1x8x32xf32> to vector<8x32xf32>
      %501 = arith.addf %498, %500 : vector<8x32xf32>
      %502 = vector.extract_strided_slice %477 {offsets = [4, 0, 0], sizes = [1, 8, 32], strides = [1, 1, 1]} : vector<8x8x32xf32> to vector<1x8x32xf32>
      %503 = vector.shape_cast %502 : vector<1x8x32xf32> to vector<8x32xf32>
      %504 = arith.mulf %503, %501 : vector<8x32xf32>
      %505 = vector.extract_strided_slice %483 {offsets = [4, 0, 0], sizes = [1, 8, 32], strides = [1, 1, 1]} : vector<8x8x32xf32> to vector<1x8x32xf32>
      %506 = vector.shape_cast %505 : vector<1x8x32xf32> to vector<8x32xf32>
      %507 = arith.addf %504, %506 : vector<8x32xf32>
      %508 = vector.extract_strided_slice %477 {offsets = [3, 0, 0], sizes = [1, 8, 32], strides = [1, 1, 1]} : vector<8x8x32xf32> to vector<1x8x32xf32>
      %509 = vector.shape_cast %508 : vector<1x8x32xf32> to vector<8x32xf32>
      %510 = arith.mulf %509, %507 : vector<8x32xf32>
      %511 = vector.extract_strided_slice %483 {offsets = [3, 0, 0], sizes = [1, 8, 32], strides = [1, 1, 1]} : vector<8x8x32xf32> to vector<1x8x32xf32>
      %512 = vector.shape_cast %511 : vector<1x8x32xf32> to vector<8x32xf32>
      %513 = arith.addf %510, %512 : vector<8x32xf32>
      %514 = vector.extract_strided_slice %477 {offsets = [2, 0, 0], sizes = [1, 8, 32], strides = [1, 1, 1]} : vector<8x8x32xf32> to vector<1x8x32xf32>
      %515 = vector.shape_cast %514 : vector<1x8x32xf32> to vector<8x32xf32>
      %516 = arith.mulf %515, %513 : vector<8x32xf32>
      %517 = vector.extract_strided_slice %483 {offsets = [2, 0, 0], sizes = [1, 8, 32], strides = [1, 1, 1]} : vector<8x8x32xf32> to vector<1x8x32xf32>
      %518 = vector.shape_cast %517 : vector<1x8x32xf32> to vector<8x32xf32>
      %519 = arith.addf %516, %518 : vector<8x32xf32>
      %520 = vector.extract_strided_slice %477 {offsets = [1, 0, 0], sizes = [1, 8, 32], strides = [1, 1, 1]} : vector<8x8x32xf32> to vector<1x8x32xf32>
      %521 = vector.shape_cast %520 : vector<1x8x32xf32> to vector<8x32xf32>
      %522 = arith.mulf %521, %519 : vector<8x32xf32>
      %523 = vector.extract_strided_slice %483 {offsets = [1, 0, 0], sizes = [1, 8, 32], strides = [1, 1, 1]} : vector<8x8x32xf32> to vector<1x8x32xf32>
      %524 = vector.shape_cast %523 : vector<1x8x32xf32> to vector<8x32xf32>
      %525 = arith.addf %522, %524 : vector<8x32xf32>
      %526 = vector.extract_strided_slice %477 {offsets = [0, 0, 0], sizes = [1, 8, 32], strides = [1, 1, 1]} : vector<8x8x32xf32> to vector<1x8x32xf32>
      %527 = vector.shape_cast %526 : vector<1x8x32xf32> to vector<8x32xf32>
      %528 = arith.mulf %527, %525 : vector<8x32xf32>
      %529 = vector.extract_strided_slice %483 {offsets = [0, 0, 0], sizes = [1, 8, 32], strides = [1, 1, 1]} : vector<8x8x32xf32> to vector<1x8x32xf32>
      %530 = vector.shape_cast %529 : vector<1x8x32xf32> to vector<8x32xf32>
      %531 = arith.addf %528, %530 : vector<8x32xf32>
      %532 = vector.shape_cast %531 : vector<8x32xf32> to vector<1x8x32xf32>
      %533 = vector.shape_cast %525 : vector<8x32xf32> to vector<1x8x32xf32>
      %534 = vector.shape_cast %519 : vector<8x32xf32> to vector<1x8x32xf32>
      %535 = vector.shape_cast %513 : vector<8x32xf32> to vector<1x8x32xf32>
      %536 = vector.shape_cast %507 : vector<8x32xf32> to vector<1x8x32xf32>
      %537 = vector.shape_cast %501 : vector<8x32xf32> to vector<1x8x32xf32>
      %538 = vector.shape_cast %495 : vector<8x32xf32> to vector<1x8x32xf32>
      %539 = vector.shape_cast %489 : vector<8x32xf32> to vector<1x8x32xf32>
      %540 = tpu.concatenate %532, %533, %534, %535, %536, %537, %538, %539 in 0 : vector<1x8x32xf32>, vector<1x8x32xf32>, vector<1x8x32xf32>, vector<1x8x32xf32>, vector<1x8x32xf32>, vector<1x8x32xf32>, vector<1x8x32xf32>, vector<1x8x32xf32> -> vector<8x8x32xf32>
      %541 = vector.shape_cast %468 : vector<8x8xf32> to vector<8x8x1xf32>
      %542 = vector.broadcast %541 : vector<8x8x1xf32> to vector<8x8x32xf32>
      %543 = arith.mulf %540, %542 : vector<8x8x32xf32>
      %cst_177 = arith.constant dense<0.000000e+00> : vector<8x32xf32>
      %544 = vector.multi_reduction <add>, %543, %cst_177 [1] : vector<8x8x32xf32> to vector<8x32xf32>
      %c0_178 = arith.constant 0 : index
      %545 = arith.index_cast %459 : i32 to index
      %c0_179 = arith.constant 0 : index
      %546 = vector.load %arg8[%c0_178, %545, %c0_179] : memref<1x64x32xf32, #tpu.memory_space<vmem>>, vector<1x8x32xf32>
      %547 = vector.shape_cast %546 : vector<1x8x32xf32> to vector<8x32xf32>
      %548 = arith.addf %547, %544 : vector<8x32xf32>
      %c0_180 = arith.constant 0 : index
      %549 = arith.index_cast %459 : i32 to index
      %c0_181 = arith.constant 0 : index
      %550 = vector.load %arg8[%c0_180, %549, %c0_181] : memref<1x64x32xf32, #tpu.memory_space<vmem>>, vector<1x8x32xf32>
      %551 = vector.shape_cast %550 : vector<1x8x32xf32> to vector<8x32xf32>
      %552 = vector.shape_cast %548 : vector<8x32xf32> to vector<1x8x32xf32>
      tpu.vector_store %arg8[%c0_180, %549, %c0_181], %552 {strides = array<i32>} : memref<1x64x32xf32, #tpu.memory_space<vmem>>, vector<1x8x32xf32>,
      scf.yield %241, %337, %434, %531 : vector<8x32xf32>, vector<8x32xf32>, vector<8x32xf32>, vector<8x32xf32>
    }
    %c8_i32_123 = arith.constant 8 : i32
    return
  }
  func.func @transform_0(%arg0: i32) -> (i32, i32, i32) {
    %c0_i32 = arith.constant 0 : i32
    %c0_i32_0 = arith.constant 0 : i32
    %c0_i32_1 = arith.constant 0 : i32
    return %arg0, %c0_i32, %c0_i32_0 : i32, i32, i32
  }
  func.func @transform_1(%arg0: i32) -> (i32, i32, i32) {
    %c0_i32 = arith.constant 0 : i32
    %c0_i32_0 = arith.constant 0 : i32
    %c0_i32_1 = arith.constant 0 : i32
    return %arg0, %c0_i32, %c0_i32_0 : i32, i32, i32
  }
  func.func @transform_2(%arg0: i32) -> (i32, i32, i32) {
    %c0_i32 = arith.constant 0 : i32
    %c0_i32_0 = arith.constant 0 : i32
    %c0_i32_1 = arith.constant 0 : i32
    %c0_i32_2 = arith.constant 0 : i32
    return %c0_i32, %c0_i32_0, %c0_i32_1 : i32, i32, i32
  }
  func.func @transform_3(%arg0: i32) -> (i32, i32, i32) {
    %c0_i32 = arith.constant 0 : i32
    %c0_i32_0 = arith.constant 0 : i32
    %c0_i32_1 = arith.constant 0 : i32
    %c0_i32_2 = arith.constant 0 : i32
    return %c0_i32, %c0_i32_0, %c0_i32_1 : i32, i32, i32
  }
  func.func @transform_4(%arg0: i32) -> (i32, i32, i32) {
    %c0_i32 = arith.constant 0 : i32
    %c0_i32_0 = arith.constant 0 : i32
    %c0_i32_1 = arith.constant 0 : i32
    %c0_i32_2 = arith.constant 0 : i32
    return %c0_i32, %c0_i32_0, %c0_i32_1 : i32, i32, i32
  }
  func.func @transform_5(%arg0: i32) -> (i32, i32, i32) {
    %c0_i32 = arith.constant 0 : i32
    %c0_i32_0 = arith.constant 0 : i32
    %c0_i32_1 = arith.constant 0 : i32
    %c0_i32_2 = arith.constant 0 : i32
    return %c0_i32, %c0_i32_0, %c0_i32_1 : i32, i32, i32
  }
  func.func @transform_6(%arg0: i32) -> (i32, i32, i32) {
    %c0_i32 = arith.constant 0 : i32
    %c0_i32_0 = arith.constant 0 : i32
    %c0_i32_1 = arith.constant 0 : i32
    return %arg0, %c0_i32, %c0_i32_0 : i32, i32, i32
  }
  func.func @transform_7(%arg0: i32) -> (i32, i32, i32) {
    %c0_i32 = arith.constant 0 : i32
    %c0_i32_0 = arith.constant 0 : i32
    %c0_i32_1 = arith.constant 0 : i32
    return %arg0, %c0_i32, %c0_i32_0 : i32, i32, i32
  }
}

module attributes {stable_mosaic.version = 11 : i64} {
  func.func @outnorm_gate_proj_kernel(%arg0: i32, %arg1: memref<128x32xf32, #tpu.memory_space<vmem>>, %arg2: memref<128x32xf32, #tpu.memory_space<vmem>>, %arg3: memref<128x32xf32, #tpu.memory_space<vmem>>, %arg4: memref<128x16xf32, #tpu.memory_space<vmem>>, %arg5: memref<1x32xf32, #tpu.memory_space<vmem>>, %arg6: memref<1x32xf32, #tpu.memory_space<vmem>>, %arg7: memref<32x16xbf16, #tpu.memory_space<vmem>>, %arg8: memref<128x16xf32, #tpu.memory_space<vmem>>) attributes {dimension_semantics = [#tpu.dimension_semantics<parallel>], iteration_bounds = array<i64: 1>, scalar_prefetch = 0 : i64, scratch_operands = 0 : i64, tpu.core_type = #tpu.core_type<tc>, window_params = [{transform_indices = @transform_0, window_bounds = array<i64: 128, 32>}, {transform_indices = @transform_1, window_bounds = array<i64: 128, 32>}, {transform_indices = @transform_2, window_bounds = array<i64: 128, 32>}, {transform_indices = @transform_3, window_bounds = array<i64: 128, 16>}, {pipeline_mode = #tpu.pipeline_mode<synchronous>, transform_indices = @transform_4, window_bounds = array<i64: 1, 32>}, {pipeline_mode = #tpu.pipeline_mode<synchronous>, transform_indices = @transform_5, window_bounds = array<i64: 1, 32>}, {pipeline_mode = #tpu.pipeline_mode<synchronous>, transform_indices = @transform_6, window_bounds = array<i64: 32, 16>}, {transform_indices = @transform_7, window_bounds = array<i64: 128, 16>}]} {
    %c0 = arith.constant 0 : index
    %c0_0 = arith.constant 0 : index
    %0 = vector.load %arg1[%c0, %c0_0] : memref<128x32xf32, #tpu.memory_space<vmem>>, vector<128x32xf32>
    %c0_1 = arith.constant 0 : index
    %c0_2 = arith.constant 0 : index
    %1 = vector.load %arg2[%c0_1, %c0_2] : memref<128x32xf32, #tpu.memory_space<vmem>>, vector<128x32xf32>
    %2 = arith.addf %0, %1 : vector<128x32xf32>
    %cst = arith.constant dense<0.000000e+00> : vector<128xf32>
    %3 = vector.multi_reduction <add>, %2, %cst [1] : vector<128x32xf32> to vector<128xf32>
    %4 = vector.shape_cast %3 : vector<128xf32> to vector<128x1xf32>
    %cst_3 = arith.constant 3.200000e+01 : f32
    %5 = vector.broadcast %cst_3 : f32 to vector<128x1xf32>
    %6 = arith.divf %4, %5 : vector<128x1xf32>
    %7 = vector.broadcast %6 : vector<128x1xf32> to vector<128x32xf32>
    %8 = arith.subf %2, %7 : vector<128x32xf32>
    %9 = arith.mulf %8, %8 : vector<128x32xf32>
    %cst_4 = arith.constant dense<0.000000e+00> : vector<128xf32>
    %10 = vector.multi_reduction <add>, %9, %cst_4 [1] : vector<128x32xf32> to vector<128xf32>
    %11 = vector.shape_cast %10 : vector<128xf32> to vector<128x1xf32>
    %cst_5 = arith.constant 3.200000e+01 : f32
    %12 = vector.broadcast %cst_5 : f32 to vector<128x1xf32>
    %13 = arith.divf %11, %12 : vector<128x1xf32>
    %cst_6 = arith.constant 9.99999974E-6 : f32
    %14 = vector.broadcast %cst_6 : f32 to vector<128x1xf32>
    %15 = arith.addf %13, %14 : vector<128x1xf32>
    %16 = math.rsqrt %15 : vector<128x1xf32>
    %17 = vector.broadcast %16 : vector<128x1xf32> to vector<128x32xf32>
    %18 = arith.mulf %8, %17 : vector<128x32xf32>
    %c0_7 = arith.constant 0 : index
    %c0_8 = arith.constant 0 : index
    %19 = vector.load %arg5[%c0_7, %c0_8] : memref<1x32xf32, #tpu.memory_space<vmem>>, vector<1x32xf32>
    %20 = vector.broadcast %19 : vector<1x32xf32> to vector<128x32xf32>
    %21 = arith.mulf %18, %20 : vector<128x32xf32>
    %c0_9 = arith.constant 0 : index
    %c0_10 = arith.constant 0 : index
    %22 = vector.load %arg6[%c0_9, %c0_10] : memref<1x32xf32, #tpu.memory_space<vmem>>, vector<1x32xf32>
    %23 = vector.broadcast %22 : vector<1x32xf32> to vector<128x32xf32>
    %24 = arith.addf %21, %23 : vector<128x32xf32>
    %c0_11 = arith.constant 0 : index
    %c0_12 = arith.constant 0 : index
    %25 = vector.load %arg3[%c0_11, %c0_12] : memref<128x32xf32, #tpu.memory_space<vmem>>, vector<128x32xf32>
    %cst_13 = arith.constant 0.000000e+00 : f32
    %26 = vector.broadcast %cst_13 : f32 to vector<128x32xf32>
    %27 = arith.subf %26, %25 : vector<128x32xf32>
    %28 = math.exp %27 : vector<128x32xf32>
    %cst_14 = arith.constant 1.000000e+00 : f32
    %29 = vector.broadcast %cst_14 : f32 to vector<128x32xf32>
    %30 = arith.addf %29, %28 : vector<128x32xf32>
    %cst_15 = arith.constant 1.000000e+00 : f32
    %31 = vector.broadcast %cst_15 : f32 to vector<128x32xf32>
    %32 = arith.divf %31, %30 : vector<128x32xf32>
    %33 = arith.mulf %25, %32 : vector<128x32xf32>
    %34 = arith.mulf %24, %33 : vector<128x32xf32>
    %35 = arith.truncf %34 : vector<128x32xf32> to vector<128x32xbf16>
    %c0_16 = arith.constant 0 : index
    %c0_17 = arith.constant 0 : index
    %36 = vector.load %arg7[%c0_16, %c0_17] : memref<32x16xbf16, #tpu.memory_space<vmem>>, vector<32x16xbf16>
    %cst_18 = arith.constant dense<0.000000e+00> : vector<128x16xf32>
    %37 = tpu.matmul %35, %36, %cst_18 {dimension_numbers = #tpu.dot_dimension_numbers<[1], [0], [0], [1], [0, 0, 1, 1], [], []>} : vector<128x32xbf16>, vector<32x16xbf16>, vector<128x16xf32> -> vector<128x16xf32>
    %c0_19 = arith.constant 0 : index
    %c0_20 = arith.constant 0 : index
    %38 = vector.load %arg4[%c0_19, %c0_20] : memref<128x16xf32, #tpu.memory_space<vmem>>, vector<128x16xf32>
    %39 = arith.addf %37, %38 : vector<128x16xf32>
    %c0_21 = arith.constant 0 : index
    %c0_22 = arith.constant 0 : index
    %40 = vector.load %arg8[%c0_21, %c0_22] : memref<128x16xf32, #tpu.memory_space<vmem>>, vector<128x16xf32>
    tpu.vector_store %arg8[%c0_21, %c0_22], %39 {strides = array<i32>} : memref<128x16xf32, #tpu.memory_space<vmem>>, vector<128x16xf32>,
    return
  }
  func.func @transform_0(%arg0: i32) -> (i32, i32) {
    %c0_i32 = arith.constant 0 : i32
    %c0_i32_0 = arith.constant 0 : i32
    return %arg0, %c0_i32 : i32, i32
  }
  func.func @transform_1(%arg0: i32) -> (i32, i32) {
    %c0_i32 = arith.constant 0 : i32
    %c0_i32_0 = arith.constant 0 : i32
    return %arg0, %c0_i32 : i32, i32
  }
  func.func @transform_2(%arg0: i32) -> (i32, i32) {
    %c0_i32 = arith.constant 0 : i32
    %c0_i32_0 = arith.constant 0 : i32
    return %arg0, %c0_i32 : i32, i32
  }
  func.func @transform_3(%arg0: i32) -> (i32, i32) {
    %c0_i32 = arith.constant 0 : i32
    %c0_i32_0 = arith.constant 0 : i32
    return %arg0, %c0_i32 : i32, i32
  }
  func.func @transform_4(%arg0: i32) -> (i32, i32) {
    %c0_i32 = arith.constant 0 : i32
    %c0_i32_0 = arith.constant 0 : i32
    %c0_i32_1 = arith.constant 0 : i32
    return %c0_i32, %c0_i32_0 : i32, i32
  }
  func.func @transform_5(%arg0: i32) -> (i32, i32) {
    %c0_i32 = arith.constant 0 : i32
    %c0_i32_0 = arith.constant 0 : i32
    %c0_i32_1 = arith.constant 0 : i32
    return %c0_i32, %c0_i32_0 : i32, i32
  }
  func.func @transform_6(%arg0: i32) -> (i32, i32) {
    %c0_i32 = arith.constant 0 : i32
    %c0_i32_0 = arith.constant 0 : i32
    %c0_i32_1 = arith.constant 0 : i32
    return %c0_i32, %c0_i32_0 : i32, i32
  }
  func.func @transform_7(%arg0: i32) -> (i32, i32) {
    %c0_i32 = arith.constant 0 : i32
    %c0_i32_0 = arith.constant 0 : i32
    return %arg0, %c0_i32 : i32, i32
  }
}

</mosaic_0001>

<bundles_post_ra>
// kernel: vss_block_forward.5
= control target key start
LH: loop header
LB: loop body
LE: loop exit
PB: predicated region body
PF: predicated region fallthrough
CT: control target
= control target key end

     0   :  { %s593_s12 = smov 0   ;;  %s793_s0 = inlined_call_operand.vmem [shape: f32[2,10,10,32], index: 0, kind: input, shape index: {}]   ;;  %s794_s1 = inlined_call_operand.vmem [shape: f32[9,32], index: 1, kind: input, shape index: {}]   ;;  %s795_s2 = inlined_call_operand.vmem [shape: f32[1,32], index: 2, kind: input, shape index: {}]   ;;  %s796_s3 = inlined_call_operand.vmem [shape: f32[2,8,8,32], index: 3, kind: output, shape index: {}]  }
   0x1 LB: > { %s511_s13 = sadd.s32 4294967295, %s571_s12   ;;  %p515_p0 = scmp.ge.s32.totalorder %s571_s12, 1  ;;  %s571_s12 = sphi %s593_s12, %s13_s12  }
   0x2   : > { %p137_p1 = scmp.lt.s32.totalorder %s571_s12, 3 }
   0x4   : > { %p138_p2 = pnand %p515_p0, %p137_p1 }
   0x5   : > { %p161_p3 = scmp.lt.s32.totalorder (!%p138_p2), %s511_s13, 1  ;;  %v211_v0 = vlaneseq (!%p138_p2)  ;;  %v171_v2 = vld [vmem:[%s794_s1] sm:$0xff] (!%p138_p2)  ;;  %v657_v41 = vld [vmem:[%s794_s1 + $0x8] ss:$0 sm:$0xff] (!%p138_p2)  ;;  %vm447_vm0 = vcmask (!%p138_p2), 261120  }
   0x6   : > { %141 = sbr.rel (%p138_p2) target bundleno = 96 (0x60), region = 32  ;;  %v615_v11 = vld [vmem:[%s795_s2] ss:$0 sm:$0xff] (!%p138_p2) }
   0x7   : > { %v212_v1 = vshrl.u32 (!%p138_p2), %v211_v0, 7 }
   0x9   : > { %v213_v3 = vsub.s32 (!%p138_p2), 0, %v212_v1  ;;  %v233_v4 = vsub.s32 (!%p138_p2), 1, %v212_v1  ;;  %v253_v5 = vsub.s32 (!%p138_p2), 2, %v212_v1  ;;  %v273_v6 = vsub.s32 (!%p138_p2), 3, %v212_v1 }
   0xa   : > { %v293_v7 = vsub.s32 (!%p138_p2), 4, %v212_v1  ;;  %v313_v8 = vsub.s32 (!%p138_p2), 5, %v212_v1  ;;  %v333_v9 = vsub.s32 (!%p138_p2), 6, %v212_v1  ;;  %v353_v10 = vsub.s32 (!%p138_p2), 7, %v212_v1 }
   0xb   : > { %v617_v12 = vrot.slane (!%p138_p2), %v171_v2, %v213_v3  ;;  %v619_v13 = vrot.slane (!%p138_p2), %v171_v2, %v233_v4  ;;  %v621_v14 = vrot.slane (!%p138_p2), %v171_v2, %v253_v5  ;;  %v623_v15 = vrot.slane (!%p138_p2), %v171_v2, %v273_v6 }
   0xc   : > { %v628_v19 = vrot.slane (!%p138_p2), %v171_v2, %v293_v7  ;;  %v630_v20 = vrot.slane (!%p138_p2), %v171_v2, %v313_v8  ;;  %v632_v21 = vrot.slane (!%p138_p2), %v171_v2, %v333_v9  ;;  %v640_v28 = vrot.slane (!%p138_p2), %v171_v2, %v353_v10 }
   0xd   : > { %s798_s13 = smov (!%p161_p3, %s511_s13), 1 }
   0xe   : > { %s524_s16 = smul.u32 160, %s798_s13  ;;  %s523_s24 = sshll.u32 %s798_s13, 6 }
   0xf   : > { %s767_s27 = scalar_lea.vmem %s796_s3, %s523_s24 }
  0x10   : > { %s610_s19 = scalar_lea.vmem %s793_s0, %s524_s16 }
  0x11   : > { %v173_v16 = vld [vmem:[%s610_s19] sm:$0xff]  ;;  %v174_v17 = vld [vmem:[%s610_s19 + $0x10] sm:$0xff] }
  0x12   : > { %v175_v18 = vld [vmem:[%s610_s19 + $0x20] sm:$0xff]  ;;  %v184_v23 = vld [vmem:[%s610_s19 + $0x11] sm:$0xff]  ;;  %v215_v25 = vmul.f32 %v617_v12, %v173_v16  ;;  %v216_v26 = vmul.f32 %v617_v12, %v174_v17  ;;  %v275_v35 = vmul.f32 %v623_v15, %v174_v17 }
  0x13   : > { %v183_v22 = vld [vmem:[%s610_s19 + $0x1] sm:$0xff]  ;;  %v217_v27 = vmul.f32 %v617_v12, %v175_v18  ;;  %v194_v30 = vld [vmem:[%s610_s19 + $0x12] sm:$0xff]  ;;  %v236_v33 = vmul.f32 %v619_v13, %v184_v23  ;;  %v276_v39 = vmul.f32 %v623_v15, %v175_v18  ;;  %v295_v44 = vmul.f32 %v628_v19, %v184_v23 }
  0x14   : > { %v185_v24 = vld [vmem:[%s610_s19 + $0x21] sm:$0xff]  ;;  %v235_v32 = vmul.f32 %v619_v13, %v183_v22  ;;  %v223_v36 = vadd.f32 %v615_v11, %v215_v25  ;;  %v176_v40 = vld [vmem:[%s610_s19 + $0x30] sm:$0xff]  ;;  %v256_v42 = vmul.f32 %v621_v14, %v194_v30  ;;  %v315_v49 = vmul.f32 %v630_v20, %v194_v30 }
  0x15   : > { %v193_v29 = vld [vmem:[%s610_s19 + $0x2] sm:$0xff]  ;;  %v237_v34 = vmul.f32 %v619_v13, %v185_v24  ;;  %v225_v37 = vadd.f32 %v615_v11, %v217_v27  ;;  %v296_v45 = vmul.f32 %v628_v19, %v185_v24  ;;  %v186_v46 = vld [vmem:[%s610_s19 + $0x31] sm:$0xff]  ;;  %v335_v52 = vmul.f32 %v632_v21, %v175_v18 }
  0x16   : > { %v195_v31 = vld [vmem:[%s610_s19 + $0x22] sm:$0xff]  ;;  %v255_v38 = vmul.f32 %v621_v14, %v193_v29  ;;  %v243_v47 = vadd.f32 %v235_v32, %v223_v36  ;;  %v196_v51 = vld [vmem:[%s610_s19 + $0x32] sm:$0xff]  ;;  %v355_v53 = vmul.f32 %v640_v28, %v185_v24  ;;  %v218_v54 = vmul.f32 %v617_v12, %v176_v40 }
  0x17   : > { %v257_v43 = vmul.f32 %v621_v14, %v195_v31  ;;  %v245_v48 = vadd.f32 %v237_v34, %v225_v37  ;;  %v316_v50 = vmul.f32 %v630_v20, %v195_v31  ;;  %v224_v55 = vadd.f32 %v615_v11, %v216_v26  ;;  %v177_v60 = vld [vmem:[%s610_s19 + $0x40] sm:$0xff]  ;;  %v178_v27 = vld [vmem:[%s610_s19 + $0x50] sm:$0xff] }
  0x18   : > { %v263_v56 = vadd.f32 %v255_v38, %v243_v47  ;;  %v375_v58 = vmul.f32 %v657_v41, %v195_v31  ;;  %v238_v59 = vmul.f32 %v619_v13, %v186_v46  ;;  %v226_v61 = vadd.f32 %v615_v11, %v218_v54  ;;  %v187_v1 = vld [vmem:[%s610_s19 + $0x41] sm:$0xff]  ;;  %v188_v29 = vld [vmem:[%s610_s19 + $0x51] sm:$0xff] }
  0x19   : > { %v265_v57 = vadd.f32 %v257_v43, %v245_v48  ;;  %v244_v62 = vadd.f32 %v236_v33, %v224_v55  ;;  %v258_v63 = vmul.f32 %v621_v14, %v196_v51  ;;  %v277_v0 = vmul.f32 %v623_v15, %v176_v40  ;;  %v197_v2 = vld [vmem:[%s610_s19 + $0x42] sm:$0xff]  ;;  %v198_v38 = vld [vmem:[%s610_s19 + $0x52] sm:$0xff] }
  0x1a   : > { %v283_v3 = vadd.f32 %v275_v35, %v263_v56  ;;  %v297_v4 = vmul.f32 %v628_v19, %v186_v46  ;;  %v317_v5 = vmul.f32 %v630_v20, %v196_v51  ;;  %v336_v6 = vmul.f32 %v632_v21, %v176_v40 }
  0x1b   : > { %v246_v7 = vadd.f32 %v238_v59, %v226_v61  ;;  %v264_v8 = vadd.f32 %v256_v42, %v244_v62  ;;  %v356_v9 = vmul.f32 %v640_v28, %v186_v46  ;;  %v219_v10 = vmul.f32 %v617_v12, %v177_v60  ;;  %v179_v59 = vld [vmem:[%s610_s19 + $0x60] sm:$0xff] }
  0x1c   : > { %v303_v16 = vadd.f32 %v295_v44, %v283_v3  ;;  %v376_v17 = vmul.f32 %v657_v41, %v196_v51  ;;  %v239_v18 = vmul.f32 %v619_v13, %v187_v1  ;;  %v259_v22 = vmul.f32 %v621_v14, %v197_v2  ;;  %v199_v3 = vld [vmem:[%s610_s19 + $0x62] sm:$0xff] }
  0x1d   : > { %v284_v23 = vadd.f32 %v276_v39, %v264_v8  ;;  %v227_v24 = vadd.f32 %v615_v11, %v219_v10  ;;  %v278_v25 = vmul.f32 %v623_v15, %v177_v60  ;;  %v285_v26 = vadd.f32 %v277_v0, %v265_v57 }
  0x1e   : > { %v323_v30 = vadd.f32 %v315_v49, %v303_v16  ;;  %v266_v31 = vadd.f32 %v258_v63, %v246_v7  ;;  %v298_v32 = vmul.f32 %v628_v19, %v187_v1  ;;  %v318_v33 = vmul.f32 %v630_v20, %v197_v2 }
  0x1f   : > { %v304_v34 = vadd.f32 %v296_v45, %v284_v23  ;;  %v247_v35 = vadd.f32 %v239_v18, %v227_v24  ;;  %v305_v36 = vadd.f32 %v297_v4, %v285_v26  ;;  %v337_v37 = vmul.f32 %v632_v21, %v177_v60 }
  0x20   : > { %v343_v39 = vadd.f32 %v335_v52, %v323_v30  ;;  %v357_v40 = vmul.f32 %v640_v28, %v187_v1  ;;  %v220_v42 = vmul.f32 %v617_v12, %v178_v27  ;;  %v240_v43 = vmul.f32 %v619_v13, %v188_v29 }
  0x21   : > { %v324_v44 = vadd.f32 %v316_v50, %v304_v34  ;;  %v267_v46 = vadd.f32 %v259_v22, %v247_v35  ;;  %v325_v47 = vadd.f32 %v317_v5, %v305_v36  ;;  %v377_v48 = vmul.f32 %v657_v41, %v197_v2 }
  0x22   : > { %v363_v45 = vadd.f32 %v355_v53, %v343_v39  ;;  %v228_v49 = vadd.f32 %v615_v11, %v220_v42  ;;  %v260_v51 = vmul.f32 %v621_v14, %v198_v38  ;;  %v286_v52 = vadd.f32 %v278_v25, %v266_v31  ;;  %v189_v53 = vld [vmem:[%s610_s19 + $0x61] sm:$0xff]  ;;  %v180_v31 = vld [vmem:[%s610_s19 + $0x70] sm:$0xff] }
  0x23   : > { %v344_v54 = vadd.f32 %v336_v6, %v324_v44  ;;  %v345_v55 = vadd.f32 %v337_v37, %v325_v47  ;;  %v279_v56 = vmul.f32 %v623_v15, %v178_v27  ;;  %v299_v57 = vmul.f32 %v628_v19, %v188_v29  ;;  %v200_v42 = vld [vmem:[%s610_s19 + $0x72] sm:$0xff] }
  0x24   : > { %v704_v50 = vadd.f32 %v375_v58, %v363_v45  ;;  %v248_v60 = vadd.f32 %v240_v43, %v228_v49  ;;  %v306_v61 = vadd.f32 %v298_v32, %v286_v52  ;;  %v338_v62 = vmul.f32 %v632_v21, %v178_v27  ;;  %v190_v32 = vld [vmem:[%s610_s19 + $0x71] sm:$0xff] }
  0x25   : > { %v364_v63 = vadd.f32 %v356_v9, %v344_v54  ;;  %v365_v0 = vadd.f32 %v357_v40, %v345_v55  ;;  %v319_v1 = vmul.f32 %v630_v20, %v198_v38  ;;  %v358_v2 = vmul.f32 %v640_v28, %v188_v29  ;;  %v181_v55 = vld [vmem:[%s610_s19 + $0x80] sm:$0xff] }
  0x26   : > { %v391_v4 = vsub.f32 0.0, %v704_v50  ;;  %v326_v5 = vadd.f32 %v318_v33, %v306_v61  ;;  %v378_v6 = vmul.f32 %v657_v41, %v198_v38  ;;  %v221_v58 = vmul.f32 %v617_v12, %v179_v59 }
  0x27   : > { %v714_v7 = vadd.f32 %v376_v17, %v364_v63  ;;  %v716_v8 = vadd.f32 %v377_v48, %v365_v0  ;;  %v268_v9 = vadd.f32 %v260_v51, %v248_v60  ;;  %v241_v10 = vmul.f32 %v619_v13, %v189_v53 }
  0x28   : > { %v399_v16 = vmul.f32 1.442695, %v391_v4  ;;  %v346_v18 = vadd.f32 %v338_v62, %v326_v5  ;;  %v229_v22 = vadd.f32 %v615_v11, %v221_v58  ;;  %v261_v23 = vmul.f32 %v621_v14, %v199_v3  ;;  %v182_v4 = vld [vmem:[%s610_s19 + $0x90] sm:$0xff] }
  0x29   : > { %v392_v24 = vsub.f32 0.0, %v714_v7  ;;  %v393_v25 = vsub.f32 0.0, %v716_v8  ;;  %v280_v17 = vmul.f32 %v623_v15, %v179_v59  ;;  %v287_v26 = vadd.f32 %v279_v56, %v267_v46 }
  0x2a   : > { %533 = vpow2.f32 %v399_v16  ;;  %v366_v27 = vadd.f32 %v358_v2, %v346_v18  ;;  %v249_v29 = vadd.f32 %v241_v10, %v229_v22  ;;  %v300_v30 = vmul.f32 %v628_v19, %v189_v53  ;;  %v192_v22 = vld [vmem:[%s610_s19 + $0x91] sm:$0xff] }
  0x2b   : > { %v401_v33 = vmul.f32 1.442695, %v392_v24  ;;  %v403_v34 = vmul.f32 1.442695, %v393_v25  ;;  %v307_v35 = vadd.f32 %v299_v57, %v287_v26  ;;  %v339_v36 = vmul.f32 %v632_v21, %v179_v59  ;;  %v191_v57 = vld [vmem:[%s610_s19 + $0x81] sm:$0xff] }
  0x2c   : > { %v728_v37 = vadd.f32 %v378_v6, %v366_v27  ;;  %v269_v38 = vadd.f32 %v261_v23, %v249_v29  ;;  %v320_v39 = vmul.f32 %v630_v20, %v199_v3  ;;  %v359_v40 = vmul.f32 %v640_v28, %v189_v53  ;;  %v201_v53 = vld [vmem:[%s610_s19 + $0x82] sm:$0xff] }
  0x2d   : > { %535 = vpow2.f32 %v401_v33  ;;  %v327_v43 = vadd.f32 %v319_v1, %v307_v35  ;;  %v222_v44 = vmul.f32 %v617_v12, %v180_v31  ;;  %v242_v46 = vmul.f32 %v619_v13, %v190_v32  ;;  %v202_v33 = vld [vmem:[%s610_s19 + $0x92] sm:$0xff] }
  0x2e   : > { %537 = vpow2.f32 %v403_v34  ;;  %v394_v47 = vsub.f32 0.0, %v728_v37  ;;  %v379_v48 = vmul.f32 %v657_v41, %v199_v3  ;;  %v281_v45 = vmul.f32 %v623_v15, %v180_v31 }
  0x2f   : > { %v347_v49 = vadd.f32 %v339_v36, %v327_v43  ;;  %v230_v51 = vadd.f32 %v615_v11, %v222_v44  ;;  %v262_v52 = vmul.f32 %v621_v14, %v200_v42  ;;  %v288_v54 = vadd.f32 %v280_v17, %v268_v9 }
  0x30   : > { %v405_v56 = vmul.f32 1.442695, %v394_v47  ;;  %v301_v12 = vmul.f32 %v628_v19, %v190_v32  ;;  %v321_v13 = vmul.f32 %v630_v20, %v200_v42  ;;  %v340_v62 = vmul.f32 %v632_v21, %v180_v31 }
  0x31   : > { %v367_v59 = vadd.f32 %v359_v40, %v347_v49  ;;  %v250_v60 = vadd.f32 %v242_v46, %v230_v51  ;;  %v308_v61 = vadd.f32 %v300_v30, %v288_v54  ;;  %v360_v11 = vmul.f32 %v640_v28, %v190_v32 }
  0x32   : > { %539 = vpow2.f32 %v405_v56  ;;  %v282_v14 = vmul.f32 %v623_v15, %v181_v55  ;;  %v289_v63 = vadd.f32 %v281_v45, %v269_v38  ;;  %v302_v3 = vmul.f32 %v628_v19, %v191_v57 }
  0x33   : > { %v748_v0 = vadd.f32 %v379_v48, %v367_v59  ;;  %v270_v1 = vadd.f32 %v262_v52, %v250_v60  ;;  %v328_v2 = vadd.f32 %v320_v39, %v308_v61  ;;  %v380_v6 = vmul.f32 %v657_v41, %v200_v42 }
  0x34   : > { %v534_v5 = vpop.eup %533  ;;  %v309_v58 = vadd.f32 %v301_v12, %v289_v63  ;;  %v322_v9 = vmul.f32 %v630_v20, %v201_v53  ;;  %v341_v10 = vmul.f32 %v632_v21, %v181_v55  ;;  %v361_v25 = vmul.f32 %v640_v28, %v191_v57 }
  0x35   : > { %v415_v16 = vadd.f32 1.0, %v534_v5  ;;  %v395_v18 = vsub.f32 0.0, %v748_v0  ;;  %v348_v15 = vadd.f32 %v340_v62, %v328_v2  ;;  %v290_v23 = vadd.f32 %v282_v14, %v270_v1 }
  0x36   : > { %v329_v24 = vadd.f32 %v321_v13, %v309_v58  ;;  %v342_v19 = vmul.f32 %v632_v21, %v182_v4  ;;  %v381_v32 = vmul.f32 %v657_v41, %v201_v53  ;;  %v362_v34 = vmul.f32 %v640_v28, %v192_v22 }
  0x37   : > { %v536_v17 = vpop.eup %535  ;;  %541 = vrcp.f32 %v415_v16  ;;  %v407_v26 = vmul.f32 1.442695, %v395_v18  ;;  %v368_v27 = vadd.f32 %v360_v11, %v348_v15  ;;  %v310_v29 = vadd.f32 %v302_v3, %v290_v23 }
  0x38   : > { %v538_v20 = vpop.eup %537  ;;  %v416_v30 = vadd.f32 1.0, %v536_v17  ;;  %v349_v31 = vadd.f32 %v341_v10, %v329_v24  ;;  %v382_v42 = vmul.f32 %v657_v41, %v202_v33 }
  0x39   : > { %v417_v35 = vadd.f32 1.0, %v538_v20  ;;  %543 = vpow2.f32 %v407_v26  ;;  %v388_v36 = vadd.f32 %v380_v6, %v368_v27  ;;  %v330_v38 = vadd.f32 %v322_v9, %v310_v29 }
  0x3a   : > { %545 = vrcp.f32 %v416_v30  ;;  %v369_v21 = vadd.f32 %v361_v25, %v349_v31 }
  0x3b   : > { %547 = vrcp.f32 %v417_v35  ;;  %v396_v39 = vsub.f32 0.0, %v388_v36  ;;  %v350_v40 = vadd.f32 %v342_v19, %v330_v38 }
  0x3c   : > { %v540_v43 = vpop.eup %539  ;;  %v389_v44 = vadd.f32 %v381_v32, %v369_v21 }
  0x3d   : > { %v418_v46 = vadd.f32 1.0, %v540_v43  ;;  %v409_v47 = vmul.f32 1.442695, %v396_v39  ;;  %v370_v48 = vadd.f32 %v362_v34, %v350_v40 }
  0x3e   : > { %v397_v45 = vsub.f32 0.0, %v389_v44 }
  0x3f   : > { %549 = vrcp.f32 %v418_v46  ;;  %v390_v28 = vadd.f32 %v382_v42, %v370_v48 }
  0x40   : > { %551 = vpow2.f32 %v409_v47  ;;  %v411_v49 = vmul.f32 1.442695, %v397_v45 }
  0x41   : > { %v542_v51 = vpop.eup %541  ;;  %v398_v41 = vsub.f32 0.0, %v390_v28 }
  0x42   : > { %v439_v52 = vmul.f32 %v542_v51, %v704_v50  ;;  %553 = vpow2.f32 %v411_v49 }
  0x43   : > { %v544_v54 = vpop.eup %543  ;;  %v413_v55 = vmul.f32 1.442695, %v398_v41 }
  0x44   : > { %v546_v56 = vpop.eup %545  ;;  %448 = vst.msk [vmem:[%s767_s27] sm:$0xff] %vm447_vm0, %v439_v52  ;;  %v419_v12 = vadd.f32 1.0, %v544_v54 }
  0x45   : > { %v548_v13 = vpop.eup %547  ;;  %v440_v57 = vmul.f32 %v546_v56, %v714_v7  ;;  %555 = vpow2.f32 %v413_v55 }
  0x46   : > { %v441_v59 = vmul.f32 %v548_v13, %v716_v8  ;;  %557 = vrcp.f32 %v419_v12 }
  0x47   : > { %449 = vst.msk [vmem:[%s767_s27 + $0x8] sm:$0xff] %vm447_vm0, %v440_v57 }
  0x48   : > { %450 = vst.msk [vmem:[%s767_s27 + $0x10] sm:$0xff] %vm447_vm0, %v441_v59 }
  0x49   : > { %v550_v50 = vpop.eup %549 }
  0x4a   : > { %v552_v60 = vpop.eup %551  ;;  %v442_v61 = vmul.f32 %v550_v50, %v728_v37 }
  0x4b   : > { %v420_v62 = vadd.f32 1.0, %v552_v60 }
  0x4c   : > { %v554_v53 = vpop.eup %553  ;;  %451 = vst.msk [vmem:[%s767_s27 + $0x18] sm:$0xff] %vm447_vm0, %v442_v61 }
  0x4d   : > { %559 = vrcp.f32 %v420_v62  ;;  %v421_v7 = vadd.f32 1.0, %v554_v53 }
  0x4f   : > { %v556_v8 = vpop.eup %555  ;;  %561 = vrcp.f32 %v421_v7 }
  0x50   : > { %v558_v11 = vpop.eup %557  ;;  %v422_v14 = vadd.f32 1.0, %v556_v8 }
  0x51   : > { %v443_v63 = vmul.f32 %v558_v11, %v748_v0 }
  0x52   : > { %563 = vrcp.f32 %v422_v14 }
  0x53   : > { %452 = vst.msk [vmem:[%s767_s27 + $0x20] sm:$0xff] %vm447_vm0, %v443_v63 }
  0x57   : > { %v560_v1 = vpop.eup %559 }
  0x58   : > { %v444_v37 = vmul.f32 %v560_v1, %v388_v36 }
  0x59   : > { %v562_v2 = vpop.eup %561 }
  0x5a   : > { %453 = vst.msk [vmem:[%s767_s27 + $0x28] sm:$0xff] %vm447_vm0, %v444_v37  ;;  %v445_v3 = vmul.f32 %v562_v2, %v389_v44 }
  0x5c   : > { %v564_v4 = vpop.eup %563  ;;  %454 = vst.msk [vmem:[%s767_s27 + $0x30] sm:$0xff] %vm447_vm0, %v445_v3 }
  0x5d   : > { %v446_v5 = vmul.f32 %v564_v4, %v390_v28 }
  0x5f   : > { %455 = vst.msk [vmem:[%s767_s27 + $0x38] sm:$0xff] %vm447_vm0, %v446_v5 }
  0x60 PF: > { %s13_s12 = sadd.s32 1, %s571_s12  }
  0x61   : > { %p10_p4 = scmp.ge.s32.totalorder %s13_s12, 4  }
  0x63   :  { %12 = sbr.rel (!%p10_p4) target bundleno = 1 (0x1), region = 62 }

// kernel: vss_block_forward.4
= control target key start
LH: loop header
LB: loop body
LE: loop exit
PB: predicated region body
PF: predicated region fallthrough
CT: control target
= control target key end

     0   :  { %11 = vsyncpa [#allocation3], 0  ;;  %s650_s18 = smov [#allocation2]   ;;  %s1045_s0 = inlined_call_operand.hbm [shape: f32[128,16], index: 0, kind: input, shape index: {}]   ;;  %s1046_s1 = inlined_call_operand.vmem [shape: f32[1,16], index: 1, kind: input, shape index: {}]   ;;  %s1047_s2 = inlined_call_operand.vmem [shape: f32[1,16], index: 2, kind: input, shape index: {}]   ;;  %s1048_s3 = inlined_call_operand.vmem [shape: bf16[16,64], index: 3, kind: input, shape index: {}]   ;;  %s1049_s4 = inlined_call_operand.vmem [shape: f32[128,32], index: 4, kind: output, shape index: {0}]   ;;  %s1050_s5 = inlined_call_operand.vmem [shape: f32[128,32], index: 5, kind: output, shape index: {1}]  }
   0x1   :  { %s17_s19 = sshll.u32 %s650_s18, 4  ;;  %s626_s22 = scalar_lea.hbm %s1045_s0, 2048  ;;  %s18_s19 = int_to_ptr.vmem [resolvable:$true] %s17_s19 }
   0x2   :  { %p627_p0 = scmp.ne.s32.totalorder %s1045_s0, %s626_s22  ;;  %p630_p1 = scmp.lt.u32.totalorder %s626_s22, %s1045_s0 }
   0x4   :  { %p632_p2 = pnand %p630_p1, %p627_p0 }
   0x6   :  { %635 = shalt.err (!%p632_p2)
}
   0x7   :  { %s636_s27 = scalar_lea.vmem %s18_s19, 2048  ;;  %p641_p4 = scmp.lt.s32.totalorder %s18_s19, %s18_s19 }
   0x8   :  { %p637_p3 = scmp.ne.s32.totalorder %s18_s19, %s636_s27  ;;  %p642_p5 = scmp.lt.s32.totalorder %s636_s27, %s636_s27 }
   0xa   :  { %p643_p6 = por %p642_p5, %p641_p4 }
   0xc   :  { %p644_p7 = pnand %p643_p6, %p637_p3 }
   0xe   :  { %647 = shalt.err (!%p644_p7)
}
   0xf   :  { %s651_s28 = smov 128   ;;  %s652_s29 = smov 8  }
  0x10   :  { %23 = dma.hbm_to_vmem [thread:$0]  %s1045_s0, 2048, %s18_s19, [#allocation3], %s651_s28, %s651_s28, %s652_s29  }
  0x11   :  { %648 = dma.done.wait [#allocation3], 2048  }
  0x12   :  { %649 = vsyncadd [#allocation3], 4294965248  ;;  %vm50_vm0 = vcmask 130048   ;;  %v34_v0 = vld [vmem:[#allocation2] sm:$0xff]  ;;  %v35_v2 = vld [vmem:[#allocation2 + $0x8] sm:$0xff]  ;;  %vm443_vm1 = vcmask 261120  }
  0x13   :  { %v42_v1 = vld [vmem:[#allocation2 + $0x40] sm:$0xff]  ;;  %v51_v3 = vsel %vm50_vm0, %v34_v0, 0.0  ;;  %v43_v5 = vld [vmem:[#allocation2 + $0x48] sm:$0xff]  ;;  %v54_v6 = vsel %vm50_vm0, %v35_v2, 0.0  ;;  %v36_v8 = vld [vmem:[#allocation2 + $0x10] sm:$0xff]  ;;  %s653_s11 = smov 96  }
  0x14   :  { %v75_v4 = vsel %vm50_vm0, %v42_v1, 0.0  ;;  %52 = vadd.xlane.f32.xlu0 %v51_v3  ;;  %v78_v7 = vsel %vm50_vm0, %v43_v5, 0.0  ;;  %v37_v9 = vld [vmem:[#allocation2 + $0x18] sm:$0xff]  ;;  %v57_v10 = vsel %vm50_vm0, %v36_v8, 0.0  ;;  %v702_v12 = vld [vmem:[#allocation2 + $0x50] sm:$0xff]  ;;  %v710_v16 = vld [vmem:[#allocation2 + $0x20] sm:$0xff] }
  0x15   :  { %76 = vadd.xlane.f32.xlu1 %v75_v4  ;;  %v60_v11 = vsel %vm50_vm0, %v37_v9, 0.0  ;;  %v704_v13 = vld [vmem:[#allocation2 + $0x58] sm:$0xff]  ;;  %v81_v14 = vsel %vm50_vm0, %v702_v12, 0.0  ;;  %v712_v17 = vld [vmem:[#allocation2 + $0x28] sm:$0xff]  ;;  %v63_v18 = vsel %vm50_vm0, %v710_v16, 0.0  ;;  %v718_v20 = vld [vmem:[#allocation2 + $0x60] sm:$0xff] }
  0x16   :  { %v84_v15 = vsel %vm50_vm0, %v704_v13, 0.0  ;;  %v66_v19 = vsel %vm50_vm0, %v712_v17, 0.0  ;;  %v720_v21 = vld [vmem:[#allocation2 + $0x68] sm:$0xff]  ;;  %v87_v22 = vsel %vm50_vm0, %v718_v20, 0.0  ;;  %v726_v24 = vld [vmem:[#allocation2 + $0x30] sm:$0xff]  ;;  %v728_v25 = vld [vmem:[#allocation2 + $0x38] sm:$0xff] }
  0x17   :  { %v90_v23 = vsel %vm50_vm0, %v720_v21, 0.0  ;;  %v69_v26 = vsel %vm50_vm0, %v726_v24, 0.0  ;;  %v72_v27 = vsel %vm50_vm0, %v728_v25, 0.0  ;;  %v734_v28 = vld [vmem:[#allocation2 + $0x70] sm:$0xff]  ;;  %v736_v29 = vld [vmem:[#allocation2 + $0x78] sm:$0xff] }
  0x18   :  { %55 = vadd.xlane.f32.xlu0 %v54_v6  ;;  %v93_v30 = vsel %vm50_vm0, %v734_v28, 0.0  ;;  %v96_v31 = vsel %vm50_vm0, %v736_v29, 0.0 }
  0x19   :  { %79 = vadd.xlane.f32.xlu1 %v78_v7 }
  0x1c   :  { %58 = vadd.xlane.f32.xlu0 %v57_v10 }
  0x1d   :  { %61 = vadd.xlane.f32.xlu1 %v60_v11 }
  0x20   :  { %82 = vadd.xlane.f32.xlu0 %v81_v14 }
  0x21   :  { %85 = vadd.xlane.f32.xlu1 %v84_v15 }
  0x24   :  { %64 = vadd.xlane.f32.xlu0 %v63_v18 }
  0x25   :  { %67 = vadd.xlane.f32.xlu1 %v66_v19 }
  0x28   :  { %88 = vadd.xlane.f32.xlu0 %v87_v22 }
  0x29   :  { %91 = vadd.xlane.f32.xlu1 %v90_v23 }
  0x2c   :  { %70 = vadd.xlane.f32.xlu0 %v69_v26 }
  0x2d   :  { %73 = vadd.xlane.f32.xlu1 %v72_v27 }
  0x30   :  { %94 = vadd.xlane.f32.xlu0 %v93_v30 }
  0x31   :  { %97 = vadd.xlane.f32.xlu1 %v96_v31 }
  0xa1   :  { %v53_v32 = vpop.xlane.xlu0 %52 }
  0xa2   :  { %v77_v33 = vpop.xlane.xlu1 %76  ;;  %v100_v34 = vmul.f32 0.0625, %v53_v32 }
  0xa3   :  { %v108_v35 = vmul.f32 0.0625, %v77_v33 }
  0xa4   :  { %v742_v36 = vsub.f32 %v34_v0, %v100_v34 }
  0xa5   :  { %v744_v37 = vsub.f32 %v42_v1, %v108_v35  ;;  %v56_v38 = vpop.xlane.xlu0 %55 }
  0xa6   :  { %v80_v39 = vpop.xlane.xlu1 %79  ;;  %v101_v40 = vmul.f32 0.0625, %v56_v38  ;;  %v132_v42 = vmul.f32 %v742_v36, %v742_v36 }
  0xa7   :  { %v109_v41 = vmul.f32 0.0625, %v80_v39  ;;  %v140_v43 = vmul.f32 %v744_v37, %v744_v37 }
  0xa8   :  { %v750_v44 = vsub.f32 %v35_v2, %v101_v40  ;;  %v148_v46 = vsel %vm50_vm0, %v132_v42, 0.0 }
  0xa9   :  { %v752_v45 = vsub.f32 %v43_v5, %v109_v41  ;;  %149 = vadd.xlane.f32.xlu0 %v148_v46  ;;  %v59_v47 = vpop.xlane.xlu0 %58  ;;  %v172_v49 = vsel %vm50_vm0, %v140_v43, 0.0 }
  0xaa   :  { %v62_v48 = vpop.xlane.xlu1 %61  ;;  %v102_v50 = vmul.f32 0.0625, %v59_v47  ;;  %v133_v52 = vmul.f32 %v750_v44, %v750_v44 }
  0xab   :  { %v103_v51 = vmul.f32 0.0625, %v62_v48  ;;  %v141_v53 = vmul.f32 %v752_v45, %v752_v45 }
  0xac   :  { %v760_v54 = vsub.f32 %v36_v8, %v102_v50  ;;  %v151_v56 = vsel %vm50_vm0, %v133_v52, 0.0 }
  0xad   :  { %v762_v55 = vsub.f32 %v37_v9, %v103_v51  ;;  %173 = vadd.xlane.f32.xlu0 %v172_v49  ;;  %152 = vadd.xlane.f32.xlu1 %v151_v56  ;;  %v83_v57 = vpop.xlane.xlu0 %82  ;;  %v175_v59 = vsel %vm50_vm0, %v141_v53, 0.0 }
  0xae   :  { %v86_v58 = vpop.xlane.xlu1 %85  ;;  %v110_v60 = vmul.f32 0.0625, %v83_v57  ;;  %v134_v62 = vmul.f32 %v760_v54, %v760_v54 }
  0xaf   :  { %v111_v61 = vmul.f32 0.0625, %v86_v58  ;;  %v135_v63 = vmul.f32 %v762_v55, %v762_v55 }
  0xb0   :  { %v771_v0 = vsub.f32 %v702_v12, %v110_v60  ;;  %v154_v2 = vsel %vm50_vm0, %v134_v62, 0.0 }
  0xb1   :  { %v774_v1 = vsub.f32 %v704_v13, %v111_v61  ;;  %176 = vadd.xlane.f32.xlu1 %v175_v59  ;;  %155 = vadd.xlane.f32.xlu0 %v154_v2  ;;  %v65_v3 = vpop.xlane.xlu0 %64  ;;  %v157_v5 = vsel %vm50_vm0, %v135_v63, 0.0 }
  0xb2   :  { %v68_v4 = vpop.xlane.xlu1 %67  ;;  %v104_v6 = vmul.f32 0.0625, %v65_v3  ;;  %v142_v8 = vmul.f32 %v771_v0, %v771_v0 }
  0xb3   :  { %v105_v7 = vmul.f32 0.0625, %v68_v4  ;;  %v143_v9 = vmul.f32 %v774_v1, %v774_v1 }
  0xb4   :  { %v783_v10 = vsub.f32 %v710_v16, %v104_v6  ;;  %v178_v12 = vsel %vm50_vm0, %v142_v8, 0.0 }
  0xb5   :  { %v786_v11 = vsub.f32 %v712_v17, %v105_v7  ;;  %158 = vadd.xlane.f32.xlu1 %v157_v5  ;;  %179 = vadd.xlane.f32.xlu0 %v178_v12  ;;  %v89_v13 = vpop.xlane.xlu0 %88  ;;  %v181_v15 = vsel %vm50_vm0, %v143_v9, 0.0 }
  0xb6   :  { %v92_v14 = vpop.xlane.xlu1 %91  ;;  %v112_v18 = vmul.f32 0.0625, %v89_v13  ;;  %v136_v22 = vmul.f32 %v783_v10, %v783_v10 }
  0xb7   :  { %v113_v19 = vmul.f32 0.0625, %v92_v14  ;;  %v137_v16 = vmul.f32 %v786_v11, %v786_v11 }
  0xb8   :  { %v795_v23 = vsub.f32 %v718_v20, %v112_v18  ;;  %v160_v26 = vsel %vm50_vm0, %v136_v22, 0.0 }
  0xb9   :  { %v798_v17 = vsub.f32 %v720_v21, %v113_v19  ;;  %182 = vadd.xlane.f32.xlu1 %v181_v15  ;;  %161 = vadd.xlane.f32.xlu0 %v160_v26  ;;  %v71_v27 = vpop.xlane.xlu0 %70  ;;  %v163_v31 = vsel %vm50_vm0, %v137_v16, 0.0 }
  0xba   :  { %v74_v30 = vpop.xlane.xlu1 %73  ;;  %v106_v32 = vmul.f32 0.0625, %v71_v27  ;;  %v144_v34 = vmul.f32 %v795_v23, %v795_v23 }
  0xbb   :  { %v107_v33 = vmul.f32 0.0625, %v74_v30  ;;  %v145_v20 = vmul.f32 %v798_v17, %v798_v17  ;;  %v839_v30 = vld [vmem:[%s1046_s1] ss:$0 sm:$0xff] }
  0xbc   :  { %v807_v35 = vsub.f32 %v726_v24, %v106_v32  ;;  %v184_v38 = vsel %vm50_vm0, %v144_v34, 0.0 }
  0xbd   :  { %v810_v21 = vsub.f32 %v728_v25, %v107_v33  ;;  %164 = vadd.xlane.f32.xlu1 %v163_v31  ;;  %185 = vadd.xlane.f32.xlu0 %v184_v38  ;;  %v95_v39 = vpop.xlane.xlu0 %94  ;;  %v187_v41 = vsel %vm50_vm0, %v145_v20, 0.0 }
  0xbe   :  { %v98_v40 = vpop.xlane.xlu1 %97  ;;  %v114_v42 = vmul.f32 0.0625, %v95_v39  ;;  %v138_v46 = vmul.f32 %v807_v35, %v807_v35 }
  0xbf   :  { %v115_v43 = vmul.f32 0.0625, %v98_v40  ;;  %v139_v24 = vmul.f32 %v810_v21, %v810_v21 }
  0xc0   :  { %v819_v47 = vsub.f32 %v734_v28, %v114_v42  ;;  %v166_v48 = vsel %vm50_vm0, %v138_v46, 0.0  ;;  %v846_v42 = vld [vmem:[%s1047_s2] ss:$0 sm:$0xff] }
  0xc1   :  { %v822_v25 = vsub.f32 %v736_v29, %v115_v43  ;;  %188 = vadd.xlane.f32.xlu1 %v187_v41  ;;  %167 = vadd.xlane.f32.xlu0 %v166_v48  ;;  %v169_v49 = vsel %vm50_vm0, %v139_v24, 0.0  ;;  %v593_v29 = vld [vmem:[%s1048_s3] sm:$0xff]  }
  0xc2   :  { %v146_v50 = vmul.f32 %v819_v47, %v819_v47  ;;  %569 = vmatprep.subr.bf16.mxu0 %v593_v29  ;;  %587 = vmatprep.subr.bf16.mxu1 %v593_v29 }
  0xc3   :  { %v147_v51 = vmul.f32 %v822_v25, %v822_v25  ;;  %570 = vmatpush3.bf16.msra.mxu0 %v593_v29  ;;  %588 = vmatpush3.bf16.msra.mxu1 %v593_v29 }
  0xc4   :  { %v190_v52 = vsel %vm50_vm0, %v146_v50, 0.0 }
  0xc5   :  { %170 = vadd.xlane.f32.xlu1 %v169_v49  ;;  %191 = vadd.xlane.f32.xlu0 %v190_v52  ;;  %v193_v28 = vsel %vm50_vm0, %v147_v51, 0.0 }
  0xc9   :  { %194 = vadd.xlane.f32.xlu1 %v193_v28 }
 0x136   :  { %v150_v53 = vpop.xlane.xlu0 %149 }
 0x137   :  { %v196_v56 = vmul.f32 0.0625, %v150_v53 }
 0x139   :  { %v212_v57 = vadd.f32 1e-06, %v196_v56 }
 0x13a   :  { %v153_v58 = vpop.xlane.xlu1 %152  ;;  %v174_v59 = vpop.xlane.xlu0 %173 }
 0x13b   :  { %594 = vrsqrt.f32 %v212_v57  ;;  %v197_v60 = vmul.f32 0.0625, %v153_v58  ;;  %v204_v61 = vmul.f32 0.0625, %v174_v59 }
 0x13d   :  { %v213_v62 = vadd.f32 1e-06, %v197_v60  ;;  %v220_v63 = vadd.f32 1e-06, %v204_v61 }
 0x13e   :  { %v177_v2 = vpop.xlane.xlu1 %176  ;;  %v156_v3 = vpop.xlane.xlu0 %155 }
 0x13f   :  { %596 = vrsqrt.f32 %v213_v62  ;;  %v205_v4 = vmul.f32 0.0625, %v177_v2  ;;  %v198_v5 = vmul.f32 0.0625, %v156_v3 }
 0x140   :  { %598 = vrsqrt.f32 %v220_v63 }
 0x141   :  { %v221_v6 = vadd.f32 1e-06, %v205_v4  ;;  %v214_v7 = vadd.f32 1e-06, %v198_v5 }
 0x142   :  { %v159_v8 = vpop.xlane.xlu1 %158  ;;  %v180_v9 = vpop.xlane.xlu0 %179 }
 0x143   :  { %600 = vrsqrt.f32 %v221_v6  ;;  %v199_v12 = vmul.f32 0.0625, %v159_v8  ;;  %v206_v13 = vmul.f32 0.0625, %v180_v9 }
 0x144   :  { %602 = vrsqrt.f32 %v214_v7 }
 0x145   :  { %v595_v14 = vpop.eup %594  ;;  %v215_v15 = vadd.f32 1e-06, %v199_v12  ;;  %v222_v18 = vadd.f32 1e-06, %v206_v13 }
 0x146   :  { %v183_v19 = vpop.xlane.xlu1 %182  ;;  %v162_v22 = vpop.xlane.xlu0 %161  ;;  %v244_v16 = vmul.f32 %v595_v14, %v742_v36 }
 0x147   :  { %604 = vrsqrt.f32 %v215_v15  ;;  %v207_v26 = vmul.f32 0.0625, %v183_v19  ;;  %v200_v27 = vmul.f32 0.0625, %v162_v22 }
 0x148   :  { %606 = vrsqrt.f32 %v222_v18  ;;  %v267_v40 = vmul.f32 %v839_v30, %v244_v16 }
 0x149   :  { %v597_v31 = vpop.eup %596  ;;  %v223_v32 = vadd.f32 1e-06, %v207_v26  ;;  %v216_v33 = vadd.f32 1e-06, %v200_v27 }
 0x14a   :  { %v599_v34 = vpop.eup %598  ;;  %v165_v20 = vpop.xlane.xlu1 %164  ;;  %v245_v39 = vmul.f32 %v597_v31, %v750_v44  ;;  %v290_v52 = vadd.f32 %v846_v42, %v267_v40 }
 0x14b   :  { %v186_v38 = vpop.xlane.xlu0 %185  ;;  %608 = vrsqrt.f32 %v223_v32  ;;  %v201_v36 = vmul.f32 0.0625, %v165_v20  ;;  %v252_v43 = vmul.f32 %v599_v34, %v744_v37 }
 0x14c   :  { %v208_v41 = vmul.f32 0.0625, %v186_v38  ;;  %610 = vrsqrt.f32 %v216_v33  ;;  %v268_v46 = vmul.f32 %v839_v30, %v245_v39 }
 0x14d   :  { %v601_v24 = vpop.eup %600  ;;  %v217_v48 = vadd.f32 1e-06, %v201_v36  ;;  %v275_v53 = vmul.f32 %v839_v30, %v252_v43 }
 0x14e   :  { %v224_v49 = vadd.f32 1e-06, %v208_v41  ;;  %v603_v50 = vpop.eup %602  ;;  %v189_v44 = vpop.xlane.xlu1 %188  ;;  %v291_v28 = vadd.f32 %v846_v42, %v268_v46  ;;  %v253_v29 = vmul.f32 %v601_v24, %v752_v45 }
 0x14f   :  { %v168_v51 = vpop.xlane.xlu0 %167  ;;  %v246_v56 = vmul.f32 %v603_v50, %v760_v54  ;;  %612 = vrsqrt.f32 %v217_v48  ;;  %v209_v37 = vmul.f32 0.0625, %v189_v44  ;;  %v298_v4 = vadd.f32 %v846_v42, %v275_v53 }
 0x150   :  { %v202_v57 = vmul.f32 0.0625, %v168_v51  ;;  %614 = vrsqrt.f32 %v224_v49  ;;  %v306_v58 = vpack.c.bf16 %v291_v28, %v290_v52  ;;  %v276_v59 = vmul.f32 %v839_v30, %v253_v29 }
 0x151   :  { %v605_v60 = vpop.eup %604  ;;  %v225_v61 = vadd.f32 1e-06, %v209_v37  ;;  %v269_v5 = vmul.f32 %v839_v30, %v246_v56 }
 0x152   :  { %v218_v62 = vadd.f32 1e-06, %v202_v57  ;;  %v607_v63 = vpop.eup %606  ;;  %v247_v2 = vmul.f32 %v605_v60, %v762_v55  ;;  %v171_v3 = vpop.xlane.xlu1 %170  ;;  %571 = vmatprep.mubr.msk.bf16.mxu0 %vm50_vm0, %v306_v58  ;;  %v299_v54 = vadd.f32 %v846_v42, %v276_v59 }
 0x153   :  { %v192_v45 = vpop.xlane.xlu0 %191  ;;  %v254_v6 = vmul.f32 %v607_v63, %v771_v0  ;;  %616 = vrsqrt.f32 %v225_v61  ;;  %v203_v7 = vmul.f32 0.0625, %v171_v3  ;;  %v292_v22 = vadd.f32 %v846_v42, %v269_v5 }
 0x154   :  { %v210_v8 = vmul.f32 0.0625, %v192_v45  ;;  %618 = vrsqrt.f32 %v218_v62  ;;  %v310_v9 = vpack.c.bf16 %v299_v54, %v298_v4  ;;  %v270_v12 = vmul.f32 %v839_v30, %v247_v2 }
 0x155   :  { %v609_v55 = vpop.eup %608  ;;  %v219_v13 = vadd.f32 1e-06, %v203_v7  ;;  %v277_v16 = vmul.f32 %v839_v30, %v254_v6 }
 0x156   :  { %v226_v14 = vadd.f32 1e-06, %v210_v8  ;;  %v611_v15 = vpop.eup %610  ;;  %v255_v18 = vmul.f32 %v609_v55, %v774_v1  ;;  %v195_v19 = vpop.xlane.xlu1 %194  ;;  %579 = vmatprep.mubr.msk.bf16.mxu1 %vm50_vm0, %v310_v9  ;;  %v293_v0 = vadd.f32 %v846_v42, %v270_v12 }
 0x157   :  { %v248_v26 = vmul.f32 %v611_v15, %v783_v10  ;;  %620 = vrsqrt.f32 %v219_v13  ;;  %v211_v27 = vmul.f32 0.0625, %v195_v19  ;;  %v300_v38 = vadd.f32 %v846_v42, %v277_v16 }
 0x158   :  { %622 = vrsqrt.f32 %v226_v14  ;;  %v307_v31 = vpack.c.bf16 %v293_v0, %v292_v22  ;;  %v278_v32 = vmul.f32 %v839_v30, %v255_v18 }
 0x159   :  { %v613_v33 = vpop.eup %612  ;;  %v227_v34 = vadd.f32 1e-06, %v211_v27  ;;  %v271_v40 = vmul.f32 %v839_v30, %v248_v26 }
 0x15a   :  { %v615_v1 = vpop.eup %614  ;;  %v249_v20 = vmul.f32 %v613_v33, %v786_v11  ;;  %572 = vmatmul.mubr.msk.bf16.vlgmr.msra.gmra.mrb[0].mxu0 %vm50_vm0, %v307_v31  ;;  %v301_v39 = vadd.f32 %v846_v42, %v278_v32 }
 0x15b   :  { %v256_v10 = vmul.f32 %v615_v1, %v795_v23  ;;  %624 = vrsqrt.f32 %v227_v34  ;;  %v294_v11 = vadd.f32 %v846_v42, %v271_v40 }
 0x15c   :  { %v311_v36 = vpack.c.bf16 %v301_v39, %v300_v38  ;;  %v272_v41 = vmul.f32 %v839_v30, %v249_v20 }
 0x15d   :  { %v617_v43 = vpop.eup %616  ;;  %v279_v49 = vmul.f32 %v839_v30, %v256_v10 }
 0x15e   :  { %v619_v46 = vpop.eup %618  ;;  %v257_v24 = vmul.f32 %v617_v43, %v798_v17  ;;  %580 = vmatmul.mubr.msk.bf16.vlgmr.msra.gmra.mrb[0].mxu1 %vm50_vm0, %v311_v36  ;;  %v295_v48 = vadd.f32 %v846_v42, %v272_v41 }
 0x15f   :  { %v250_v50 = vmul.f32 %v619_v46, %v807_v35  ;;  %v302_v17 = vadd.f32 %v846_v42, %v279_v49 }
 0x160   :  { %v308_v44 = vpack.c.bf16 %v295_v48, %v294_v11  ;;  %v280_v23 = vmul.f32 %v839_v30, %v257_v24 }
 0x161   :  { %v621_v51 = vpop.eup %620  ;;  %v273_v53 = vmul.f32 %v839_v30, %v250_v50 }
 0x162   :  { %v623_v52 = vpop.eup %622  ;;  %v251_v28 = vmul.f32 %v621_v51, %v810_v21  ;;  %575 = vmatprep.mubr.msk.bf16.mxu0 %vm50_vm0, %v308_v44  ;;  %v303_v29 = vadd.f32 %v846_v42, %v280_v23 }
 0x163   :  { %v258_v56 = vmul.f32 %v623_v52, %v819_v47  ;;  %v296_v21 = vadd.f32 %v846_v42, %v273_v53 }
 0x164   :  { %v312_v37 = vpack.c.bf16 %v303_v29, %v302_v17  ;;  %v274_v35 = vmul.f32 %v839_v30, %v251_v28 }
 0x165   :  { %v625_v57 = vpop.eup %624  ;;  %v281_v60 = vmul.f32 %v839_v30, %v258_v56 }
 0x166   :  { %v259_v58 = vmul.f32 %v625_v57, %v822_v25  ;;  %583 = vmatprep.mubr.msk.bf16.mxu1 %vm50_vm0, %v312_v37  ;;  %v297_v59 = vadd.f32 %v846_v42, %v274_v35 }
 0x167   :  { %v304_v47 = vadd.f32 %v846_v42, %v281_v60 }
 0x168   :  { %v309_v61 = vpack.c.bf16 %v297_v59, %v296_v21  ;;  %v282_v62 = vmul.f32 %v839_v30, %v259_v58 }
 0x16a   :  { %576 = vmatmul.mubr.msk.bf16.gmra.mrb[4].mxu0 %vm50_vm0, %v309_v61  ;;  %v305_v63 = vadd.f32 %v846_v42, %v282_v62 }
 0x16c   :  { %v313_v2 = vpack.c.bf16 %v305_v63, %v304_v47 }
 0x16e   :  { %584 = vmatmul.mubr.msk.bf16.gmra.mrb[4].mxu1 %vm50_vm0, %v313_v2 }
 0x22d   :  { %v573_v25 = vpop.f32.mrb[0].mxu0 }
 0x22e   :  { %446 = vst.msk [vmem:[%s1049_s4 + $0x10] sm:$0xff] %vm443_vm1, %v573_v25  ;;  %480 = vrot.lane.b32.xlu1 %v573_v25, %s653_s11  ;;  %v380_v30 = vpop.f32.mrb[1].mxu0 }
 0x22f   :  { %444 = vst.msk [vmem:[%s1049_s4] sm:$0xff] %vm443_vm1, %v380_v30  ;;  %v574_v42 = vpop.f32.mrb[2].mxu0 }
 0x230   :  { %447 = vst.msk [vmem:[%s1049_s4 + $0x18] sm:$0xff] %vm443_vm1, %v574_v42  ;;  %v383_v3 = vpop.f32.mrb[3].mxu0 }
 0x231   :  { %445 = vst.msk [vmem:[%s1049_s4 + $0x8] sm:$0xff] %vm443_vm1, %v383_v3  ;;  %v581_v45 = vpop.f32.mrb[0].mxu1 }
 0x232   :  { %454 = vst.msk [vmem:[%s1049_s4 + $0x50] sm:$0xff] %vm443_vm1, %v581_v45  ;;  %482 = vrot.lane.b32.xlu1 %v574_v42, %s653_s11  ;;  %496 = vrot.lane.b32.xlu0 %v581_v45, %s653_s11  ;;  %v412_v4 = vpop.f32.mrb[1].mxu1 }
 0x233   :  { %452 = vst.msk [vmem:[%s1049_s4 + $0x40] sm:$0xff] %vm443_vm1, %v412_v4  ;;  %v582_v54 = vpop.f32.mrb[2].mxu1 }
 0x234   :  { %455 = vst.msk [vmem:[%s1049_s4 + $0x58] sm:$0xff] %vm443_vm1, %v582_v54  ;;  %v415_v5 = vpop.f32.mrb[3].mxu1 }
 0x235   :  { %453 = vst.msk [vmem:[%s1049_s4 + $0x48] sm:$0xff] %vm443_vm1, %v415_v5 }
 0x236   :  { %476 = vrot.lane.b32.xlu0 %v380_v30, %s653_s11  ;;  %498 = vrot.lane.b32.xlu1 %v582_v54, %s653_s11 }
 0x23a   :  { %492 = vrot.lane.b32.xlu0 %v412_v4, %s653_s11  ;;  %478 = vrot.lane.b32.xlu1 %v383_v3, %s653_s11 }
 0x23d   :  { %v577_v6 = vpop.f32.mrb[4].mxu0 }
 0x23e   :  { %450 = vst.msk [vmem:[%s1049_s4 + $0x30] sm:$0xff] %vm443_vm1, %v577_v6  ;;  %494 = vrot.lane.b32.xlu1 %v415_v5, %s653_s11  ;;  %488 = vrot.lane.b32.xlu0 %v577_v6, %s653_s11  ;;  %v396_v7 = vpop.f32.mrb[5].mxu0 }
 0x23f   :  { %448 = vst.msk [vmem:[%s1049_s4 + $0x20] sm:$0xff] %vm443_vm1, %v396_v7  ;;  %v578_v8 = vpop.f32.mrb[6].mxu0 }
 0x240   :  { %451 = vst.msk [vmem:[%s1049_s4 + $0x38] sm:$0xff] %vm443_vm1, %v578_v8  ;;  %v399_v9 = vpop.f32.mrb[7].mxu0 }
 0x241   :  { %449 = vst.msk [vmem:[%s1049_s4 + $0x28] sm:$0xff] %vm443_vm1, %v399_v9  ;;  %v585_v12 = vpop.f32.mrb[4].mxu1 }
 0x242   :  { %458 = vst.msk [vmem:[%s1049_s4 + $0x70] sm:$0xff] %vm443_vm1, %v585_v12  ;;  %484 = vrot.lane.b32.xlu0 %v396_v7, %s653_s11  ;;  %490 = vrot.lane.b32.xlu1 %v578_v8, %s653_s11  ;;  %v428_v55 = vpop.f32.mrb[5].mxu1 }
 0x243   :  { %456 = vst.msk [vmem:[%s1049_s4 + $0x60] sm:$0xff] %vm443_vm1, %v428_v55  ;;  %v586_v13 = vpop.f32.mrb[6].mxu1 }
 0x244   :  { %459 = vst.msk [vmem:[%s1049_s4 + $0x78] sm:$0xff] %vm443_vm1, %v586_v13  ;;  %v431_v14 = vpop.f32.mrb[7].mxu1 }
 0x245   :  { %457 = vst.msk [vmem:[%s1049_s4 + $0x68] sm:$0xff] %vm443_vm1, %v431_v14 }
 0x246   :  { %486 = vrot.lane.b32.xlu1 %v399_v9, %s653_s11  ;;  %500 = vrot.lane.b32.xlu0 %v428_v55, %s653_s11 }
 0x24a   :  { %504 = vrot.lane.b32.xlu0 %v585_v12, %s653_s11  ;;  %502 = vrot.lane.b32.xlu1 %v431_v14, %s653_s11 }
 0x24e   :  { %506 = vrot.lane.b32.xlu1 %v586_v13, %s653_s11 }
 0x2a0   :  { %v481_v15 = vpop.permute.xlu1 %480 }
 0x2a1   :  { %526 = vst.msk [vmem:[%s1050_s5 + $0x10] sm:$0xff] %vm443_vm1, %v481_v15 }
 0x2a4   :  { %v483_v18 = vpop.permute.xlu1 %482  ;;  %v497_v19 = vpop.permute.xlu0 %496 }
 0x2a5   :  { %527 = vst.msk [vmem:[%s1050_s5 + $0x18] sm:$0xff] %vm443_vm1, %v483_v18  ;;  %534 = vst.msk [vmem:[%s1050_s5 + $0x50] sm:$0xff] %vm443_vm1, %v497_v19 }
 0x2a8   :  { %v499_v22 = vpop.permute.xlu1 %498  ;;  %v477_v0 = vpop.permute.xlu0 %476 }
 0x2a9   :  { %535 = vst.msk [vmem:[%s1050_s5 + $0x58] sm:$0xff] %vm443_vm1, %v499_v22  ;;  %524 = vst.msk [vmem:[%s1050_s5] sm:$0xff] %vm443_vm1, %v477_v0 }
 0x2ac   :  { %v479_v16 = vpop.permute.xlu1 %478  ;;  %v493_v26 = vpop.permute.xlu0 %492 }
 0x2ad   :  { %525 = vst.msk [vmem:[%s1050_s5 + $0x8] sm:$0xff] %vm443_vm1, %v479_v16  ;;  %532 = vst.msk [vmem:[%s1050_s5 + $0x40] sm:$0xff] %vm443_vm1, %v493_v26 }
 0x2b0   :  { %v495_v27 = vpop.permute.xlu1 %494  ;;  %v489_v31 = vpop.permute.xlu0 %488 }
 0x2b1   :  { %533 = vst.msk [vmem:[%s1050_s5 + $0x48] sm:$0xff] %vm443_vm1, %v495_v27  ;;  %530 = vst.msk [vmem:[%s1050_s5 + $0x30] sm:$0xff] %vm443_vm1, %v489_v31 }
 0x2b4   :  { %v491_v32 = vpop.permute.xlu1 %490  ;;  %v485_v33 = vpop.permute.xlu0 %484 }
 0x2b5   :  { %531 = vst.msk [vmem:[%s1050_s5 + $0x38] sm:$0xff] %vm443_vm1, %v491_v32  ;;  %528 = vst.msk [vmem:[%s1050_s5 + $0x20] sm:$0xff] %vm443_vm1, %v485_v33 }
 0x2b8   :  { %v487_v34 = vpop.permute.xlu1 %486  ;;  %v501_v1 = vpop.permute.xlu0 %500 }
 0x2b9   :  { %529 = vst.msk [vmem:[%s1050_s5 + $0x28] sm:$0xff] %vm443_vm1, %v487_v34  ;;  %536 = vst.msk [vmem:[%s1050_s5 + $0x60] sm:$0xff] %vm443_vm1, %v501_v1 }
 0x2bc   :  { %v503_v20 = vpop.permute.xlu1 %502  ;;  %v505_v38 = vpop.permute.xlu0 %504 }
 0x2bd   :  { %537 = vst.msk [vmem:[%s1050_s5 + $0x68] sm:$0xff] %vm443_vm1, %v503_v20  ;;  %538 = vst.msk [vmem:[%s1050_s5 + $0x70] sm:$0xff] %vm443_vm1, %v505_v38 }
 0x2c0   :  { %v507_v39 = vpop.permute.xlu1 %506 }
 0x2c1   :  { %539 = vst.msk [vmem:[%s1050_s5 + $0x78] sm:$0xff] %vm443_vm1, %v507_v39 }
 0x2c2   :  { %548 = vsyncpa [#allocation3], 1 }

// kernel: vss_block_forward.7
= control target key start
LH: loop header
LB: loop body
LE: loop exit
PB: predicated region body
PF: predicated region fallthrough
CT: control target
= control target key end

     0   :  { %vm76_vm0 = vcmask 261120   ;;  %s1427_s0 = inlined_call_operand.vmem [shape: f32[128,32], index: 0, kind: input, shape index: {}]   ;;  %s1428_s1 = inlined_call_operand.vmem [shape: f32[128,32], index: 1, kind: input, shape index: {}]   ;;  %s1429_s2 = inlined_call_operand.vmem [shape: f32[128,32], index: 2, kind: input, shape index: {}]   ;;  %s1430_s3 = inlined_call_operand.vmem [shape: f32[128,16], index: 3, kind: input, shape index: {}]   ;;  %s1431_s4 = inlined_call_operand.vmem [shape: f32[1,32], index: 4, kind: input, shape index: {}]   ;;  %s1432_s5 = inlined_call_operand.vmem [shape: f32[1,32], index: 5, kind: input, shape index: {}]   ;;  %s1433_s6 = inlined_call_operand.vmem [shape: bf16[32,16], index: 6, kind: input, shape index: {}]   ;;  %s1434_s7 = inlined_call_operand.hbm [shape: f32[128,16], index: 7, kind: output, shape index: {}]  }
   0x1   :  { %v28_v0 = vld [vmem:[%s1427_s0] sm:$0xff]  ;;  %v29_v5 = vld [vmem:[%s1427_s0 + $0x8] sm:$0xff]  ;;  %v30_v11 = vld [vmem:[%s1427_s0 + $0x10] sm:$0xff] }
   0x2   :  { %v44_v1 = vld [vmem:[%s1428_s1] sm:$0xff]  ;;  %v45_v6 = vld [vmem:[%s1428_s1 + $0x8] sm:$0xff]  ;;  %v46_v14 = vld [vmem:[%s1428_s1 + $0x10] sm:$0xff] }
   0x3   :  { %v36_v2 = vld [vmem:[%s1427_s0 + $0x40] sm:$0xff]  ;;  %v893_v3 = vadd.f32 %v44_v1, %v28_v0  ;;  %v906_v8 = vadd.f32 %v45_v6, %v29_v5  ;;  %v37_v9 = vld [vmem:[%s1427_s0 + $0x48] sm:$0xff]  ;;  %v31_v15 = vld [vmem:[%s1427_s0 + $0x18] sm:$0xff]  ;;  %v934_v19 = vadd.f32 %v46_v14, %v30_v11 }
   0x4   :  { %v52_v4 = vld [vmem:[%s1428_s1 + $0x40] sm:$0xff]  ;;  %v53_v10 = vld [vmem:[%s1428_s1 + $0x48] sm:$0xff]  ;;  %v47_v16 = vld [vmem:[%s1428_s1 + $0x18] sm:$0xff] }
   0x5   :  { %v904_v7 = vadd.f32 %v52_v4, %v36_v2  ;;  %v77_v12 = vsel %vm76_vm0, %v893_v3, 0.0  ;;  %v919_v13 = vadd.f32 %v53_v10, %v37_v9  ;;  %v80_v18 = vsel %vm76_vm0, %v906_v8, 0.0  ;;  %v38_v22 = vld [vmem:[%s1427_s0 + $0x50] sm:$0xff]  ;;  %v39_v24 = vld [vmem:[%s1427_s0 + $0x58] sm:$0xff]  ;;  %v32_v28 = vld [vmem:[%s1427_s0 + $0x20] sm:$0xff] }
   0x6   :  { %78 = vadd.xlane.f32.xlu0 %v77_v12  ;;  %v938_v21 = vadd.f32 %v47_v16, %v31_v15  ;;  %v54_v23 = vld [vmem:[%s1428_s1 + $0x50] sm:$0xff]  ;;  %v55_v25 = vld [vmem:[%s1428_s1 + $0x58] sm:$0xff]  ;;  %v83_v26 = vsel %vm76_vm0, %v934_v19, 0.0  ;;  %v48_v31 = vld [vmem:[%s1428_s1 + $0x20] sm:$0xff] }
   0x7   :  { %v101_v17 = vsel %vm76_vm0, %v904_v7, 0.0  ;;  %v104_v20 = vsel %vm76_vm0, %v919_v13, 0.0  ;;  %v954_v27 = vadd.f32 %v54_v23, %v38_v22  ;;  %v961_v30 = vadd.f32 %v55_v25, %v39_v24  ;;  %v33_v32 = vld [vmem:[%s1427_s0 + $0x28] sm:$0xff] }
   0x8   :  { %102 = vadd.xlane.f32.xlu1 %v101_v17  ;;  %v86_v29 = vsel %vm76_vm0, %v938_v21, 0.0  ;;  %v49_v33 = vld [vmem:[%s1428_s1 + $0x28] sm:$0xff] }
   0xa   :  { %81 = vadd.xlane.f32.xlu0 %v80_v18 }
   0xc   :  { %105 = vadd.xlane.f32.xlu1 %v104_v20 }
   0xe   :  { %84 = vadd.xlane.f32.xlu0 %v83_v26 }
   0xf   :  { %12 = vsyncpa [#allocation3], 0  ;;  %v107_v34 = vsel %vm76_vm0, %v954_v27, 0.0  ;;  %v974_v35 = vadd.f32 %v48_v31, %v32_v28  ;;  %v110_v36 = vsel %vm76_vm0, %v961_v30, 0.0  ;;  %v978_v37 = vadd.f32 %v49_v33, %v33_v32  ;;  %v40_v38 = vld [vmem:[%s1427_s0 + $0x60] sm:$0xff]  ;;  %v41_v40 = vld [vmem:[%s1427_s0 + $0x68] sm:$0xff] }
  0x10   :  { %87 = vadd.xlane.f32.xlu1 %v86_v29  ;;  %v56_v39 = vld [vmem:[%s1428_s1 + $0x60] sm:$0xff]  ;;  %v57_v41 = vld [vmem:[%s1428_s1 + $0x68] sm:$0xff]  ;;  %v34_v46 = vld [vmem:[%s1427_s0 + $0x30] sm:$0xff]  ;;  %vm637_vm1 = vcmask 130048   ;;  %s841_s30 = smov [#allocation2]  }
  0x11   :  { %v89_v42 = vsel %vm76_vm0, %v974_v35, 0.0  ;;  %v994_v43 = vadd.f32 %v56_v39, %v40_v38  ;;  %v92_v44 = vsel %vm76_vm0, %v978_v37, 0.0  ;;  %v998_v45 = vadd.f32 %v57_v41, %v41_v40  ;;  %v50_v47 = vld [vmem:[%s1428_s1 + $0x30] sm:$0xff]  ;;  %v35_v48 = vld [vmem:[%s1427_s0 + $0x38] sm:$0xff]  ;;  %s659_s8 = sshll.u32 %s841_s30, 4  ;;  %s660_s8 = int_to_ptr.vmem [resolvable:$true] %s659_s8 }
  0x12   :  { %108 = vadd.xlane.f32.xlu0 %v107_v34  ;;  %v51_v49 = vld [vmem:[%s1428_s1 + $0x38] sm:$0xff]  ;;  %v1014_v51 = vadd.f32 %v50_v47, %v34_v46  ;;  %v42_v54 = vld [vmem:[%s1427_s0 + $0x70] sm:$0xff]  ;;  %s817_s9 = scalar_lea.vmem %s660_s8, 2048  ;;  %p822_p1 = scmp.lt.s32.totalorder %s660_s8, %s660_s8 }
  0x13   :  { %v113_v50 = vsel %vm76_vm0, %v994_v43, 0.0  ;;  %v116_v52 = vsel %vm76_vm0, %v998_v45, 0.0  ;;  %v1018_v53 = vadd.f32 %v51_v49, %v35_v48  ;;  %v58_v55 = vld [vmem:[%s1428_s1 + $0x70] sm:$0xff]  ;;  %v43_v56 = vld [vmem:[%s1427_s0 + $0x78] sm:$0xff]  ;;  %p818_p0 = scmp.ne.s32.totalorder %s660_s8, %s817_s9  ;;  %p823_p2 = scmp.lt.s32.totalorder %s817_s9, %s817_s9 }
  0x14   :  { %111 = vadd.xlane.f32.xlu1 %v110_v36  ;;  %v59_v57 = vld [vmem:[%s1428_s1 + $0x78] sm:$0xff]  ;;  %v95_v58 = vsel %vm76_vm0, %v1014_v51, 0.0  ;;  %v1034_v59 = vadd.f32 %v58_v55, %v42_v54 }
  0x15   :  { %v98_v60 = vsel %vm76_vm0, %v1018_v53, 0.0  ;;  %v1038_v61 = vadd.f32 %v59_v57, %v43_v56  ;;  %p824_p3 = por %p823_p2, %p822_p1 }
  0x16   :  { %90 = vadd.xlane.f32.xlu0 %v89_v42  ;;  %v119_v62 = vsel %vm76_vm0, %v1034_v59, 0.0 }
  0x17   :  { %v122_v63 = vsel %vm76_vm0, %v1038_v61, 0.0  ;;  %p825_p4 = pnand %p824_p3, %p818_p0 }
  0x18   :  { %93 = vadd.xlane.f32.xlu1 %v92_v44 }
  0x1a   :  { %114 = vadd.xlane.f32.xlu0 %v113_v50 }
  0x1c   :  { %117 = vadd.xlane.f32.xlu1 %v116_v52 }
  0x1e   :  { %96 = vadd.xlane.f32.xlu0 %v95_v58 }
  0x20   :  { %99 = vadd.xlane.f32.xlu1 %v98_v60 }
  0x22   :  { %120 = vadd.xlane.f32.xlu0 %v119_v62 }
  0x24   :  { %123 = vadd.xlane.f32.xlu1 %v122_v63 }
  0x93   :  { %v79_v0 = vpop.xlane.xlu0 %78 }
  0x94   :  { %v126_v1 = vmul.f32 0.03125, %v79_v0 }
  0x95   :  { %v103_v2 = vpop.xlane.xlu1 %102 }
  0x96   :  { %v134_v4 = vmul.f32 0.03125, %v103_v2  ;;  %v1045_v5 = vsub.f32 %v893_v3, %v126_v1 }
  0x97   :  { %v82_v9 = vpop.xlane.xlu0 %81 }
  0x98   :  { %v1048_v6 = vsub.f32 %v904_v7, %v134_v4  ;;  %v127_v10 = vmul.f32 0.03125, %v82_v9  ;;  %v158_v12 = vmul.f32 %v1045_v5, %v1045_v5 }
  0x99   :  { %v106_v11 = vpop.xlane.xlu1 %105 }
  0x9a   :  { %v135_v14 = vmul.f32 0.03125, %v106_v11  ;;  %v166_v15 = vmul.f32 %v1048_v6, %v1048_v6  ;;  %v1055_v16 = vsub.f32 %v906_v8, %v127_v10  ;;  %v174_v17 = vsel %vm76_vm0, %v158_v12, 0.0 }
  0x9b   :  { %175 = vadd.xlane.f32.xlu0 %v174_v17  ;;  %v85_v7 = vpop.xlane.xlu0 %84 }
  0x9c   :  { %v1059_v3 = vsub.f32 %v919_v13, %v135_v14  ;;  %v128_v18 = vmul.f32 0.03125, %v85_v7  ;;  %v198_v22 = vsel %vm76_vm0, %v166_v15, 0.0  ;;  %v159_v23 = vmul.f32 %v1055_v16, %v1055_v16 }
  0x9d   :  { %v88_v20 = vpop.xlane.xlu1 %87 }
  0x9e   :  { %v129_v24 = vmul.f32 0.03125, %v88_v20  ;;  %v167_v25 = vmul.f32 %v1059_v3, %v1059_v3  ;;  %v1067_v8 = vsub.f32 %v934_v19, %v128_v18  ;;  %v177_v26 = vsel %vm76_vm0, %v159_v23, 0.0 }
  0x9f   :  { %199 = vadd.xlane.f32.xlu0 %v198_v22  ;;  %178 = vadd.xlane.f32.xlu1 %v177_v26  ;;  %v109_v28 = vpop.xlane.xlu0 %108  ;;  %v1149_v26 = vld [vmem:[%s1429_s2] sm:$0xff] }
  0xa0   :  { %v1071_v13 = vsub.f32 %v938_v21, %v129_v24  ;;  %v136_v29 = vmul.f32 0.03125, %v109_v28  ;;  %v201_v32 = vsel %vm76_vm0, %v167_v25, 0.0  ;;  %v160_v33 = vmul.f32 %v1067_v8, %v1067_v8  ;;  %v720_v25 = vld [vmem:[%s1433_s6 + $0x8] sm:$0xff]  }
  0xa1   :  { %v112_v31 = vpop.xlane.xlu1 %111  ;;  %v1154_v28 = vld [vmem:[%s1429_s2 + $0x8] sm:$0xff] }
  0xa2   :  { %v137_v34 = vmul.f32 0.03125, %v112_v31  ;;  %v161_v19 = vmul.f32 %v1071_v13, %v1071_v13  ;;  %v1079_v36 = vsub.f32 %v954_v27, %v136_v29  ;;  %v180_v21 = vsel %vm76_vm0, %v160_v33, 0.0  ;;  %v1160_v31 = vld [vmem:[%s1429_s2 + $0x40] sm:$0xff] }
  0xa3   :  { %202 = vadd.xlane.f32.xlu1 %v201_v32  ;;  %181 = vadd.xlane.f32.xlu0 %v180_v21  ;;  %v91_v39 = vpop.xlane.xlu0 %90  ;;  %v348_v29 = vsub.f32 0.0, %v1149_v26  ;;  %v1165_v32 = vld [vmem:[%s1429_s2 + $0x48] sm:$0xff]  ;;  %v349_v33 = vsub.f32 0.0, %v1154_v28  ;;  %v1172_v21 = vld [vmem:[%s1429_s2 + $0x10] sm:$0xff] }
  0xa4   :  { %v1083_v38 = vsub.f32 %v961_v30, %v137_v34  ;;  %v130_v40 = vmul.f32 0.03125, %v91_v39  ;;  %v183_v42 = vsel %vm76_vm0, %v161_v19, 0.0  ;;  %v168_v44 = vmul.f32 %v1079_v36, %v1079_v36 }
  0xa5   :  { %v94_v41 = vpop.xlane.xlu1 %93  ;;  %v364_v34 = vmul.f32 1.442695, %v348_v29  ;;  %v356_v19 = vsub.f32 0.0, %v1160_v31  ;;  %v357_v39 = vsub.f32 0.0, %v1165_v32 }
  0xa6   :  { %v131_v46 = vmul.f32 0.03125, %v94_v41  ;;  %v169_v27 = vmul.f32 %v1083_v38, %v1083_v38  ;;  %v1091_v47 = vsub.f32 %v974_v35, %v130_v40  ;;  %v204_v30 = vsel %vm76_vm0, %v168_v44, 0.0  ;;  %v1178_v41 = vld [vmem:[%s1429_s2 + $0x18] sm:$0xff] }
  0xa7   :  { %184 = vadd.xlane.f32.xlu1 %v183_v42  ;;  %205 = vadd.xlane.f32.xlu0 %v204_v30  ;;  %v115_v49 = vpop.xlane.xlu0 %114  ;;  %v366_v40 = vmul.f32 1.442695, %v349_v33  ;;  %v350_v42 = vsub.f32 0.0, %v1172_v21  ;;  %721 = vpow2.f32 %v364_v34  ;;  %v380_v44 = vmul.f32 1.442695, %v356_v19  ;;  %v1232_v33 = vld [vmem:[%s1429_s2 + $0x70] sm:$0xff] }
  0xa8   :  { %v1095_v48 = vsub.f32 %v978_v37, %v131_v46  ;;  %v138_v50 = vmul.f32 0.03125, %v115_v49  ;;  %v207_v54 = vsel %vm76_vm0, %v169_v27, 0.0  ;;  %v162_v55 = vmul.f32 %v1091_v47, %v1091_v47  ;;  %v1184_v46 = vld [vmem:[%s1429_s2 + $0x50] sm:$0xff] }
  0xa9   :  { %v118_v52 = vpop.xlane.xlu1 %117  ;;  %v382_v27 = vmul.f32 1.442695, %v357_v39  ;;  %v351_v30 = vsub.f32 0.0, %v1178_v41  ;;  %723 = vpow2.f32 %v366_v40  ;;  %v368_v49 = vmul.f32 1.442695, %v350_v42 }
  0xaa   :  { %v139_v56 = vmul.f32 0.03125, %v118_v52  ;;  %v163_v35 = vmul.f32 %v1095_v48, %v1095_v48  ;;  %v1103_v57 = vsub.f32 %v994_v43, %v138_v50  ;;  %v186_v37 = vsel %vm76_vm0, %v162_v55, 0.0  ;;  %v1191_v52 = vld [vmem:[%s1429_s2 + $0x58] sm:$0xff] }
  0xab   :  { %208 = vadd.xlane.f32.xlu1 %v207_v54  ;;  %187 = vadd.xlane.f32.xlu0 %v186_v37  ;;  %v97_v60 = vpop.xlane.xlu0 %96  ;;  %v358_v50 = vsub.f32 0.0, %v1184_v46  ;;  %725 = vpow2.f32 %v380_v44  ;;  %v370_v54 = vmul.f32 1.442695, %v351_v30  ;;  %v359_v55 = vsub.f32 0.0, %v1191_v52  ;;  %v1202_v37 = vld [vmem:[%s1429_s2 + $0x28] sm:$0xff] }
  0xac   :  { %v1107_v58 = vsub.f32 %v998_v45, %v139_v56  ;;  %v132_v62 = vmul.f32 0.03125, %v97_v60  ;;  %v189_v0 = vsel %vm76_vm0, %v163_v35, 0.0  ;;  %v170_v1 = vmul.f32 %v1103_v57, %v1103_v57  ;;  %v1197_v35 = vld [vmem:[%s1429_s2 + $0x20] sm:$0xff] }
  0xad   :  { %v100_v63 = vpop.xlane.xlu1 %99  ;;  %727 = vpow2.f32 %v382_v27  ;;  %v384_v56 = vmul.f32 1.442695, %v358_v50  ;;  %v362_v44 = vsub.f32 0.0, %v1232_v33 }
  0xae   :  { %v133_v2 = vmul.f32 0.03125, %v100_v63  ;;  %v171_v43 = vmul.f32 %v1107_v58, %v1107_v58  ;;  %v1115_v4 = vsub.f32 %v1014_v51, %v132_v62  ;;  %v210_v45 = vsel %vm76_vm0, %v170_v1, 0.0  ;;  %v1209_v1 = vld [vmem:[%s1429_s2 + $0x60] sm:$0xff] }
  0xaf   :  { %190 = vadd.xlane.f32.xlu1 %v189_v0  ;;  %211 = vadd.xlane.f32.xlu0 %v210_v45  ;;  %v121_v10 = vpop.xlane.xlu0 %120  ;;  %729 = vpow2.f32 %v368_v49  ;;  %v352_v62 = vsub.f32 0.0, %v1197_v35  ;;  %v386_v63 = vmul.f32 1.442695, %v359_v55  ;;  %v353_v0 = vsub.f32 0.0, %v1202_v37 }
  0xb0   :  { %v1119_v9 = vsub.f32 %v1018_v53, %v133_v2  ;;  %v140_v11 = vmul.f32 0.03125, %v121_v10  ;;  %v213_v14 = vsel %vm76_vm0, %v171_v43, 0.0  ;;  %v164_v15 = vmul.f32 %v1115_v4, %v1115_v4 }
  0xb1   :  { %v124_v12 = vpop.xlane.xlu1 %123  ;;  %v722_v60 = vpop.eup %721  ;;  %731 = vpow2.f32 %v370_v54  ;;  %v372_v10 = vmul.f32 1.442695, %v352_v62  ;;  %v392_v62 = vmul.f32 1.442695, %v362_v44 }
  0xb2   :  { %v141_v17 = vmul.f32 0.03125, %v124_v12  ;;  %v165_v51 = vmul.f32 %v1119_v9, %v1119_v9  ;;  %v1127_v7 = vsub.f32 %v1034_v59, %v140_v11  ;;  %v192_v53 = vsel %vm76_vm0, %v164_v15, 0.0  ;;  %v1214_v11 = vld [vmem:[%s1429_s2 + $0x68] sm:$0xff] }
  0xb3   :  { %214 = vadd.xlane.f32.xlu1 %v213_v14  ;;  %193 = vadd.xlane.f32.xlu0 %v192_v53  ;;  %733 = vpow2.f32 %v384_v56  ;;  %v724_v2 = vpop.eup %723  ;;  %v396_v43 = vadd.f32 1.0, %v722_v60  ;;  %v374_v14 = vmul.f32 1.442695, %v353_v0  ;;  %v360_v15 = vsub.f32 0.0, %v1209_v1  ;;  %v1241_v60 = vld [vmem:[%s1429_s2 + $0x78] sm:$0xff] }
  0xb4   :  { %v1131_v18 = vsub.f32 %v1038_v61, %v141_v17  ;;  %v195_v20 = vsel %vm76_vm0, %v165_v51, 0.0  ;;  %v172_v22 = vmul.f32 %v1127_v7, %v1127_v7  ;;  %v719_v61 = vld [vmem:[%s1433_s6] sm:$0xff]   ;;  %735 = vpow2.f32 %v386_v63  ;;  %v1220_v17 = vld [vmem:[%s1429_s2 + $0x30] sm:$0xff] }
  0xb5   :  { %692 = vmatprep.subr.bf16.mxu0 %v719_v61  ;;  %712 = vmatprep.subr.bf16.mxu1 %v719_v61  ;;  %v726_v45 = vpop.eup %725  ;;  %v397_v51 = vadd.f32 1.0, %v724_v2  ;;  %737 = vrcp.f32 %v396_v43 }
  0xb6   :  { %v173_v23 = vmul.f32 %v1131_v18, %v1131_v18  ;;  %v216_v24 = vsel %vm76_vm0, %v172_v22, 0.0  ;;  %693 = vmatpush3.bf16.msra.mxu0 %v719_v61  ;;  %714 = vmatpush3.bf16.msra.mxu1 %v719_v61  ;;  %v361_v22 = vsub.f32 0.0, %v1214_v11  ;;  %739 = vpow2.f32 %v372_v10  ;;  %v1227_v61 = vld [vmem:[%s1429_s2 + $0x38] sm:$0xff] }
  0xb7   :  { %196 = vadd.xlane.f32.xlu1 %v195_v20  ;;  %217 = vadd.xlane.f32.xlu0 %v216_v24  ;;  %v728_v12 = vpop.eup %727  ;;  %v404_v20 = vadd.f32 1.0, %v726_v45  ;;  %v354_v24 = vsub.f32 0.0, %v1220_v17  ;;  %741 = vpow2.f32 %v374_v14  ;;  %v355_v39 = vsub.f32 0.0, %v1227_v61 }
  0xb8   :  { %v219_v59 = vsel %vm76_vm0, %v173_v23, 0.0  ;;  %694 = vmatprep.subr.bf16.mxu0 %v720_v25  ;;  %713 = vmatprep.subr.bf16.mxu1 %v720_v25  ;;  %v405_v23 = vadd.f32 1.0, %v728_v12  ;;  %743 = vrcp.f32 %v397_v51  ;;  %v390_v19 = vmul.f32 1.442695, %v361_v22 }
  0xb9   :  { %v730_v53 = vpop.eup %729  ;;  %745 = vrcp.f32 %v404_v20  ;;  %v376_v40 = vmul.f32 1.442695, %v354_v24  ;;  %v378_v54 = vmul.f32 1.442695, %v355_v39 }
  0xba   :  { %695 = vmatpush3.bf16.msra.mxu0 %v720_v25  ;;  %715 = vmatpush3.bf16.msra.mxu1 %v720_v25  ;;  %v398_v29 = vadd.f32 1.0, %v730_v53  ;;  %747 = vrcp.f32 %v405_v23 }
  0xbb   :  { %220 = vadd.xlane.f32.xlu1 %v219_v59  ;;  %v388_v59 = vmul.f32 1.442695, %v360_v15  ;;  %v732_v25 = vpop.eup %731  ;;  %v363_v15 = vsub.f32 0.0, %v1241_v60 }
  0xbc   :  { %v399_v42 = vadd.f32 1.0, %v732_v25 }
  0xbd   :  { %v734_v34 = vpop.eup %733  ;;  %749 = vpow2.f32 %v388_v59 }
  0xbe   :  { %751 = vrcp.f32 %v398_v29  ;;  %v406_v30 = vadd.f32 1.0, %v734_v34  ;;  %v736_v49 = vpop.eup %735 }
  0xbf   :  { %753 = vpow2.f32 %v390_v19  ;;  %v1236_v55 = vpop.eup %737  ;;  %v407_v43 = vadd.f32 1.0, %v736_v49 }
  0xc0   :  { %755 = vpow2.f32 %v376_v40  ;;  %v740_v63 = vpop.eup %739 }
  0xc1   :  { %757 = vrcp.f32 %v399_v42  ;;  %v742_v45 = vpop.eup %741  ;;  %v400_v22 = vadd.f32 1.0, %v740_v63 }
  0xc2   :  { %759 = vrcp.f32 %v406_v30  ;;  %v744_v14 = vpop.eup %743  ;;  %v401_v25 = vadd.f32 1.0, %v742_v45 }
  0xc3   :  { %v746_v51 = vpop.eup %745 }
  0xc4   :  { %v748_v23 = vpop.eup %747 }
  0xc7   :  { %v750_v29 = vpop.eup %749 }
  0xc8   :  { %v752_v39 = vpop.eup %751 }
  0xc9   :  { %v754_v40 = vpop.eup %753 }
  0xca   :  { %v756_v30 = vpop.eup %755 }
 0x128   :  { %v176_v27 = vpop.xlane.xlu0 %175 }
 0x129   :  { %v222_v50 = vmul.f32 0.03125, %v176_v27  ;;  %v394_v27 = vmul.f32 1.442695, %v363_v15 }
 0x12b   :  { %v238_v56 = vadd.f32 1e-05, %v222_v50 }
 0x12c   :  { %v179_v0 = vpop.xlane.xlu1 %178  ;;  %v200_v2 = vpop.xlane.xlu0 %199 }
 0x12d   :  { %761 = vrsqrt.f32 %v238_v56  ;;  %v223_v10 = vmul.f32 0.03125, %v179_v0  ;;  %v230_v12 = vmul.f32 0.03125, %v200_v2  ;;  %v758_v56 = vpop.eup %757  ;;  %v1247_v2 = vld [vmem:[%s1431_s4] ss:$0 sm:$0xff] }
 0x12e   :  { %763 = vpow2.f32 %v378_v54  ;;  %v408_v54 = vadd.f32 1.0, %v750_v29  ;;  %v760_v0 = vpop.eup %759 }
 0x12f   :  { %v239_v53 = vadd.f32 1e-05, %v223_v10  ;;  %v246_v20 = vadd.f32 1e-05, %v230_v12  ;;  %765 = vpow2.f32 %v392_v62  ;;  %v409_v12 = vadd.f32 1.0, %v754_v40 }
 0x130   :  { %v203_v24 = vpop.xlane.xlu1 %202  ;;  %v182_v59 = vpop.xlane.xlu0 %181  ;;  %767 = vrcp.f32 %v407_v43 }
 0x131   :  { %769 = vrsqrt.f32 %v239_v53  ;;  %v231_v34 = vmul.f32 0.03125, %v203_v24  ;;  %v224_v19 = vmul.f32 0.03125, %v182_v59  ;;  %v402_v24 = vadd.f32 1.0, %v756_v30 }
 0x132   :  { %771 = vrsqrt.f32 %v246_v20 }
 0x133   :  { %v247_v42 = vadd.f32 1e-05, %v231_v34  ;;  %v240_v44 = vadd.f32 1e-05, %v224_v19  ;;  %773 = vrcp.f32 %v400_v22  ;;  %v1253_v34 = vld [vmem:[%s1432_s5] ss:$0 sm:$0xff]  ;;  %v444_v19 = vmul.f32 %v1236_v55, %v1149_v26 }
 0x134   :  { %v185_v49 = vpop.xlane.xlu1 %184  ;;  %v206_v50 = vpop.xlane.xlu0 %205  ;;  %775 = vrcp.f32 %v401_v25 }
 0x135   :  { %777 = vrsqrt.f32 %v247_v42  ;;  %v225_v62 = vmul.f32 0.03125, %v185_v49  ;;  %v232_v63 = vmul.f32 0.03125, %v206_v50  ;;  %v453_v50 = vmul.f32 %v748_v23, %v1165_v32 }
 0x136   :  { %779 = vrsqrt.f32 %v240_v44  ;;  %v452_v44 = vmul.f32 %v746_v51, %v1160_v31 }
 0x137   :  { %v762_v43 = vpop.eup %761  ;;  %v241_v45 = vadd.f32 1e-05, %v225_v62  ;;  %v248_v10 = vadd.f32 1e-05, %v232_v63  ;;  %781 = vpow2.f32 %v394_v27 }
 0x138   :  { %v764_v15 = vpop.eup %763  ;;  %v209_v53 = vpop.xlane.xlu1 %208  ;;  %v270_v22 = vmul.f32 %v762_v43, %v1045_v5  ;;  %783 = vrcp.f32 %v408_v54  ;;  %v445_v5 = vmul.f32 %v744_v14, %v1154_v28  ;;  %v1266_v43 = vmul.f32 %v752_v39, %v1172_v21 }
 0x139   :  { %v188_v20 = vpop.xlane.xlu0 %187  ;;  %v766_v59 = vpop.eup %765  ;;  %785 = vrsqrt.f32 %v241_v45  ;;  %v233_v25 = vmul.f32 0.03125, %v209_v53  ;;  %v1278_v45 = vmul.f32 %v760_v0, %v1184_v46  ;;  %v403_v53 = vadd.f32 1.0, %v764_v15 }
 0x13a   :  { %v226_v29 = vmul.f32 0.03125, %v188_v20  ;;  %v1257_v40 = vpop.eup %767  ;;  %787 = vrsqrt.f32 %v248_v10  ;;  %v293_v42 = vmul.f32 %v1247_v2, %v270_v22 }
 0x13b   :  { %v770_v27 = vpop.eup %769  ;;  %v249_v30 = vadd.f32 1e-05, %v233_v25  ;;  %789 = vrcp.f32 %v409_v12 }
 0x13c   :  { %v242_v49 = vadd.f32 1e-05, %v226_v29  ;;  %v772_v54 = vpop.eup %771  ;;  %v191_v62 = vpop.xlane.xlu1 %190  ;;  %v271_v26 = vmul.f32 %v770_v27, %v1055_v16  ;;  %v316_v55 = vadd.f32 %v1253_v34, %v293_v42  ;;  %791 = vrcp.f32 %v402_v24 }
 0x13d   :  { %v212_v63 = vpop.xlane.xlu0 %211  ;;  %v1268_v28 = vpop.eup %773  ;;  %793 = vrsqrt.f32 %v249_v30  ;;  %v227_v31 = vmul.f32 0.03125, %v191_v62  ;;  %v278_v51 = vmul.f32 %v772_v54, %v1048_v6  ;;  %v1275_v16 = vmul.f32 %v758_v56, %v1178_v41 }
 0x13e   :  { %v234_v14 = vmul.f32 0.03125, %v212_v63  ;;  %v1271_v32 = vpop.eup %775  ;;  %795 = vrsqrt.f32 %v242_v49  ;;  %v294_v23 = vmul.f32 %v1247_v2, %v271_v26  ;;  %v460_v25 = vmul.f32 %v444_v19, %v316_v55 }
 0x13f   :  { %v778_v21 = vpop.eup %777  ;;  %v243_v39 = vadd.f32 1e-05, %v227_v31  ;;  %v301_v12 = vmul.f32 %v1247_v2, %v278_v51  ;;  %v410_v42 = vadd.f32 1.0, %v766_v59 }
 0x140   :  { %v250_v10 = vadd.f32 1e-05, %v234_v14  ;;  %v780_v20 = vpop.eup %779  ;;  %v215_v22 = vpop.xlane.xlu1 %214  ;;  %v317_v24 = vadd.f32 %v1253_v34, %v294_v23  ;;  %v279_v29 = vmul.f32 %v778_v21, %v1059_v3 }
 0x141   :  { %v194_v6 = vpop.xlane.xlu0 %193  ;;  %v782_v41 = vpop.eup %781  ;;  %v272_v56 = vmul.f32 %v780_v20, %v1067_v8  ;;  %797 = vrsqrt.f32 %v243_v39  ;;  %v235_v46 = vmul.f32 0.03125, %v215_v22  ;;  %v324_v49 = vadd.f32 %v1253_v34, %v301_v12 }
 0x142   :  { %v228_v0 = vmul.f32 0.03125, %v194_v6  ;;  %v1284_v27 = vpop.eup %783  ;;  %799 = vrsqrt.f32 %v250_v10  ;;  %v461_v30 = vmul.f32 %v445_v5, %v317_v24  ;;  %v302_v15 = vmul.f32 %v1247_v2, %v279_v29 }
 0x143   :  { %v786_v54 = vpop.eup %785  ;;  %v251_v62 = vadd.f32 1e-05, %v235_v46  ;;  %v295_v3 = vmul.f32 %v1247_v2, %v272_v56  ;;  %801 = vrcp.f32 %v403_v53  ;;  %v468_v14 = vmul.f32 %v452_v44, %v324_v49 }
 0x144   :  { %v244_v19 = vadd.f32 1e-05, %v228_v0  ;;  %v788_v59 = vpop.eup %787  ;;  %v273_v8 = vmul.f32 %v786_v54, %v1071_v13  ;;  %v197_v63 = vpop.xlane.xlu1 %196  ;;  %v476_v55 = vpack.c.bf16 %v461_v30, %v460_v25  ;;  %v325_v31 = vadd.f32 %v1253_v34, %v302_v15 }
 0x145   :  { %v218_v26 = vpop.xlane.xlu0 %217  ;;  %v790_v5 = vpop.eup %789  ;;  %v280_v51 = vmul.f32 %v788_v59, %v1079_v36  ;;  %803 = vrsqrt.f32 %v251_v62  ;;  %v229_v23 = vmul.f32 0.03125, %v197_v63  ;;  %v318_v12 = vadd.f32 %v1253_v34, %v295_v3 }
 0x146   :  { %v236_v21 = vmul.f32 0.03125, %v218_v26  ;;  %v1292_v39 = vpop.eup %791  ;;  %805 = vrsqrt.f32 %v244_v19  ;;  %696 = vmatprep.mubr.msk.bf16.mxu0 %vm76_vm0, %v476_v55  ;;  %v469_v10 = vmul.f32 %v453_v50, %v325_v31  ;;  %v296_v13 = vmul.f32 %v1247_v2, %v273_v8 }
 0x147   :  { %v794_v53 = vpop.eup %793  ;;  %v245_v20 = vadd.f32 1e-05, %v229_v23  ;;  %v303_v44 = vmul.f32 %v1247_v2, %v280_v51  ;;  %v455_v36 = vmul.f32 %v1257_v40, %v1191_v52  ;;  %v411_v50 = vadd.f32 1.0, %v782_v41 }
 0x148   :  { %v252_v22 = vadd.f32 1e-05, %v236_v21  ;;  %v796_v6 = vpop.eup %795  ;;  %v281_v24 = vmul.f32 %v794_v53, %v1083_v38  ;;  %v221_v25 = vpop.xlane.xlu1 %220  ;;  %v480_v29 = vpack.c.bf16 %v469_v10, %v468_v14  ;;  %v319_v56 = vadd.f32 %v1253_v34, %v296_v13 }
 0x149   :  { %v274_v46 = vmul.f32 %v796_v6, %v1091_v47  ;;  %807 = vrsqrt.f32 %v245_v20  ;;  %v237_v0 = vmul.f32 0.03125, %v221_v25  ;;  %v462_v30 = vmul.f32 %v1266_v43, %v318_v12 }
 0x14a   :  { %809 = vrsqrt.f32 %v252_v22  ;;  %704 = vmatprep.mubr.msk.bf16.mxu1 %vm76_vm0, %v480_v29  ;;  %v463_v15 = vmul.f32 %v1275_v16, %v319_v56  ;;  %v304_v52 = vmul.f32 %v1247_v2, %v281_v24  ;;  %v326_v38 = vadd.f32 %v1253_v34, %v303_v44 }
 0x14b   :  { %v798_v40 = vpop.eup %797  ;;  %v253_v49 = vadd.f32 1e-05, %v237_v0  ;;  %v297_v54 = vmul.f32 %v1247_v2, %v274_v46  ;;  %811 = vrcp.f32 %v410_v42  ;;  %v448_v16 = vmul.f32 %v1268_v28, %v1197_v35 }
 0x14c   :  { %v800_v41 = vpop.eup %799  ;;  %v275_v47 = vmul.f32 %v798_v40, %v1095_v48  ;;  %v477_v62 = vpack.c.bf16 %v463_v15, %v462_v30  ;;  %v327_v43 = vadd.f32 %v1253_v34, %v304_v52  ;;  %813 = vrcp.f32 %v411_v50 }
 0x14d   :  { %v802_v19 = vpop.eup %801  ;;  %v282_v3 = vmul.f32 %v800_v41, %v1103_v57  ;;  %815 = vrsqrt.f32 %v253_v49  ;;  %v449_v59 = vmul.f32 %v1271_v32, %v1202_v37  ;;  %v470_v42 = vmul.f32 %v1278_v45, %v326_v38  ;;  %v489_v49 = vld [vmem:[%s1430_s3 + $0x8] sm:$0xff] }
 0x14e   :  { %697 = vmatmul.mubr.msk.bf16.vlgmr.msra.gmra.mrb[0].mxu0 %vm76_vm0, %v477_v62  ;;  %v471_v8 = vmul.f32 %v455_v36, %v327_v43  ;;  %v298_v48 = vmul.f32 %v1247_v2, %v275_v47  ;;  %v320_v63 = vadd.f32 %v1253_v34, %v297_v54  ;;  %v456_v28 = vmul.f32 %v1284_v27, %v1209_v1  ;;  %v498_v47 = vld [vmem:[%s1430_s3 + $0x50] sm:$0xff] }
 0x14f   :  { %v804_v26 = vpop.eup %803  ;;  %v305_v55 = vmul.f32 %v1247_v2, %v282_v3  ;;  %v457_v32 = vmul.f32 %v790_v5, %v1214_v11  ;;  %v450_v27 = vmul.f32 %v1292_v39, %v1220_v17  ;;  %v451_v5 = vmul.f32 %v802_v19, %v1227_v61  ;;  %v496_v19 = vld [vmem:[%s1430_s3 + $0x40] sm:$0xff] }
 0x150   :  { %v806_v57 = vpop.eup %805  ;;  %v283_v31 = vmul.f32 %v804_v26, %v1107_v58  ;;  %v481_v14 = vpack.c.bf16 %v471_v8, %v470_v42  ;;  %v321_v35 = vadd.f32 %v1253_v34, %v298_v48  ;;  %v464_v45 = vmul.f32 %v448_v16, %v320_v63  ;;  %v497_v48 = vld [vmem:[%s1430_s3 + $0x48] sm:$0xff] }
 0x151   :  { %v276_v37 = vmul.f32 %v806_v57, %v1115_v4  ;;  %v328_v21 = vadd.f32 %v1253_v34, %v305_v55 }
 0x152   :  { %705 = vmatmul.mubr.msk.bf16.vlgmr.msra.gmra.mrb[0].mxu1 %vm76_vm0, %v481_v14  ;;  %v465_v51 = vmul.f32 %v449_v59, %v321_v35  ;;  %v306_v23 = vmul.f32 %v1247_v2, %v283_v31  ;;  %v499_v59 = vld [vmem:[%s1430_s3 + $0x58] sm:$0xff]  ;;  %v494_v14 = vld [vmem:[%s1430_s3 + $0x30] sm:$0xff]  ;;  %v492_v35 = vld [vmem:[%s1430_s3 + $0x20] sm:$0xff] }
 0x153   :  { %v808_v10 = vpop.eup %807  ;;  %v299_v58 = vmul.f32 %v1247_v2, %v276_v37  ;;  %v472_v22 = vmul.f32 %v456_v28, %v328_v21  ;;  %v495_v28 = vld [vmem:[%s1430_s3 + $0x38] sm:$0xff] }
 0x154   :  { %v810_v13 = vpop.eup %809  ;;  %v277_v12 = vmul.f32 %v808_v10, %v1119_v9  ;;  %v478_v4 = vpack.c.bf16 %v465_v51, %v464_v45  ;;  %v329_v53 = vadd.f32 %v1253_v34, %v306_v23  ;;  %v493_v51 = vld [vmem:[%s1430_s3 + $0x28] sm:$0xff]  ;;  %v502_v10 = vld [vmem:[%s1430_s3 + $0x70] sm:$0xff] }
 0x155   :  { %v812_v1 = vpop.eup %811  ;;  %v284_v11 = vmul.f32 %v810_v13, %v1127_v7  ;;  %v322_v9 = vadd.f32 %v1253_v34, %v299_v58 }
 0x156   :  { %v814_v20 = vpop.eup %813  ;;  %700 = vmatprep.mubr.msk.bf16.mxu0 %vm76_vm0, %v478_v4  ;;  %v473_v44 = vmul.f32 %v457_v32, %v329_v53  ;;  %v300_v36 = vmul.f32 %v1247_v2, %v277_v12  ;;  %v458_v17 = vmul.f32 %v812_v1, %v1232_v33  ;;  %v490_v33 = vld [vmem:[%s1430_s3 + $0x10] sm:$0xff]  ;;  %v500_v12 = vld [vmem:[%s1430_s3 + $0x60] sm:$0xff]  ;;  %v503_v1 = vld [vmem:[%s1430_s3 + $0x78] sm:$0xff] }
 0x157   :  { %v816_v6 = vpop.eup %815  ;;  %v307_v24 = vmul.f32 %v1247_v2, %v284_v11  ;;  %v459_v61 = vmul.f32 %v814_v20, %v1241_v60  ;;  %v466_v39 = vmul.f32 %v450_v27, %v322_v9  ;;  %v488_v60 = vld [vmem:[%s1430_s3] sm:$0xff] }
 0x158   :  { %v285_v25 = vmul.f32 %v816_v6, %v1131_v18  ;;  %v482_v7 = vpack.c.bf16 %v473_v44, %v472_v22  ;;  %v323_v29 = vadd.f32 %v1253_v34, %v300_v36 }
 0x159   :  { %v330_v46 = vadd.f32 %v1253_v34, %v307_v24 }
 0x15a   :  { %708 = vmatprep.mubr.msk.bf16.mxu1 %vm76_vm0, %v482_v7  ;;  %v467_v56 = vmul.f32 %v451_v5, %v323_v29  ;;  %v308_v50 = vmul.f32 %v1247_v2, %v285_v25  ;;  %v501_v5 = vld [vmem:[%s1430_s3 + $0x68] sm:$0xff] }
 0x15b   :  { %v474_v18 = vmul.f32 %v458_v17, %v330_v46 }
 0x15c   :  { %v479_v0 = vpack.c.bf16 %v467_v56, %v466_v39  ;;  %v331_v30 = vadd.f32 %v1253_v34, %v308_v50  ;;  %v491_v34 = vld [vmem:[%s1430_s3 + $0x18] sm:$0xff] }
 0x15e   :  { %701 = vmatmul.mubr.msk.bf16.gmra.mrb[4].mxu0 %vm76_vm0, %v479_v0  ;;  %v475_v15 = vmul.f32 %v459_v61, %v331_v30 }
 0x160   :  { %v483_v52 = vpack.c.bf16 %v475_v15, %v474_v18 }
 0x162   :  { %709 = vmatmul.mubr.msk.bf16.gmra.mrb[4].mxu1 %vm76_vm0, %v483_v52 }
 0x221   :  { %v698_v2 = vpop.f32.mrb[0].mxu0 }
 0x222   :  { %v583_v38 = vadd.f32 %v698_v2, %v490_v33  ;;  %v574_v40 = vpop.f32.mrb[1].mxu0 }
 0x223   :  { %v575_v54 = vadd.f32 %v574_v40, %v488_v60  ;;  %v699_v41 = vpop.f32.mrb[2].mxu0 }
 0x224   :  { %640 = vst.msk [vmem:[#allocation2 + $0x10] sm:$0xff] %vm637_vm1, %v583_v38  ;;  %v586_v62 = vadd.f32 %v699_v41, %v491_v34  ;;  %v577_v43 = vpop.f32.mrb[3].mxu0 }
 0x225   :  { %638 = vst.msk [vmem:[#allocation2] sm:$0xff] %vm637_vm1, %v575_v54  ;;  %v578_v3 = vadd.f32 %v577_v43, %v489_v49  ;;  %v706_v16 = vpop.f32.mrb[0].mxu1 }
 0x226   :  { %641 = vst.msk [vmem:[#allocation2 + $0x18] sm:$0xff] %vm637_vm1, %v586_v62  ;;  %v615_v42 = vadd.f32 %v706_v16, %v498_v47  ;;  %v606_v8 = vpop.f32.mrb[1].mxu1 }
 0x227   :  { %639 = vst.msk [vmem:[#allocation2 + $0x8] sm:$0xff] %vm637_vm1, %v578_v3  ;;  %v607_v63 = vadd.f32 %v606_v8, %v496_v19  ;;  %v707_v26 = vpop.f32.mrb[2].mxu1 }
 0x228   :  { %648 = vst.msk [vmem:[#allocation2 + $0x50] sm:$0xff] %vm637_vm1, %v615_v42  ;;  %v618_v55 = vadd.f32 %v707_v26, %v499_v59  ;;  %v609_v57 = vpop.f32.mrb[3].mxu1 }
 0x229   :  { %646 = vst.msk [vmem:[#allocation2 + $0x40] sm:$0xff] %vm637_vm1, %v607_v63  ;;  %v610_v31 = vadd.f32 %v609_v57, %v497_v48 }
 0x22a   :  { %649 = vst.msk [vmem:[#allocation2 + $0x58] sm:$0xff] %vm637_vm1, %v618_v55 }
 0x22b   :  { %647 = vst.msk [vmem:[#allocation2 + $0x48] sm:$0xff] %vm637_vm1, %v610_v31 }
 0x231   :  { %v702_v37 = vpop.f32.mrb[4].mxu0 }
 0x232   :  { %v599_v32 = vadd.f32 %v702_v37, %v494_v14  ;;  %v590_v45 = vpop.f32.mrb[5].mxu0 }
 0x233   :  { %v591_v23 = vadd.f32 %v590_v45, %v492_v35  ;;  %v703_v21 = vpop.f32.mrb[6].mxu0 }
 0x234   :  { %644 = vst.msk [vmem:[#allocation2 + $0x30] sm:$0xff] %vm637_vm1, %v599_v32  ;;  %v602_v58 = vadd.f32 %v703_v21, %v495_v28  ;;  %v593_v13 = vpop.f32.mrb[7].mxu0 }
 0x235   :  { %642 = vst.msk [vmem:[#allocation2 + $0x20] sm:$0xff] %vm637_vm1, %v591_v23  ;;  %v594_v4 = vadd.f32 %v593_v13, %v493_v51  ;;  %v710_v53 = vpop.f32.mrb[4].mxu1 }
 0x236   :  { %645 = vst.msk [vmem:[#allocation2 + $0x38] sm:$0xff] %vm637_vm1, %v602_v58  ;;  %v631_v11 = vadd.f32 %v710_v53, %v502_v10  ;;  %v622_v27 = vpop.f32.mrb[5].mxu1 }
 0x237   :  { %643 = vst.msk [vmem:[#allocation2 + $0x28] sm:$0xff] %vm637_vm1, %v594_v4  ;;  %v623_v20 = vadd.f32 %v622_v27, %v500_v12  ;;  %v711_v22 = vpop.f32.mrb[6].mxu1 }
 0x238   :  { %652 = vst.msk [vmem:[#allocation2 + $0x70] sm:$0xff] %vm637_vm1, %v631_v11  ;;  %v634_v44 = vadd.f32 %v711_v22, %v503_v1  ;;  %v625_v36 = vpop.f32.mrb[7].mxu1 }
 0x239   :  { %650 = vst.msk [vmem:[#allocation2 + $0x60] sm:$0xff] %vm637_vm1, %v623_v20  ;;  %v626_v9 = vadd.f32 %v625_v36, %v501_v5 }
 0x23a   :  { %653 = vst.msk [vmem:[#allocation2 + $0x78] sm:$0xff] %vm637_vm1, %v634_v44 }
 0x23b   :  { %651 = vst.msk [vmem:[#allocation2 + $0x68] sm:$0xff] %vm637_vm1, %v626_v9 }
 0x23c   :  { %828 = shalt.err (!%p825_p4)
}
 0x23d   :  { %s829_s11 = scalar_lea.hbm %s1434_s7, 2048 }
 0x23e   :  { %p830_p5 = scmp.ne.s32.totalorder %s1434_s7, %s829_s11  ;;  %p833_p6 = scmp.lt.u32.totalorder %s829_s11, %s1434_s7 }
 0x240   :  { %p835_p7 = pnand %p833_p6, %p830_p5 }
 0x242   :  { %838 = shalt.err (!%p835_p7)
}
 0x243   :  { %s842_s16 = smov 128   ;;  %s843_s17 = smov 8  }
 0x244   :  { %665 = dma.vmem_to_hbm [thread:$0]  %s660_s8, 2048, %s1434_s7, [#allocation3], %s842_s16, %s842_s16, %s843_s17  }
 0x245   :  { %839 = dma.done.wait [#allocation3], 2048  }
 0x246   :  { %840 = vsyncadd [#allocation3], 4294965248 }
 0x247   :  { %669 = vsyncpa [#allocation3], 1 }

// kernel: vss_block_forward.6
= control target key start
LH: loop header
LB: loop body
LE: loop exit
PB: predicated region body
PF: predicated region fallthrough
CT: control target
= control target key end

     0   :  { %s3903_s24 = smov 0   ;;  %s5514_s0 = inlined_call_operand.vmem [shape: f32[2,64,32], index: 0, kind: input, shape index: {}]   ;;  %s5515_s1 = inlined_call_operand.vmem [shape: f32[2,64,32], index: 1, kind: input, shape index: {}]   ;;  %s5516_s2 = inlined_call_operand.vmem [shape: bf16[4,32,48], index: 2, kind: input, shape index: {}]   ;;  %s5517_s3 = inlined_call_operand.vmem [shape: f32[4,8,32], index: 3, kind: input, shape index: {}]   ;;  %s5518_s4 = inlined_call_operand.vmem [shape: f32[4,1,32], index: 4, kind: input, shape index: {}]   ;;  %s5519_s5 = inlined_call_operand.vmem [shape: f32[4,1,32], index: 5, kind: input, shape index: {}]   ;;  %s5520_s6 = inlined_call_operand.vmem [shape: f32[2,64,32], index: 6, kind: output, shape index: {0}]   ;;  %s5521_s7 = inlined_call_operand.vmem [shape: f32[2,64,32], index: 7, kind: output, shape index: {1}]  }
   0x1 LB: > { %s3404_s25 = sadd.s32 4294967295, %s3838_s24   ;;  %p3408_p0 = scmp.ge.s32.totalorder %s3838_s24, 1  ;;  %s3838_s24 = sphi %s3903_s24, %s18_s24  }
   0x2   : > { %p250_p1 = scmp.lt.s32.totalorder %s3838_s24, 3 }
   0x4   : > { %p251_p2 = pnand %p3408_p0, %p250_p1 }
   0x6   : > { %254 = sbr.rel (%p251_p2) target bundleno = 743 (0x2e7), region = 44 }
   0xd   : > { %v3914_v0 = vld [vmem:[%s5517_s3] sm:$0xff]  ;;  %v3919_v1 = vld [vmem:[%s5517_s3 + $0x8] sm:$0xff]  ;;  %v3924_v2 = vld [vmem:[%s5517_s3 + $0x10] sm:$0xff]  ;;  %p292_p3 = scmp.lt.s32.totalorder %s3404_s25, 1  ;;  %v333_v3 = vlaneseq  ;;  %vm346_vm0 = vcmask 261120   ;;  %s3860_s10 = smov 88  }
   0xe   : > { %5536 = vst [vmem:[#allocation5_spill] sm:$0xff] %v3914_v0  ;;  %5537 = vst [vmem:[#allocation6_spill] sm:$0xff] %v3919_v1  ;;  %v3929_v4 = vld [vmem:[%s5517_s3 + $0x18] sm:$0xff]  ;;  %v3608_v5 = vld [vmem:[%s5516_s2] sm:$0xff]   ;;  %s3861_s11 = smov 96   ;;  %vm622_vm1 = vcmask 64512  }
   0xf   : > { %5538 = vst [vmem:[#allocation7_spill] sm:$0xff] %v3924_v2  ;;  %5539 = vst [vmem:[#allocation8_spill] sm:$0xff] %v3929_v4  ;;  %s5581_s25 = smov (!%p292_p3, %s3404_s25), 1  ;;  %v3609_v6 = vld [vmem:[%s5516_s2 + $0x10] sm:$0xff]   ;;  %v3937_v7 = vshrl.u32 %v333_v3, 7  ;;  %3509 = vmatprep.subr.bf16.mxu0 %v3608_v5  ;;  %v3610_v8 = vld [vmem:[%s5516_s2 + $0x8] sm:$0xff]  }
  0x10   : > { %s3942_s17 = sshll.u32 %s5581_s25, 6  ;;  %3521 = vmatprep.subr.bf16.mxu1 %v3609_v6  ;;  %3510 = vmatpush3.bf16.msra.mxu0 %v3608_v5  ;;  %v3611_v9 = vld [vmem:[%s5516_s2 + $0x18] sm:$0xff]   ;;  %v328_v10 = vld [vmem:[%s5518_s4] sm:$0x1]  ;;  %v3420_v11 = vld [vmem:[%s5518_s4 + $0x2] sm:$0x1] }
  0x11   : > { %5540 = vst [vmem:[#allocation9_spill] sm:$0xff] %v3937_v7  ;;  %s3951_s22 = scalar_lea.vmem %s5514_s0, %s3942_s17  ;;  %v3960_v12 = vsub.s32 0, %v3937_v7  ;;  %3522 = vmatpush3.bf16.msra.mxu1 %v3609_v6  ;;  %3511 = vmatprep.subr.bf16.mxu0 %v3610_v8  ;;  %v331_v16 = vadd.f32 %v3420_v11, %v328_v10  ;;  %s3969_s30 = scalar_lea.vmem %s5515_s1, %s3942_s17  ;;  %v3421_v24 = vld [vmem:[%s5518_s4 + $0x1] sm:$0x1]  ;;  %v3422_v26 = vld [vmem:[%s5518_s4 + $0x3] sm:$0x1] }
  0x12   : > { %v320_v13 = vld [vmem:[%s3951_s22] sm:$0xff]  ;;  %v321_v14 = vld [vmem:[%s3951_s22 + $0x8] sm:$0xff]  ;;  %v322_v15 = vld [vmem:[%s3951_s22 + $0x10] sm:$0xff]  ;;  %3523 = vmatprep.subr.bf16.mxu1 %v3611_v9  ;;  %s3988_s12 = scalar_lea.vmem %s5520_s6, %s3942_s17  ;;  %v367_v42 = vadd.f32 %v3422_v26, %v3421_v24  ;;  %s4038_s25 = scalar_lea.vmem %s5521_s7, %s3942_s17 }
  0x13   : > { %5541 = vst [vmem:[#allocation10_spill] sm:$0xff] %v3960_v12  ;;  %v323_v17 = vld [vmem:[%s3951_s22 + $0x18] sm:$0xff]  ;;  %v324_v18 = vld [vmem:[%s3951_s22 + $0x20] sm:$0xff]  ;;  %v325_v19 = vld [vmem:[%s3951_s22 + $0x28] sm:$0xff]  ;;  %v3974_v20 = vpack.c.bf16 %v321_v14, %v320_v13  ;;  %v336_v23 = vrot.slane %v331_v16, %v3960_v12  ;;  %s4588_s18 = smov 0  }
  0x14   : > { %v326_v21 = vld [vmem:[%s3951_s22 + $0x30] sm:$0xff]  ;;  %v327_v22 = vld [vmem:[%s3951_s22 + $0x38] sm:$0xff]  ;;  %v3982_v25 = vpack.c.bf16 %v323_v17, %v322_v15  ;;  %3512 = vmatpush3.bf16.msra.mxu0 %v3610_v8  ;;  %v355_v27 = vld [vmem:[%s3969_s30] sm:$0xff]  ;;  %v3997_v29 = vpack.c.bf16 %v325_v19, %v324_v18  ;;  %v372_v48 = vrot.slane %v367_v42, %v3960_v12 }
  0x15   : > { %3513 = vmatprep.mubr.msk.bf16.mxu0 %vm346_vm0, %v3974_v20  ;;  %v356_v28 = vld [vmem:[%s3969_s30 + $0x8] sm:$0xff]  ;;  %3524 = vmatpush3.bf16.msra.mxu1 %v3611_v9  ;;  %v338_v30 = vmul.f32 %v336_v23, %v320_v13  ;;  %v339_v31 = vmul.f32 %v336_v23, %v321_v14  ;;  %v340_v32 = vmul.f32 %v336_v23, %v322_v15  ;;  %v357_v34 = vld [vmem:[%s3969_s30 + $0x10] sm:$0xff]  ;;  %v358_v35 = vld [vmem:[%s3969_s30 + $0x18] sm:$0xff] }
  0x16   : > { %v341_v33 = vmul.f32 %v336_v23, %v323_v17  ;;  %v359_v36 = vld [vmem:[%s3969_s30 + $0x20] sm:$0xff]  ;;  %v342_v37 = vmul.f32 %v336_v23, %v324_v18  ;;  %v343_v38 = vmul.f32 %v336_v23, %v325_v19  ;;  %v344_v39 = vmul.f32 %v336_v23, %v326_v21  ;;  %v360_v41 = vld [vmem:[%s3969_s30 + $0x28] sm:$0xff]  ;;  %v3614_v49 = vld [vmem:[%s5516_s2 + $0x30] sm:$0xff]  }
  0x17   : > { %v345_v40 = vmul.f32 %v336_v23, %v327_v22  ;;  %347 = vst.msk [vmem:[%s3988_s12] sm:$0xff] %vm346_vm0, %v338_v30  ;;  %348 = vst.msk [vmem:[%s3988_s12 + $0x8] sm:$0xff] %vm346_vm0, %v339_v31  ;;  %v671_v43 = vpack.c.bf16 %v356_v28, %v355_v27  ;;  %3514 = vmatmul.mubr.msk.bf16.vlgmr.msra.gmra.mrb[0].mxu0 %vm346_vm0, %v3982_v25  ;;  %v672_v44 = vpack.c.bf16 %v358_v35, %v357_v34  ;;  %v3612_v46 = vld [vmem:[%s5516_s2 + $0x20] sm:$0xff]   ;;  %v3613_v47 = vld [vmem:[%s5516_s2 + $0x28] sm:$0xff]  }
  0x18   : > { %349 = vst.msk [vmem:[%s3988_s12 + $0x10] sm:$0xff] %vm346_vm0, %v340_v32  ;;  %350 = vst.msk [vmem:[%s3988_s12 + $0x18] sm:$0xff] %vm346_vm0, %v341_v33  ;;  %v673_v45 = vpack.c.bf16 %v360_v41, %v359_v36  ;;  %3517 = vmatprep.mubr.msk.bf16.mxu0 %vm346_vm0, %v3997_v29  ;;  %3533 = vmatprep.subr.bf16.mxu0 %v3612_v46  ;;  %v401_v50 = vpack.c.bf16 %v327_v22, %v326_v21  ;;  %v361_v51 = vld [vmem:[%s3969_s30 + $0x30] sm:$0xff]  ;;  %v362_v52 = vld [vmem:[%s3969_s30 + $0x38] sm:$0xff] }
  0x19   : > { %351 = vst.msk [vmem:[%s3988_s12 + $0x20] sm:$0xff] %vm346_vm0, %v342_v37  ;;  %352 = vst.msk [vmem:[%s3988_s12 + $0x28] sm:$0xff] %vm346_vm0, %v343_v38  ;;  %3525 = vmatprep.mubr.msk.bf16.mxu1 %vm346_vm0, %v671_v43  ;;  %3534 = vmatpush3.bf16.msra.mxu0 %v3612_v46  ;;  %v374_v53 = vmul.f32 %v372_v48, %v355_v27  ;;  %v375_v54 = vmul.f32 %v372_v48, %v356_v28  ;;  %v3615_v57 = vld [vmem:[%s5516_s2 + $0x38] sm:$0xff]   ;;  %v4079_v63 = vld [vmem:[%s5519_s5] ss:$0 sm:$0xff] }
  0x1a   : > { %353 = vst.msk [vmem:[%s3988_s12 + $0x30] sm:$0xff] %vm346_vm0, %v344_v39  ;;  %354 = vst.msk [vmem:[%s3988_s12 + $0x38] sm:$0xff] %vm346_vm0, %v345_v40  ;;  %3526 = vmatmul.mubr.msk.bf16.vlgmr.msra.gmra.mrb[0].mxu1 %vm346_vm0, %v672_v44  ;;  %v376_v55 = vmul.f32 %v372_v48, %v357_v34  ;;  %v377_v56 = vmul.f32 %v372_v48, %v358_v35  ;;  %v378_v58 = vmul.f32 %v372_v48, %v359_v36  ;;  %v4087_v6 = vld [vmem:[%s5519_s5 + $0x1] ss:$0 sm:$0xff] }
  0x1b   : > { %3529 = vmatprep.mubr.msk.bf16.mxu1 %vm346_vm0, %v673_v45  ;;  %v379_v59 = vmul.f32 %v372_v48, %v360_v41  ;;  %v380_v60 = vmul.f32 %v372_v48, %v361_v51  ;;  %v381_v61 = vmul.f32 %v372_v48, %v362_v52  ;;  %3535 = vmatprep.subr.bf16.mxu0 %v3613_v47 }
  0x1c   : > { %382 = vst.msk [vmem:[%s4038_s25] sm:$0xff] %vm346_vm0, %v374_v53  ;;  %383 = vst.msk [vmem:[%s4038_s25 + $0x8] sm:$0xff] %vm346_vm0, %v375_v54  ;;  %3545 = vmatprep.subr.bf16.mxu1 %v3614_v49  ;;  %v674_v62 = vpack.c.bf16 %v362_v52, %v361_v51 }
  0x1d   : > { %384 = vst.msk [vmem:[%s4038_s25 + $0x10] sm:$0xff] %vm346_vm0, %v376_v55  ;;  %385 = vst.msk [vmem:[%s4038_s25 + $0x18] sm:$0xff] %vm346_vm0, %v377_v56  ;;  %3536 = vmatpush3.bf16.msra.mxu0 %v3613_v47  ;;  %3546 = vmatpush3.bf16.msra.mxu1 %v3614_v49 }
  0x1e   : > { %386 = vst.msk [vmem:[%s4038_s25 + $0x20] sm:$0xff] %vm346_vm0, %v378_v58  ;;  %387 = vst.msk [vmem:[%s4038_s25 + $0x28] sm:$0xff] %vm346_vm0, %v379_v59  ;;  %3547 = vmatprep.subr.bf16.mxu1 %v3615_v57 }
  0x1f   : > { %388 = vst.msk [vmem:[%s4038_s25 + $0x30] sm:$0xff] %vm346_vm0, %v380_v60  ;;  %389 = vst.msk [vmem:[%s4038_s25 + $0x38] sm:$0xff] %vm346_vm0, %v381_v61  ;;  %3518 = vmatmul.mubr.msk.bf16.gmra.mrb[4].mxu0 %vm346_vm0, %v401_v50 }
  0x20   : > { %3537 = vmatprep.mubr.msk.bf16.mxu0 %vm346_vm0, %v3974_v20 }
  0x21   : > { %3548 = vmatpush3.bf16.msra.mxu1 %v3615_v57 }
  0x22   : > { %3530 = vmatmul.mubr.msk.bf16.gmra.mrb[4].mxu1 %vm346_vm0, %v674_v62 }
  0x23   : > { %3549 = vmatprep.mubr.msk.bf16.mxu1 %vm346_vm0, %v671_v43 }
  0x27   : > { %3538 = vmatmul.mubr.msk.bf16.vlgmr.msra.gmra.mrb[8].mxu0 %vm346_vm0, %v3982_v25 }
  0x28   : > { %3541 = vmatprep.mubr.msk.bf16.mxu0 %vm346_vm0, %v3997_v29 }
  0x2a   : > { %3550 = vmatmul.mubr.msk.bf16.vlgmr.msra.gmra.mrb[8].mxu1 %vm346_vm0, %v672_v44 }
  0x2b   : > { %3553 = vmatprep.mubr.msk.bf16.mxu1 %vm346_vm0, %v673_v45 }
  0x2f   : > { %3542 = vmatmul.mubr.msk.bf16.gmra.mrb[12].mxu0 %vm346_vm0, %v401_v50 }
  0x32   : > { %3554 = vmatmul.mubr.msk.bf16.gmra.mrb[12].mxu1 %vm346_vm0, %v674_v62 }
  0xea   : > { %v3515_v3 = vpop.f32.mrb[0].mxu0 }
  0xeb   : > { %v4082_v5 = vadd.f32 %v3515_v3, %v4079_v63  ;;  %635 = vrot.lane.b32.xlu0 %v3515_v3, %s3860_s10  ;;  %602 = vrot.lane.b32.xlu1 %v3515_v3, %s3861_s11  ;;  %v4091_v8 = vpop.f32.mrb[1].mxu0 }
  0xec   : > { %v4095_v9 = vadd.f32 %v4079_v63, %v4091_v8  ;;  %v3516_v10 = vpop.f32.mrb[2].mxu0 }
  0xed   : > { %v520_v11 = vand.u32 2147483647, %v4082_v5  ;;  %v3527_v13 = vpop.f32.mrb[0].mxu1  ;;  %v4099_v14 = vadd.f32 %v3516_v10, %v4079_v63  ;;  %v4101_v15 = vpop.f32.mrb[3].mxu0 }
  0xee   : > { %v4104_v16 = vadd.f32 %v3527_v13, %v4087_v6  ;;  %v4106_v17 = vpop.f32.mrb[1].mxu1  ;;  %v518_v18 = vand.u32 2147483647, %v4095_v9  ;;  %v4122_v26 = vadd.f32 %v4079_v63, %v4101_v15 }
  0xef   : > { %v528_v19 = vsub.f32 0.0, %v520_v11  ;;  %v4111_v20 = vadd.f32 %v4087_v6, %v4106_v17  ;;  %v521_v21 = vand.u32 2147483647, %v4099_v14  ;;  %v3528_v22 = vpop.f32.mrb[2].mxu1  ;;  %878 = vrot.lane.b32.xlu0 %v3527_v13, %s3861_s11  ;;  %604 = vrot.lane.b32.xlu1 %v3516_v10, %s3861_s11 }
  0xf0   : > { %v795_v23 = vand.u32 2147483647, %v4104_v16  ;;  %v526_v24 = vsub.f32 0.0, %v518_v18  ;;  %v4118_v25 = vadd.f32 %v3528_v22, %v4087_v6  ;;  %v4124_v27 = vpop.f32.mrb[3].mxu1  ;;  %v519_v39 = vand.u32 2147483647, %v4122_v26 }
  0xf1   : > { %v538_v28 = vmul.f32 1.442695, %v528_v19  ;;  %v793_v29 = vand.u32 2147483647, %v4111_v20  ;;  %v529_v30 = vsub.f32 0.0, %v521_v21  ;;  %v4137_v42 = vadd.f32 %v4087_v6, %v4124_v27 }
  0xf2   : > { %v803_v31 = vsub.f32 0.0, %v795_v23  ;;  %v534_v32 = vmul.f32 1.442695, %v526_v24  ;;  %v796_v33 = vand.u32 2147483647, %v4118_v25  ;;  %v4128_v36 = vpop.f32.mrb[4].mxu0 }
  0xf3   : > { %3616 = vpow2.f32 %v538_v28  ;;  %v801_v34 = vsub.f32 0.0, %v793_v29  ;;  %v540_v35 = vmul.f32 1.442695, %v529_v30  ;;  %911 = vrot.lane.b32.xlu0 %v3527_v13, %s3860_s10  ;;  %637 = vrot.lane.b32.xlu1 %v3516_v10, %s3860_s10  ;;  %v4133_v40 = vpop.f32.mrb[5].mxu0  ;;  %v4141_v43 = vadd.f32 %v4128_v36, %v4079_v63 }
  0xf4   : > { %v813_v37 = vmul.f32 1.442695, %v803_v31  ;;  %3618 = vpow2.f32 %v534_v32  ;;  %v804_v38 = vsub.f32 0.0, %v796_v33  ;;  %v4145_v45 = vpop.f32.mrb[6].mxu0  ;;  %v527_v47 = vsub.f32 0.0, %v519_v39 }
  0xf5   : > { %v809_v41 = vmul.f32 1.442695, %v801_v34  ;;  %3620 = vpow2.f32 %v540_v35  ;;  %v4143_v44 = vpop.f32.mrb[4].mxu1  ;;  %v4153_v50 = vpop.f32.mrb[7].mxu0  ;;  %v794_v51 = vand.u32 2147483647, %v4137_v42  ;;  %v4171_v59 = vadd.f32 %v4079_v63, %v4133_v40 }
  0xf6   : > { %3622 = vpow2.f32 %v813_v37  ;;  %v815_v46 = vmul.f32 1.442695, %v804_v38  ;;  %v4149_v48 = vadd.f32 %v4143_v44, %v4087_v6  ;;  %v4151_v49 = vpop.f32.mrb[5].mxu1  ;;  %v536_v53 = vmul.f32 1.442695, %v527_v47 }
  0xf7   : > { %3624 = vpow2.f32 %v809_v41  ;;  %v4156_v52 = vpop.f32.mrb[6].mxu1  ;;  %598 = vrot.lane.b32.xlu0 %v4091_v8, %s3861_s11  ;;  %880 = vrot.lane.b32.xlu1 %v3528_v22, %s3861_s11  ;;  %v524_v54 = vand.u32 2147483647, %v4141_v43  ;;  %v802_v56 = vsub.f32 0.0, %v794_v51  ;;  %v4167_v58 = vadd.f32 %v4087_v6, %v4151_v49 }
  0xf8   : > { %3626 = vpow2.f32 %v815_v46  ;;  %v4162_v55 = vpop.f32.mrb[7].mxu1  ;;  %v799_v57 = vand.u32 2147483647, %v4149_v48  ;;  %v4176_v62 = vadd.f32 %v4145_v45, %v4079_v63  ;;  %v522_v23 = vand.u32 2147483647, %v4171_v59 }
  0xf9   : > { %3628 = vpow2.f32 %v536_v53  ;;  %v532_v61 = vsub.f32 0.0, %v524_v54  ;;  %v811_v11 = vmul.f32 1.442695, %v802_v56  ;;  %v797_v18 = vand.u32 2147483647, %v4167_v58 }
  0xfa   : > { %v4178_v3 = vpop.f32.mrb[8].mxu0  ;;  %v807_v13 = vsub.f32 0.0, %v799_v57  ;;  %v4189_v24 = vadd.f32 %v4156_v52, %v4087_v6  ;;  %v525_v31 = vand.u32 2147483647, %v4176_v62  ;;  %v530_v46 = vsub.f32 0.0, %v522_v23 }
  0xfb   : > { %631 = vrot.lane.b32.xlu0 %v4091_v8, %s3860_s10  ;;  %913 = vrot.lane.b32.xlu1 %v3528_v22, %s3860_s10  ;;  %v546_v21 = vmul.f32 1.442695, %v532_v61  ;;  %3630 = vpow2.f32 %v811_v11  ;;  %v4193_v32 = vpop.f32.mrb[9].mxu0  ;;  %v805_v34 = vsub.f32 0.0, %v797_v18 }
  0xfc   : > { %v821_v30 = vmul.f32 1.442695, %v807_v13  ;;  %5542 = vst [vmem:[#allocation11_spill] sm:$0xff] %v4193_v32  ;;  %v4196_v35 = vpop.f32.mrb[10].mxu0  ;;  %v533_v56 = vsub.f32 0.0, %v525_v31  ;;  %v4221_v31 = vadd.f32 %v4087_v6, %v4162_v55 }
  0xfd   : > { %v3617_v28 = vpop.eup %3616  ;;  %3632 = vpow2.f32 %v546_v21  ;;  %v4198_v37 = vpop.f32.mrb[8].mxu1  ;;  %v800_v57 = vand.u32 2147483647, %v4189_v24  ;;  %v4215_v21 = vadd.f32 %v4079_v63, %v4153_v50 }
  0xfe   : > { %v3619_v8 = vpop.eup %3618  ;;  %v552_v22 = vadd.f32 1.0, %v3617_v28  ;;  %3634 = vpow2.f32 %v821_v30  ;;  %v4205_v47 = vpop.f32.mrb[11].mxu0  ;;  %v798_v18 = vand.u32 2147483647, %v4221_v31 }
  0xff   : > { %v3621_v38 = vpop.eup %3620  ;;  %v550_v39 = vadd.f32 1.0, %v3619_v8  ;;  %874 = vrot.lane.b32.xlu0 %v4106_v17, %s3861_s11  ;;  %633 = vrot.lane.b32.xlu1 %v4101_v15, %s3860_s10  ;;  %v4207_v51 = vpop.f32.mrb[9].mxu1  ;;  %v817_v8 = vmul.f32 1.442695, %v805_v34 }
 0x100   : > { %v3623_v53 = vpop.eup %3622  ;;  %3636 = vlog2.f32 %v552_v22  ;;  %v553_v54 = vadd.f32 1.0, %v3621_v38  ;;  %v4210_v61 = vpop.f32.mrb[10].mxu1  ;;  %v4226_v22 = vld [vmem:[%s5519_s5 + $0x2] ss:$0 sm:$0xff]  ;;  %v806_v29 = vsub.f32 0.0, %v798_v18 }
 0x101   : > { %v3625_v11 = vpop.eup %3624  ;;  %v827_v13 = vadd.f32 1.0, %v3623_v53  ;;  %3638 = vlog2.f32 %v550_v39  ;;  %v4217_v23 = vpop.f32.mrb[11].mxu1  ;;  %v542_v39 = vmul.f32 1.442695, %v530_v46  ;;  %v523_v53 = vand.u32 2147483647, %v4215_v21 }
 0x102   : > { %v3627_v28 = vpop.eup %3626  ;;  %v825_v30 = vadd.f32 1.0, %v3625_v11  ;;  %3640 = vlog2.f32 %v553_v54  ;;  %v4228_v38 = vpop.f32.mrb[12].mxu0  ;;  %v548_v54 = vmul.f32 1.442695, %v533_v56  ;;  %v808_v11 = vsub.f32 0.0, %v800_v57 }
 0x103   : > { %3642 = vlog2.f32 %v827_v13  ;;  %v828_v63 = vadd.f32 1.0, %v3627_v28  ;;  %907 = vrot.lane.b32.xlu0 %v4106_v17, %s3860_s10  ;;  %876 = vrot.lane.b32.xlu1 %v4124_v27, %s3861_s11  ;;  %v4235_v6 = vpop.f32.mrb[13].mxu0  ;;  %v3629_v34 = vpop.eup %3628  ;;  %v531_v13 = vsub.f32 0.0, %v523_v53  ;;  %v4242_v28 = vadd.f32 %v4178_v3, %v4226_v22 }
 0x104   : > { %3644 = vlog2.f32 %v825_v30  ;;  %v4238_v41 = vpop.f32.mrb[14].mxu0  ;;  %v551_v46 = vadd.f32 1.0, %v3629_v34  ;;  %v4250_v56 = vadd.f32 %v4226_v22, %v4193_v32  ;;  %v4254_v57 = vadd.f32 %v4196_v35, %v4226_v22 }
 0x105   : > { %3646 = vlog2.f32 %v828_v63  ;;  %v4244_v17 = vpop.f32.mrb[15].mxu0  ;;  %v4246_v33 = vpop.f32.mrb[12].mxu1  ;;  %v1072_v18 = vand.u32 2147483647, %v4242_v28  ;;  %v823_v60 = vmul.f32 1.442695, %v808_v11 }
 0x106   : > { %3648 = vpow2.f32 %v817_v8  ;;  %v4256_v30 = vpop.f32.mrb[13].mxu1  ;;  %v3631_v63 = vpop.eup %3630  ;;  %v544_v4 = vmul.f32 1.442695, %v531_v13  ;;  %v819_v0 = vmul.f32 1.442695, %v806_v29 }
 0x107   : > { %3650 = vlog2.f32 %v551_v46  ;;  %909 = vrot.lane.b32.xlu1 %v4124_v27, %s3860_s10  ;;  %600 = vrot.lane.b32.xlu0 %v4101_v15, %s3861_s11  ;;  %v4265_v8 = vpop.f32.mrb[14].mxu1  ;;  %v3633_v19 = vpop.eup %3632  ;;  %v826_v10 = vadd.f32 1.0, %v3631_v63  ;;  %v1080_v34 = vsub.f32 0.0, %v1072_v18  ;;  %v1070_v27 = vand.u32 2147483647, %v4250_v56 }
 0x108   : > { %3652 = vpow2.f32 %v542_v39  ;;  %v4267_v46 = vpop.f32.mrb[15].mxu1  ;;  %v3635_v53 = vpop.eup %3634  ;;  %v556_v2 = vadd.f32 1.0, %v3633_v19  ;;  %v1073_v12 = vand.u32 2147483647, %v4254_v57 }
 0x109   : > { %5543 = vst [vmem:[#allocation12_spill] sm:$0xff] %v4267_v46  ;;  %3654 = vpow2.f32 %v548_v54  ;;  %v831_v15 = vadd.f32 1.0, %v3635_v53  ;;  %v1090_v39 = vmul.f32 1.442695, %v1080_v34  ;;  %v1078_v11 = vsub.f32 0.0, %v1070_v27 }
 0x10a   : > { %v3637_v1 = vpop.eup %3636  ;;  %3656 = vlog2.f32 %v826_v10  ;;  %v1081_v13 = vsub.f32 0.0, %v1073_v12  ;;  %v4277_v10 = vadd.f32 %v4226_v22, %v4205_v47  ;;  %v5545_v27 = vmax.f32 %v4095_v9, 0.0  ;;  %v4286_v12 = vld [vmem:[%s5519_s5 + $0x3] ss:$0 sm:$0xff] }
 0x10b   : > { %v3639_v7 = vpop.eup %3638  ;;  %v563_v32 = vmul.f32 0.6931472, %v3637_v1  ;;  %3658 = vlog2.f32 %v556_v2  ;;  %610 = vrot.lane.b32.xlu0 %v4128_v36, %s3861_s11  ;;  %612 = vrot.lane.b32.xlu1 %v4145_v45, %s3861_s11  ;;  %v5544_v1 = vmax.f32 %v4082_v5, 0.0  ;;  %v1086_v53 = vmul.f32 1.442695, %v1078_v11 }
 0x10c   : > { %v3641_v19 = vpop.eup %3640  ;;  %v559_v54 = vmul.f32 0.6931472, %v3639_v7  ;;  %3660 = vlog2.f32 %v831_v15  ;;  %v1092_v7 = vmul.f32 1.442695, %v1081_v13  ;;  %v791_v11 = vmax.f32 %v4149_v48, 0.0 }
 0x10d   : > { %v3643_v29 = vpop.eup %3642  ;;  %v576_v2 = vadd.f32 %v563_v32, %v5544_v1  ;;  %v565_v63 = vmul.f32 0.6931472, %v3641_v19  ;;  %3662 = vpow2.f32 %v823_v60  ;;  %v5546_v32 = vmax.f32 %v4099_v14, 0.0 }
 0x10e   : > { %v3645_v34 = vpop.eup %3644  ;;  %v838_v18 = vmul.f32 0.6931472, %v3643_v29  ;;  %v574_v46 = vadd.f32 %v559_v54, %v5545_v27  ;;  %3664 = vpow2.f32 %v544_v4  ;;  %v5547_v9 = vmax.f32 %v4104_v16, 0.0 }
 0x10f   : > { %v3647_v15 = vpop.eup %3646  ;;  %584 = vst.msk [vmem:[#allocation2 + $0x10] sm:$0xff] %vm346_vm0, %v576_v2  ;;  %v834_v5 = vmul.f32 0.6931472, %v3645_v34  ;;  %v577_v60 = vadd.f32 %v565_v63, %v5546_v32  ;;  %3666 = vpow2.f32 %v819_v0  ;;  %643 = vrot.lane.b32.xlu0 %v4128_v36, %s3860_s10  ;;  %645 = vrot.lane.b32.xlu1 %v4145_v45, %s3860_s10  ;;  %v1071_v14 = vand.u32 2147483647, %v4277_v10 }
 0x110   : > { %v3649_v4 = vpop.eup %3648  ;;  %v851_v19 = vadd.f32 %v838_v18, %v5547_v9  ;;  %582 = vst.msk [vmem:[#allocation2] sm:$0xff] %vm346_vm0, %v574_v46  ;;  %v840_v54 = vmul.f32 0.6931472, %v3647_v15  ;;  %3668 = vpow2.f32 %v1090_v39  ;;  %v5548_v48 = vmax.f32 %v4111_v20, 0.0 }
 0x111   : > { %v3651_v13 = vpop.eup %3650  ;;  %585 = vst.msk [vmem:[#allocation2 + $0x18] sm:$0xff] %vm346_vm0, %v577_v60  ;;  %v829_v36 = vadd.f32 1.0, %v3649_v4  ;;  %3670 = vpow2.f32 %v1086_v53  ;;  %v4305_v45 = vadd.f32 %v4198_v37, %v4286_v12  ;;  %v5549_v46 = vmax.f32 %v4118_v25, 0.0 }
 0x112   : > { %v849_v0 = vadd.f32 %v834_v5, %v5548_v48  ;;  %v3653_v16 = vpop.eup %3652  ;;  %860 = vst.msk [vmem:[#allocation2 + $0x50] sm:$0xff] %vm346_vm0, %v851_v19  ;;  %v561_v29 = vmul.f32 0.6931472, %v3651_v13  ;;  %3672 = vpow2.f32 %v1092_v7  ;;  %v1079_v1 = vsub.f32 0.0, %v1071_v14 }
 0x113   : > { %v852_v39 = vadd.f32 %v840_v54, %v5549_v46  ;;  %v3655_v2 = vpop.eup %3654  ;;  %v789_v20 = vmax.f32 %v4167_v58, 0.0  ;;  %3674 = vlog2.f32 %v829_v36  ;;  %v554_v63 = vadd.f32 1.0, %v3653_v16  ;;  %886 = vrot.lane.b32.xlu0 %v4143_v44, %s3861_s11  ;;  %888 = vrot.lane.b32.xlu1 %v4156_v52, %s3861_s11 }
 0x114   : > { %858 = vst.msk [vmem:[#allocation2 + $0x40] sm:$0xff] %vm346_vm0, %v849_v0  ;;  %v1349_v53 = vand.u32 2147483647, %v4305_v45  ;;  %v3657_v25 = vpop.eup %3656  ;;  %v5550_v34 = vmax.f32 %v4122_v26, 0.0  ;;  %v557_v27 = vadd.f32 1.0, %v3655_v2  ;;  %v4322_v15 = vadd.f32 %v4286_v12, %v4207_v51 }
 0x115   : > { %861 = vst.msk [vmem:[#allocation2 + $0x58] sm:$0xff] %vm346_vm0, %v852_v39  ;;  %v1088_v7 = vmul.f32 1.442695, %v1079_v1  ;;  %v3659_v5 = vpop.eup %3658  ;;  %v836_v32 = vmul.f32 0.6931472, %v3657_v25  ;;  %3676 = vlog2.f32 %v554_v63  ;;  %v4326_v4 = vadd.f32 %v4210_v61, %v4286_v12 }
 0x116   : > { %v575_v18 = vadd.f32 %v561_v29, %v5550_v34  ;;  %v1357_v60 = vsub.f32 0.0, %v1349_v53  ;;  %v3661_v9 = vpop.eup %3660  ;;  %v571_v19 = vmul.f32 0.6931472, %v3659_v5  ;;  %v514_v26 = vmax.f32 %v4171_v59, 0.0 }
 0x117   : > { %3678 = vlog2.f32 %v557_v27  ;;  %v1347_v54 = vand.u32 2147483647, %v4322_v15  ;;  %v3663_v14 = vpop.eup %3662  ;;  %v5551_v13 = vmax.f32 %v4137_v42, 0.0  ;;  %v846_v0 = vmul.f32 0.6931472, %v3661_v9  ;;  %919 = vrot.lane.b32.xlu0 %v4143_v44, %s3860_s10  ;;  %921 = vrot.lane.b32.xlu1 %v4156_v52, %s3860_s10 }
 0x118   : > { %583 = vst.msk [vmem:[#allocation2 + $0x8] sm:$0xff] %vm346_vm0, %v575_v18  ;;  %3680 = vpow2.f32 %v1088_v7  ;;  %v1367_v36 = vmul.f32 1.442695, %v1357_v60  ;;  %v3665_v16 = vpop.eup %3664  ;;  %v5552_v46 = vmax.f32 %v4141_v43, 0.0  ;;  %v517_v29 = vmax.f32 %v4176_v62, 0.0 }
 0x119   : > { %v850_v48 = vadd.f32 %v836_v32, %v5551_v13  ;;  %v832_v1 = vadd.f32 1.0, %v3663_v14  ;;  %v1355_v2 = vsub.f32 0.0, %v1347_v54  ;;  %v3667_v63 = vpop.eup %3666  ;;  %v855_v42 = vadd.f32 %v846_v0, %v791_v11 }
 0x11a   : > { %v580_v39 = vadd.f32 %v571_v19, %v5552_v46  ;;  %v555_v53 = vadd.f32 1.0, %v3665_v16  ;;  %3682 = vpow2.f32 %v1367_v36  ;;  %v1350_v25 = vand.u32 2147483647, %v4326_v4  ;;  %v3669_v44 = vpop.eup %3668 }
 0x11b   : > { %859 = vst.msk [vmem:[#allocation2 + $0x48] sm:$0xff] %vm346_vm0, %v850_v48  ;;  %v792_v52 = vmax.f32 %v4189_v24, 0.0  ;;  %3684 = vlog2.f32 %v832_v1  ;;  %v830_v43 = vadd.f32 1.0, %v3667_v63  ;;  %v4346_v62 = vadd.f32 %v4286_v12, %v4217_v23  ;;  %v3671_v34 = vpop.eup %3670  ;;  %864 = vst.msk [vmem:[#allocation2 + $0x70] sm:$0xff] %vm346_vm0, %v855_v42  ;;  %606 = vrot.lane.b32.xlu0 %v4133_v40, %s3861_s11  ;;  %608 = vrot.lane.b32.xlu1 %v4153_v50, %s3861_s11 }
 0x11c   : > { %588 = vst.msk [vmem:[#allocation2 + $0x30] sm:$0xff] %vm346_vm0, %v580_v39  ;;  %3686 = vlog2.f32 %v555_v53  ;;  %v1104_v11 = vadd.f32 1.0, %v3669_v44  ;;  %v1358_v18 = vsub.f32 0.0, %v1350_v25  ;;  %v4355_v27 = vadd.f32 %v4228_v38, %v4226_v22  ;;  %v3673_v7 = vpop.eup %3672 }
 0x11d   : > { %3688 = vlog2.f32 %v830_v43  ;;  %v1102_v5 = vadd.f32 1.0, %v3671_v34  ;;  %v1363_v32 = vmul.f32 1.442695, %v1355_v2  ;;  %v1348_v60 = vand.u32 2147483647, %v4346_v62  ;;  %v3675_v9 = vpop.eup %3674 }
 0x11e   : > { %v515_v19 = vmax.f32 %v4215_v21, 0.0  ;;  %3690 = vlog2.f32 %v1104_v11  ;;  %v1105_v54 = vadd.f32 1.0, %v3673_v7  ;;  %v1369_v14 = vmul.f32 1.442695, %v1358_v18 }
 0x11f   : > { %v842_v13 = vmul.f32 0.6931472, %v3675_v9  ;;  %3692 = vlog2.f32 %v1102_v5  ;;  %v1356_v48 = vsub.f32 0.0, %v1348_v60  ;;  %v1076_v0 = vand.u32 2147483647, %v4355_v27  ;;  %v3677_v36 = vpop.eup %3676  ;;  %639 = vrot.lane.b32.xlu0 %v4133_v40, %s3860_s10  ;;  %641 = vrot.lane.b32.xlu1 %v4153_v50, %s3860_s10 }
 0x120   : > { %v790_v16 = vmax.f32 %v4221_v31, 0.0  ;;  %3694 = vlog2.f32 %v1105_v54  ;;  %v4367_v21 = vadd.f32 %v4226_v22, %v4235_v6  ;;  %v4371_v46 = vadd.f32 %v4238_v41, %v4226_v22 }
 0x121   : > { %v3679_v39 = vpop.eup %3678  ;;  %v853_v1 = vadd.f32 %v842_v13, %v789_v20  ;;  %v567_v31 = vmul.f32 0.6931472, %v3677_v36  ;;  %3696 = vpow2.f32 %v1363_v32  ;;  %v1365_v2 = vmul.f32 1.442695, %v1356_v48 }
 0x122   : > { %v3681_v63 = vpop.eup %3680  ;;  %v573_v40 = vmul.f32 0.6931472, %v3679_v39  ;;  %3698 = vpow2.f32 %v1369_v14  ;;  %v1084_v42 = vsub.f32 0.0, %v1076_v0  ;;  %v4377_v50 = vadd.f32 %v4226_v22, %v4244_v17 }
 0x123   : > { %862 = vst.msk [vmem:[#allocation2 + $0x60] sm:$0xff] %vm346_vm0, %v853_v1  ;;  %v578_v53 = vadd.f32 %v567_v31, %v514_v26  ;;  %v1103_v25 = vadd.f32 1.0, %v3681_v63  ;;  %3700 = vpow2.f32 %v1365_v2  ;;  %v1074_v58 = vand.u32 2147483647, %v4367_v21  ;;  %882 = vrot.lane.b32.xlu0 %v4151_v49, %s3861_s11  ;;  %884 = vrot.lane.b32.xlu1 %v4162_v55, %s3861_s11 }
 0x124   : > { %v3683_v20 = vpop.eup %3682  ;;  %v581_v44 = vadd.f32 %v573_v40, %v517_v29  ;;  %v1064_v43 = vmax.f32 %v4242_v28, 0.0  ;;  %v1098_v22 = vmul.f32 1.442695, %v1084_v42  ;;  %v1077_v34 = vand.u32 2147483647, %v4371_v46 }
 0x125   : > { %v3685_v11 = vpop.eup %3684  ;;  %586 = vst.msk [vmem:[#allocation2 + $0x20] sm:$0xff] %vm346_vm0, %v578_v53  ;;  %v1062_v59 = vmax.f32 %v4250_v56, 0.0  ;;  %3702 = vlog2.f32 %v1103_v25  ;;  %v1381_v26 = vadd.f32 1.0, %v3683_v20  ;;  %v1082_v18 = vsub.f32 0.0, %v1074_v58 }
 0x126   : > { %v3687_v29 = vpop.eup %3686  ;;  %589 = vst.msk [vmem:[#allocation2 + $0x38] sm:$0xff] %vm346_vm0, %v581_v44  ;;  %v848_v28 = vmul.f32 0.6931472, %v3685_v11  ;;  %3704 = vpow2.f32 %v1098_v22  ;;  %v1085_v7 = vsub.f32 0.0, %v1077_v34  ;;  %v1075_v5 = vand.u32 2147483647, %v4377_v50 }
 0x127   : > { %v3689_v32 = vpop.eup %3688  ;;  %v569_v60 = vmul.f32 0.6931472, %v3687_v29  ;;  %3706 = vlog2.f32 %v1381_v26  ;;  %v1094_v9 = vmul.f32 1.442695, %v1082_v18  ;;  %v4395_v54 = vadd.f32 %v4246_v33, %v4286_v12  ;;  %915 = vrot.lane.b32.xlu0 %v4151_v49, %s3860_s10  ;;  %917 = vrot.lane.b32.xlu1 %v4162_v55, %s3860_s10  ;;  %v5553_v29 = vld [vmem:[#allocation12_spill] sm:$0xff] }
 0x128   : > { %v3691_v56 = vpop.eup %3690  ;;  %v856_v14 = vadd.f32 %v848_v28, %v792_v52  ;;  %v844_v13 = vmul.f32 0.6931472, %v3689_v32  ;;  %v1100_v48 = vmul.f32 1.442695, %v1085_v7  ;;  %v1083_v0 = vsub.f32 0.0, %v1075_v5 }
 0x129   : > { %v3693_v36 = vpop.eup %3692  ;;  %v579_v39 = vadd.f32 %v569_v60, %v515_v19  ;;  %v1115_v1 = vmul.f32 0.6931472, %v3691_v56  ;;  %v1065_v31 = vmax.f32 %v4254_v57, 0.0  ;;  %3708 = vpow2.f32 %v1094_v9 }
 0x12a   : > { %v3695_v2 = vpop.eup %3694  ;;  %865 = vst.msk [vmem:[#allocation2 + $0x78] sm:$0xff] %vm346_vm0, %v856_v14  ;;  %v854_v24 = vadd.f32 %v844_v13, %v790_v16  ;;  %v1111_v52 = vmul.f32 0.6931472, %v3693_v36  ;;  %3710 = vpow2.f32 %v1100_v48  ;;  %v1096_v63 = vmul.f32 1.442695, %v1083_v0 }
 0x12b   : > { %v3697_v40 = vpop.eup %3696  ;;  %587 = vst.msk [vmem:[#allocation2 + $0x28] sm:$0xff] %vm346_vm0, %v579_v39  ;;  %v1128_v49 = vadd.f32 %v1115_v1, %v1064_v43  ;;  %v1117_v55 = vmul.f32 0.6931472, %v3695_v2  ;;  %v1353_v42 = vand.u32 2147483647, %v4395_v54  ;;  %v4409_v19 = vadd.f32 %v4286_v12, %v4256_v30  ;;  %1155 = vrot.lane.b32.xlu0 %v4178_v3, %s3861_s11  ;;  %1157 = vrot.lane.b32.xlu1 %v4196_v35, %s3861_s11 }
 0x12c   : > { %v3699_v57 = vpop.eup %3698  ;;  %863 = vst.msk [vmem:[#allocation2 + $0x68] sm:$0xff] %vm346_vm0, %v854_v24  ;;  %v1126_v53 = vadd.f32 %v1111_v52, %v1062_v59  ;;  %v1379_v25 = vadd.f32 1.0, %v3697_v40  ;;  %3712 = vpow2.f32 %v1096_v63  ;;  %v4418_v16 = vadd.f32 %v4265_v8, %v4286_v12 }
 0x12d   : > { %v3701_v58 = vpop.eup %3700  ;;  %1137 = vst.msk [vmem:[#allocation2 + $0x90] sm:$0xff] %vm346_vm0, %v1128_v49  ;;  %v1129_v20 = vadd.f32 %v1117_v55, %v1065_v31  ;;  %v1382_v44 = vadd.f32 1.0, %v3699_v57  ;;  %v1361_v43 = vsub.f32 0.0, %v1353_v42  ;;  %v1063_v22 = vmax.f32 %v4277_v10, 0.0 }
 0x12e   : > { %1135 = vst.msk [vmem:[#allocation2 + $0x80] sm:$0xff] %vm346_vm0, %v1126_v53  ;;  %3714 = vlog2.f32 %v1379_v25  ;;  %v1380_v34 = vadd.f32 1.0, %v3701_v58  ;;  %v1351_v11 = vand.u32 2147483647, %v4409_v19  ;;  %v1354_v18 = vand.u32 2147483647, %v4418_v16 }
 0x12f   : > { %v3703_v59 = vpop.eup %3702  ;;  %1138 = vst.msk [vmem:[#allocation2 + $0x98] sm:$0xff] %vm346_vm0, %v1129_v20  ;;  %3716 = vlog2.f32 %v1382_v44  ;;  %v1375_v26 = vmul.f32 1.442695, %v1361_v43  ;;  %v4428_v28 = vadd.f32 %v4286_v12, %v5553_v29  ;;  %v1341_v32 = vmax.f32 %v4305_v45, 0.0  ;;  %1188 = vrot.lane.b32.xlu0 %v4178_v3, %s3860_s10  ;;  %1190 = vrot.lane.b32.xlu1 %v4196_v35, %s3860_s10  ;;  %v5554_v43 = vld [vmem:[#allocation11_spill] sm:$0xff] }
 0x130   : > { %v3705_v7 = vpop.eup %3704  ;;  %v1113_v5 = vmul.f32 0.6931472, %v3703_v59  ;;  %3718 = vlog2.f32 %v1380_v34  ;;  %v1359_v10 = vsub.f32 0.0, %v1351_v11  ;;  %v1362_v56 = vsub.f32 0.0, %v1354_v18 }
 0x131   : > { %v3707_v60 = vpop.eup %3706  ;;  %v1108_v9 = vadd.f32 1.0, %v3705_v7  ;;  %3720 = vpow2.f32 %v1375_v26  ;;  %v1352_v48 = vand.u32 2147483647, %v4428_v28  ;;  %v1339_v24 = vmax.f32 %v4322_v15, 0.0 }
 0x132   : > { %v1127_v14 = vadd.f32 %v1113_v5, %v1063_v22  ;;  %v1392_v13 = vmul.f32 0.6931472, %v3707_v60  ;;  %v1371_v12 = vmul.f32 1.442695, %v1359_v10  ;;  %v1377_v45 = vmul.f32 1.442695, %v1362_v56 }
 0x133   : > { %v3709_v0 = vpop.eup %3708  ;;  %3722 = vlog2.f32 %v1108_v9  ;;  %v1360_v35 = vsub.f32 0.0, %v1352_v48  ;;  %1432 = vrot.lane.b32.xlu0 %v4198_v37, %s3861_s11  ;;  %1434 = vrot.lane.b32.xlu1 %v4210_v61, %s3861_s11  ;;  %v1342_v40 = vmax.f32 %v4326_v4, 0.0  ;;  %v1340_v42 = vmax.f32 %v4346_v62, 0.0 }
 0x134   : > { %v3711_v36 = vpop.eup %3710  ;;  %1136 = vst.msk [vmem:[#allocation2 + $0x88] sm:$0xff] %vm346_vm0, %v1127_v14  ;;  %v1405_v3 = vadd.f32 %v1392_v13, %v1341_v32  ;;  %v1106_v39 = vadd.f32 1.0, %v3709_v0  ;;  %3724 = vpow2.f32 %v1371_v12  ;;  %v1068_v4 = vmax.f32 %v4355_v27, 0.0 }
 0x135   : > { %v1109_v1 = vadd.f32 1.0, %v3711_v36  ;;  %3726 = vpow2.f32 %v1377_v45  ;;  %v1373_v2 = vmul.f32 1.442695, %v1360_v35  ;;  %v1066_v27 = vmax.f32 %v4367_v21, 0.0 }
 0x136   : > { %v3713_v31 = vpop.eup %3712  ;;  %1414 = vst.msk [vmem:[#allocation2 + $0xd0] sm:$0xff] %vm346_vm0, %v1405_v3  ;;  %3728 = vlog2.f32 %v1106_v39  ;;  %v1069_v18 = vmax.f32 %v4371_v46, 0.0  ;;  %v1067_v21 = vmax.f32 %v4377_v50, 0.0  ;;  %v1345_v50 = vmax.f32 %v4395_v54, 0.0 }
 0x137   : > { %3730 = vlog2.f32 %v1109_v1  ;;  %v1107_v52 = vadd.f32 1.0, %v3713_v31  ;;  %1465 = vrot.lane.b32.xlu0 %v4198_v37, %s3860_s10  ;;  %1467 = vrot.lane.b32.xlu1 %v4210_v61, %s3860_s10  ;;  %v1343_v0 = vmax.f32 %v4409_v19, 0.0  ;;  %v1346_v3 = vmax.f32 %v4418_v16, 0.0 }
 0x138   : > { %v3715_v63 = vpop.eup %3714  ;;  %3732 = vpow2.f32 %v1373_v2 }
 0x139   : > { %v3717_v49 = vpop.eup %3716  ;;  %v1388_v55 = vmul.f32 0.6931472, %v3715_v63  ;;  %3734 = vlog2.f32 %v1107_v52 }
 0x13a   : > { %v3719_v57 = vpop.eup %3718  ;;  %v1394_v53 = vmul.f32 0.6931472, %v3717_v49 }
 0x13b   : > { %v3721_v15 = vpop.eup %3720  ;;  %v1403_v25 = vadd.f32 %v1388_v55, %v1339_v24  ;;  %v1390_v58 = vmul.f32 0.6931472, %v3719_v57  ;;  %1151 = vrot.lane.b32.xlu0 %v5554_v43, %s3861_s11  ;;  %1153 = vrot.lane.b32.xlu1 %v4205_v47, %s3861_s11 }
 0x13c   : > { %v1406_v20 = vadd.f32 %v1394_v53, %v1342_v40  ;;  %v1385_v44 = vadd.f32 1.0, %v3721_v15 }
 0x13d   : > { %v3723_v37 = vpop.eup %3722  ;;  %1412 = vst.msk [vmem:[#allocation2 + $0xc0] sm:$0xff] %vm346_vm0, %v1403_v25  ;;  %v1404_v61 = vadd.f32 %v1390_v58, %v1340_v42 }
 0x13e   : > { %v3725_v62 = vpop.eup %3724  ;;  %1415 = vst.msk [vmem:[#allocation2 + $0xd8] sm:$0xff] %vm346_vm0, %v1406_v20  ;;  %v1123_v22 = vmul.f32 0.6931472, %v3723_v37  ;;  %3736 = vlog2.f32 %v1385_v44 }
 0x13f   : > { %v3727_v34 = vpop.eup %3726  ;;  %1413 = vst.msk [vmem:[#allocation2 + $0xc8] sm:$0xff] %vm346_vm0, %v1404_v61  ;;  %v1383_v11 = vadd.f32 1.0, %v3725_v62  ;;  %1184 = vrot.lane.b32.xlu0 %v5554_v43, %s3860_s10  ;;  %1186 = vrot.lane.b32.xlu1 %v4205_v47, %s3860_s10 }
 0x140   : > { %v3729_v59 = vpop.eup %3728  ;;  %v1132_v26 = vadd.f32 %v1123_v22, %v1068_v4  ;;  %v1386_v7 = vadd.f32 1.0, %v3727_v34 }
 0x141   : > { %v3731_v5 = vpop.eup %3730  ;;  %v1119_v32 = vmul.f32 0.6931472, %v3729_v59  ;;  %3738 = vlog2.f32 %v1383_v11 }
 0x142   : > { %v3733_v10 = vpop.eup %3732  ;;  %1141 = vst.msk [vmem:[#allocation2 + $0xb0] sm:$0xff] %vm346_vm0, %v1132_v26  ;;  %v1125_v60 = vmul.f32 0.6931472, %v3731_v5  ;;  %3740 = vlog2.f32 %v1386_v7 }
 0x143   : > { %v3735_v9 = vpop.eup %3734  ;;  %v1130_v56 = vadd.f32 %v1119_v32, %v1066_v27  ;;  %v1384_v46 = vadd.f32 1.0, %v3733_v10  ;;  %1428 = vrot.lane.b32.xlu0 %v4207_v51, %s3861_s11  ;;  %1430 = vrot.lane.b32.xlu1 %v4217_v23, %s3861_s11 }
 0x144   : > { %v1133_v14 = vadd.f32 %v1125_v60, %v1069_v18  ;;  %v1121_v13 = vmul.f32 0.6931472, %v3735_v9 }
 0x145   : > { %1139 = vst.msk [vmem:[#allocation2 + $0xa0] sm:$0xff] %vm346_vm0, %v1130_v56  ;;  %3742 = vlog2.f32 %v1384_v46 }
 0x146   : > { %1142 = vst.msk [vmem:[#allocation2 + $0xb8] sm:$0xff] %vm346_vm0, %v1133_v14  ;;  %v1131_v47 = vadd.f32 %v1121_v13, %v1067_v21 }
 0x147   : > { %1461 = vrot.lane.b32.xlu0 %v4207_v51, %s3860_s10  ;;  %1463 = vrot.lane.b32.xlu1 %v4217_v23, %s3860_s10  ;;  %v1344_v23 = vmax.f32 %v4428_v28, 0.0 }
 0x148   : > { %v3737_v12 = vpop.eup %3736  ;;  %1140 = vst.msk [vmem:[#allocation2 + $0xa8] sm:$0xff] %vm346_vm0, %v1131_v47 }
 0x149   : > { %v1400_v48 = vmul.f32 0.6931472, %v3737_v12 }
 0x14b   : > { %v3739_v45 = vpop.eup %3738  ;;  %v1409_v36 = vadd.f32 %v1400_v48, %v1345_v50  ;;  %1163 = vrot.lane.b32.xlu0 %v4228_v38, %s3861_s11  ;;  %1165 = vrot.lane.b32.xlu1 %v4238_v41, %s3861_s11 }
 0x14c   : > { %v3741_v39 = vpop.eup %3740  ;;  %v1396_v35 = vmul.f32 0.6931472, %v3739_v45 }
 0x14d   : > { %1418 = vst.msk [vmem:[#allocation2 + $0xf0] sm:$0xff] %vm346_vm0, %v1409_v36  ;;  %v1402_v51 = vmul.f32 0.6931472, %v3741_v39 }
 0x14e   : > { %v1407_v54 = vadd.f32 %v1396_v35, %v1343_v0 }
 0x14f   : > { %v3743_v1 = vpop.eup %3742  ;;  %v1410_v19 = vadd.f32 %v1402_v51, %v1346_v3  ;;  %1196 = vrot.lane.b32.xlu0 %v4228_v38, %s3860_s10  ;;  %1198 = vrot.lane.b32.xlu1 %v4238_v41, %s3860_s10 }
 0x150   : > { %1416 = vst.msk [vmem:[#allocation2 + $0xe0] sm:$0xff] %vm346_vm0, %v1407_v54  ;;  %v1398_v31 = vmul.f32 0.6931472, %v3743_v1 }
 0x151   : > { %1419 = vst.msk [vmem:[#allocation2 + $0xf8] sm:$0xff] %vm346_vm0, %v1410_v19 }
 0x152   : > { %v1408_v16 = vadd.f32 %v1398_v31, %v1344_v23 }
 0x153   : > { %1440 = vrot.lane.b32.xlu0 %v4246_v33, %s3861_s11  ;;  %1442 = vrot.lane.b32.xlu1 %v4265_v8, %s3861_s11 }
 0x154   : > { %1417 = vst.msk [vmem:[#allocation2 + $0xe8] sm:$0xff] %vm346_vm0, %v1408_v16 }
 0x157   : > { %1159 = vrot.lane.b32.xlu0 %v4235_v6, %s3861_s11  ;;  %1161 = vrot.lane.b32.xlu1 %v4244_v17, %s3861_s11 }
 0x15b   : > { %1192 = vrot.lane.b32.xlu0 %v4235_v6, %s3860_s10  ;;  %1194 = vrot.lane.b32.xlu1 %v4244_v17, %s3860_s10 }
 0x15d   : > { %v636_v41 = vpop.permute.xlu0 %635  ;;  %v603_v38 = vpop.permute.xlu1 %602 }
 0x15e   : > { %657 = vst.msk [vmem:[#allocation4 + $0x10] sm:$0xff] %vm622_vm1, %v636_v41  ;;  %625 = vst.msk [vmem:[#allocation3 + $0x10] sm:$0xff] %vm622_vm1, %v603_v38  ;;  %v4580_v41 = vmov 0.0   ;;  %v4582_v38 = vmov 0.0  }
 0x15f   : > { %1436 = vrot.lane.b32.xlu0 %v4256_v30, %s3861_s11  ;;  %1438 = vrot.lane.b32.xlu1 %v5553_v29, %s3861_s11 }
 0x161   : > { %v879_v28 = vpop.permute.xlu0 %878  ;;  %v605_v2 = vpop.permute.xlu1 %604 }
 0x162   : > { %901 = vst.msk [vmem:[#allocation3 + $0x50] sm:$0xff] %vm622_vm1, %v879_v28  ;;  %626 = vst.msk [vmem:[#allocation3 + $0x18] sm:$0xff] %vm622_vm1, %v605_v2  ;;  %v4584_v28 = vmov 0.0   ;;  %v4586_v2 = vmov 0.0  }
 0x163   : > { %1469 = vrot.lane.b32.xlu0 %v4256_v30, %s3860_s10  ;;  %1471 = vrot.lane.b32.xlu1 %v5553_v29, %s3860_s10 }
 0x165   : > { %v912_v6 = vpop.permute.xlu0 %911  ;;  %v638_v17 = vpop.permute.xlu1 %637 }
 0x166   : > { %934 = vst.msk [vmem:[#allocation4 + $0x50] sm:$0xff] %vm622_vm1, %v912_v6  ;;  %658 = vst.msk [vmem:[#allocation4 + $0x18] sm:$0xff] %vm622_vm1, %v638_v17 }
 0x167   : > { %1473 = vrot.lane.b32.xlu0 %v4246_v33, %s3860_s10  ;;  %1475 = vrot.lane.b32.xlu1 %v4265_v8, %s3860_s10 }
 0x169   : > { %v599_v24 = vpop.permute.xlu0 %598  ;;  %v881_v52 = vpop.permute.xlu1 %880 }
 0x16a   : > { %623 = vst.msk [vmem:[#allocation3] sm:$0xff] %vm622_vm1, %v599_v24  ;;  %902 = vst.msk [vmem:[#allocation3 + $0x58] sm:$0xff] %vm622_vm1, %v881_v52 }
 0x16d   : > { %v632_v30 = vpop.permute.xlu0 %631  ;;  %v914_v29 = vpop.permute.xlu1 %913 }
 0x16e   : > { %655 = vst.msk [vmem:[#allocation4] sm:$0xff] %vm622_vm1, %v632_v30  ;;  %935 = vst.msk [vmem:[#allocation4 + $0x58] sm:$0xff] %vm622_vm1, %v914_v29 }
 0x171   : > { %v875_v63 = vpop.permute.xlu0 %874  ;;  %v634_v40 = vpop.permute.xlu1 %633 }
 0x172   : > { %899 = vst.msk [vmem:[#allocation3 + $0x40] sm:$0xff] %vm622_vm1, %v875_v63  ;;  %656 = vst.msk [vmem:[#allocation4 + $0x8] sm:$0xff] %vm622_vm1, %v634_v40 }
 0x175   : > { %v908_v33 = vpop.permute.xlu0 %907  ;;  %v877_v8 = vpop.permute.xlu1 %876 }
 0x176   : > { %932 = vst.msk [vmem:[#allocation4 + $0x40] sm:$0xff] %vm622_vm1, %v908_v33  ;;  %900 = vst.msk [vmem:[#allocation3 + $0x48] sm:$0xff] %vm622_vm1, %v877_v8 }
 0x179   : > { %v910_v49 = vpop.permute.xlu1 %909  ;;  %v601_v55 = vpop.permute.xlu0 %600 }
 0x17a   : > { %933 = vst.msk [vmem:[#allocation4 + $0x48] sm:$0xff] %vm622_vm1, %v910_v49  ;;  %624 = vst.msk [vmem:[#allocation3 + $0x8] sm:$0xff] %vm622_vm1, %v601_v55 }
 0x17d   : > { %v611_v42 = vpop.permute.xlu0 %610  ;;  %v613_v57 = vpop.permute.xlu1 %612 }
 0x17e   : > { %629 = vst.msk [vmem:[#allocation3 + $0x30] sm:$0xff] %vm622_vm1, %v611_v42  ;;  %630 = vst.msk [vmem:[#allocation3 + $0x38] sm:$0xff] %vm622_vm1, %v613_v57 }
 0x181   : > { %v644_v53 = vpop.permute.xlu0 %643  ;;  %v646_v15 = vpop.permute.xlu1 %645 }
 0x182   : > { %661 = vst.msk [vmem:[#allocation4 + $0x30] sm:$0xff] %vm622_vm1, %v644_v53  ;;  %662 = vst.msk [vmem:[#allocation4 + $0x38] sm:$0xff] %vm622_vm1, %v646_v15 }
 0x185   : > { %v887_v25 = vpop.permute.xlu0 %886  ;;  %v889_v58 = vpop.permute.xlu1 %888 }
 0x186   : > { %905 = vst.msk [vmem:[#allocation3 + $0x70] sm:$0xff] %vm622_vm1, %v887_v25  ;;  %906 = vst.msk [vmem:[#allocation3 + $0x78] sm:$0xff] %vm622_vm1, %v889_v58 }
 0x189   : > { %v920_v20 = vpop.permute.xlu0 %919  ;;  %v922_v4 = vpop.permute.xlu1 %921 }
 0x18a   : > { %938 = vst.msk [vmem:[#allocation4 + $0x70] sm:$0xff] %vm622_vm1, %v920_v20  ;;  %939 = vst.msk [vmem:[#allocation4 + $0x78] sm:$0xff] %vm622_vm1, %v922_v4 }
 0x18d   : > { %v607_v44 = vpop.permute.xlu0 %606  ;;  %v609_v43 = vpop.permute.xlu1 %608 }
 0x18e   : > { %627 = vst.msk [vmem:[#allocation3 + $0x20] sm:$0xff] %vm622_vm1, %v607_v44  ;;  %628 = vst.msk [vmem:[#allocation3 + $0x28] sm:$0xff] %vm622_vm1, %v609_v43 }
 0x191   : > { %v640_v37 = vpop.permute.xlu0 %639  ;;  %v642_v61 = vpop.permute.xlu1 %641 }
 0x192   : > { %659 = vst.msk [vmem:[#allocation4 + $0x20] sm:$0xff] %vm622_vm1, %v640_v37  ;;  %660 = vst.msk [vmem:[#allocation4 + $0x28] sm:$0xff] %vm622_vm1, %v642_v61 }
 0x195   : > { %v883_v62 = vpop.permute.xlu0 %882  ;;  %v885_v22 = vpop.permute.xlu1 %884 }
 0x196   : > { %903 = vst.msk [vmem:[#allocation3 + $0x60] sm:$0xff] %vm622_vm1, %v883_v62  ;;  %904 = vst.msk [vmem:[#allocation3 + $0x68] sm:$0xff] %vm622_vm1, %v885_v22 }
 0x199   : > { %v916_v34 = vpop.permute.xlu0 %915  ;;  %v918_v27 = vpop.permute.xlu1 %917 }
 0x19a   : > { %936 = vst.msk [vmem:[#allocation4 + $0x60] sm:$0xff] %vm622_vm1, %v916_v34  ;;  %937 = vst.msk [vmem:[#allocation4 + $0x68] sm:$0xff] %vm622_vm1, %v918_v27 }
 0x19d   : > { %v1156_v11 = vpop.permute.xlu0 %1155  ;;  %v1158_v59 = vpop.permute.xlu1 %1157 }
 0x19e   : > { %1178 = vst.msk [vmem:[#allocation3 + $0x90] sm:$0xff] %vm622_vm1, %v1156_v11  ;;  %1179 = vst.msk [vmem:[#allocation3 + $0x98] sm:$0xff] %vm622_vm1, %v1158_v59 }
 0x1a1   : > { %v1189_v26 = vpop.permute.xlu0 %1188  ;;  %v1191_v18 = vpop.permute.xlu1 %1190 }
 0x1a2   : > { %1211 = vst.msk [vmem:[#allocation4 + $0x90] sm:$0xff] %vm622_vm1, %v1189_v26  ;;  %1212 = vst.msk [vmem:[#allocation4 + $0x98] sm:$0xff] %vm622_vm1, %v1191_v18 }
 0x1a5   : > { %v1433_v7 = vpop.permute.xlu0 %1432  ;;  %v1435_v5 = vpop.permute.xlu1 %1434 }
 0x1a6   : > { %1455 = vst.msk [vmem:[#allocation3 + $0xd0] sm:$0xff] %vm622_vm1, %v1433_v7  ;;  %1456 = vst.msk [vmem:[#allocation3 + $0xd8] sm:$0xff] %vm622_vm1, %v1435_v5 }
 0x1a9   : > { %v1466_v32 = vpop.permute.xlu0 %1465  ;;  %v1468_v10 = vpop.permute.xlu1 %1467 }
 0x1aa   : > { %1488 = vst.msk [vmem:[#allocation4 + $0xd0] sm:$0xff] %vm622_vm1, %v1466_v32  ;;  %1489 = vst.msk [vmem:[#allocation4 + $0xd8] sm:$0xff] %vm622_vm1, %v1468_v10 }
 0x1ad   : > { %v1152_v60 = vpop.permute.xlu0 %1151  ;;  %v1154_v21 = vpop.permute.xlu1 %1153 }
 0x1ae   : > { %1176 = vst.msk [vmem:[#allocation3 + $0x80] sm:$0xff] %vm622_vm1, %v1152_v60  ;;  %1177 = vst.msk [vmem:[#allocation3 + $0x88] sm:$0xff] %vm622_vm1, %v1154_v21 }
 0x1b1   : > { %v1185_v9 = vpop.permute.xlu0 %1184  ;;  %v1187_v56 = vpop.permute.xlu1 %1186 }
 0x1b2   : > { %1209 = vst.msk [vmem:[#allocation4 + $0x80] sm:$0xff] %vm622_vm1, %v1185_v9  ;;  %1210 = vst.msk [vmem:[#allocation4 + $0x88] sm:$0xff] %vm622_vm1, %v1187_v56 }
 0x1b5   : > { %v1429_v46 = vpop.permute.xlu0 %1428  ;;  %v1431_v14 = vpop.permute.xlu1 %1430 }
 0x1b6   : > { %1453 = vst.msk [vmem:[#allocation3 + $0xc0] sm:$0xff] %vm622_vm1, %v1429_v46  ;;  %1454 = vst.msk [vmem:[#allocation3 + $0xc8] sm:$0xff] %vm622_vm1, %v1431_v14 }
 0x1b9   : > { %v1462_v13 = vpop.permute.xlu0 %1461  ;;  %v1464_v47 = vpop.permute.xlu1 %1463 }
 0x1ba   : > { %1486 = vst.msk [vmem:[#allocation4 + $0xc0] sm:$0xff] %vm622_vm1, %v1462_v13  ;;  %1487 = vst.msk [vmem:[#allocation4 + $0xc8] sm:$0xff] %vm622_vm1, %v1464_v47 }
 0x1bd   : > { %v1164_v50 = vpop.permute.xlu0 %1163  ;;  %v1166_v12 = vpop.permute.xlu1 %1165 }
 0x1be   : > { %1182 = vst.msk [vmem:[#allocation3 + $0xb0] sm:$0xff] %vm622_vm1, %v1164_v50  ;;  %1183 = vst.msk [vmem:[#allocation3 + $0xb8] sm:$0xff] %vm622_vm1, %v1166_v12 }
 0x1c1   : > { %v1197_v48 = vpop.permute.xlu0 %1196  ;;  %v1199_v0 = vpop.permute.xlu1 %1198 }
 0x1c2   : > { %1215 = vst.msk [vmem:[#allocation4 + $0xb0] sm:$0xff] %vm622_vm1, %v1197_v48  ;;  %1216 = vst.msk [vmem:[#allocation4 + $0xb8] sm:$0xff] %vm622_vm1, %v1199_v0 }
 0x1c5   : > { %v1441_v45 = vpop.permute.xlu0 %1440  ;;  %v1443_v36 = vpop.permute.xlu1 %1442 }
 0x1c6   : > { %1459 = vst.msk [vmem:[#allocation3 + $0xf0] sm:$0xff] %vm622_vm1, %v1441_v45  ;;  %1460 = vst.msk [vmem:[#allocation3 + $0xf8] sm:$0xff] %vm622_vm1, %v1443_v36 }
 0x1c9   : > { %v1160_v3 = vpop.permute.xlu0 %1159  ;;  %v1162_v39 = vpop.permute.xlu1 %1161 }
 0x1ca   : > { %1180 = vst.msk [vmem:[#allocation3 + $0xa0] sm:$0xff] %vm622_vm1, %v1160_v3  ;;  %1181 = vst.msk [vmem:[#allocation3 + $0xa8] sm:$0xff] %vm622_vm1, %v1162_v39 }
 0x1cd   : > { %v1193_v35 = vpop.permute.xlu0 %1192  ;;  %v1195_v51 = vpop.permute.xlu1 %1194 }
 0x1ce   : > { %1213 = vst.msk [vmem:[#allocation4 + $0xa0] sm:$0xff] %vm622_vm1, %v1193_v35  ;;  %1214 = vst.msk [vmem:[#allocation4 + $0xa8] sm:$0xff] %vm622_vm1, %v1195_v51 }
 0x1d1   : > { %v1437_v54 = vpop.permute.xlu0 %1436  ;;  %v1439_v23 = vpop.permute.xlu1 %1438 }
 0x1d2   : > { %1457 = vst.msk [vmem:[#allocation3 + $0xe0] sm:$0xff] %vm622_vm1, %v1437_v54  ;;  %1458 = vst.msk [vmem:[#allocation3 + $0xe8] sm:$0xff] %vm622_vm1, %v1439_v23 }
 0x1d5   : > { %v1470_v1 = vpop.permute.xlu0 %1469  ;;  %v1472_v19 = vpop.permute.xlu1 %1471 }
 0x1d6   : > { %1490 = vst.msk [vmem:[#allocation4 + $0xe0] sm:$0xff] %vm622_vm1, %v1470_v1  ;;  %1491 = vst.msk [vmem:[#allocation4 + $0xe8] sm:$0xff] %vm622_vm1, %v1472_v19 }
 0x1d9   : > { %v1474_v31 = vpop.permute.xlu0 %1473  ;;  %v1476_v16 = vpop.permute.xlu1 %1475 }
 0x1da   : > { %1492 = vst.msk [vmem:[#allocation4 + $0xf0] sm:$0xff] %vm622_vm1, %v1474_v31  ;;  %1493 = vst.msk [vmem:[#allocation4 + $0xf8] sm:$0xff] %vm622_vm1, %v1476_v16 }
 0x1db LB: >> { %v5555_v6 = vld [vmem:[#allocation9_spill] sm:$0xff]  ;;  %s4609_s19 = sshll.u32 %s3858_s18, 3  ;;  %v5556_v63 = vld [vmem:[#allocation10_spill] sm:$0xff]  ;;  %v3862_v51 = vmov 1966171168   ;;  %vm1928_vm2 = vcmask 1041409   ;;  %s3858_s18 = sphi %s4588_s18, %s1499_s18   ;;  %v3854_v2 = vphi %v4586_v2, %v5393_v2   ;;  %v3850_v28 = vphi %v4584_v28, %v5397_v28   ;;  %v3846_v38 = vphi %v4582_v38, %v5416_v38   ;;  %v3842_v41 = vphi %v4580_v41, %v5579_v41  }
 0x1dc   : >> { %v4606_v17 = vsub.s32 2, %v5555_v6  ;;  %v4612_v24 = vsub.s32 3, %v5555_v6  ;;  %v4615_v52 = vsub.s32 1, %v5555_v6  ;;  %s1507_s20 = scalar_lea.vmem [#allocation3], %s4609_s19  ;;  %v4629_v49 = vsub.s32 4, %v5555_v6  ;;  %s4634_s21 = ssub.s32 56, %s4609_s19 }
 0x1dd   : >> { %v4618_v30 = vld [vmem:[%s1507_s20] sm:$0xff]  ;;  %v4641_v53 = vsub.s32 5, %v5555_v6  ;;  %v4648_v58 = vsub.s32 7, %v5555_v6  ;;  %s3330_s23 = scalar_lea.vmem [#allocation3], %s4634_s21  ;;  %v4660_v37 = vsub.s32 6, %v5555_v6  ;;  %s1509_s26 = scalar_lea.vmem [#allocation4], %s4609_s19  ;;  %v1516_v54 = vunpack.c.l.s4 %v3862_v51 }
 0x1de   : >> { %v1695_v29 = vrot.slane %v4618_v30, %v4606_v17  ;;  %v1681_v40 = vrot.slane %v4618_v30, %v5556_v63  ;;  %v1702_v33 = vrot.slane %v4618_v30, %v4612_v24  ;;  %v1688_v8 = vrot.slane %v4618_v30, %v4615_v52  ;;  %v4631_v55 = vld [vmem:[%s1507_s20 + $0x40] sm:$0xff]  ;;  %s1511_s17 = scalar_lea.vmem %s3951_s22, %s4609_s19  ;;  %s1505_s27 = scalar_lea.vmem [#allocation2], %s4609_s19 }
 0x1df   : >> { %v2122_v42 = vrot.slane %v4631_v55, %v5556_v63  ;;  %v1709_v57 = vrot.slane %v4618_v30, %v4629_v49  ;;  %v2129_v15 = vrot.slane %v4631_v55, %v4615_v52  ;;  %v1716_v25 = vrot.slane %v4618_v30, %v4641_v53  ;;  %v4651_v20 = vld [vmem:[%s3330_s23 + $0xc0] sm:$0xff]  ;;  %s3332_s28 = scalar_lea.vmem [#allocation4], %s4634_s21  ;;  %s3328_s29 = scalar_lea.vmem [#allocation2], %s4634_s21 }
 0x1e0   : >> { %1697 = vbcast.lane.b32.xlu1 %v1695_v29, 256  ;;  %1683 = vbcast.lane.b32.xlu0 %v1681_v40, 256  ;;  %v4653_v4 = vld [vmem:[%s3330_s23 + $0x80] sm:$0xff]  ;;  %v3040_v44 = vrot.slane %v4651_v20, %v4648_v58  ;;  %v2136_v62 = vrot.slane %v4631_v55, %v4606_v17  ;;  %v2143_v22 = vrot.slane %v4631_v55, %v4612_v24  ;;  %v1517_v19 = vunpack.c.0.s8 %v1516_v54  ;;  %s1952_s8 = scalar_lea.vmem %s3969_s30, %s4609_s19  ;;  %s2821_s9 = scalar_lea.vmem %s3969_s30, %s4634_s21 }
 0x1e1   : >> { %v2606_v43 = vrot.slane %v4653_v4, %v4648_v58  ;;  %v2599_v61 = vrot.slane %v4653_v4, %v4660_v37  ;;  %v3033_v34 = vrot.slane %v4651_v20, %v4660_v37  ;;  %v3026_v27 = vrot.slane %v4651_v20, %v4641_v53  ;;  %v4695_v56 = vld [vmem:[%s1509_s26] sm:$0xff]  ;;  %s2387_s10 = scalar_lea.vmem %s3951_s22, %s4634_s21  ;;  %s5428_s11 = scalar_lea.vmem %s4038_s25, %s4609_s19 }
 0x1e2   : >> { %v2592_v11 = vrot.slane %v4653_v4, %v4641_v53  ;;  %v2585_v59 = vrot.slane %v4653_v4, %v4629_v49  ;;  %v2150_v26 = vrot.slane %v4631_v55, %v4629_v49  ;;  %v2157_v18 = vrot.slane %v4631_v55, %v4641_v53  ;;  %v4701_v13 = vld [vmem:[%s1509_s26 + $0x40] sm:$0xff]  ;;  %s5432_s13 = scalar_lea.vmem %s3988_s12, %s4609_s19  ;;  %s3228_s14 = scalar_lea.vmem %s4038_s25, %s4634_s21 }
 0x1e3   : >> { %v3019_v7 = vrot.slane %v4651_v20, %v4629_v49  ;;  %v3012_v5 = vrot.slane %v4651_v20, %v4612_v24  ;;  %v2578_v32 = vrot.slane %v4653_v4, %v4612_v24  ;;  %v2164_v10 = vrot.slane %v4631_v55, %v4660_v37  ;;  %v1506_v29 = vld [vmem:[%s1505_s27] sm:$0xff]  ;;  %s2794_s15 = scalar_lea.vmem %s3988_s12, %s4634_s21  ;;  %s1499_s18 = sadd.s32 1, %s3858_s18  }
 0x1e4   : >> { %1704 = vbcast.lane.b32.xlu1 %v1702_v33, 256  ;;  %1690 = vbcast.lane.b32.xlu0 %v1688_v8, 256  ;;  %v1723_v60 = vrot.slane %v4618_v30, %v4660_v37  ;;  %v3005_v21 = vrot.slane %v4651_v20, %v4606_v17  ;;  %v2571_v9 = vrot.slane %v4653_v4, %v4606_v17  ;;  %v4742_v8 = vld [vmem:[%s3332_s28 + $0x80] sm:$0xff]  ;;  %vm1930_vm3 = vcmask 1042434   ;;  %p1496_p4 = scmp.ge.s32.totalorder %s1499_s18, 8  }
 0x1e5   : >> { %v1808_v46 = vrot.slane %v4695_v56, %v4615_v52  ;;  %v1801_v14 = vrot.slane %v4695_v56, %v5556_v63  ;;  %v2249_v47 = vrot.slane %v4701_v13, %v4615_v52  ;;  %v2242_v50 = vrot.slane %v4701_v13, %v5556_v63 }
 0x1e6   : >> { %v2256_v12 = vrot.slane %v4701_v13, %v4606_v17  ;;  %v1815_v48 = vrot.slane %v4695_v56, %v4606_v17  ;;  %v1822_v0 = vrot.slane %v4695_v56, %v4612_v24  ;;  %v1730_v45 = vrot.slane %v4618_v30, %v4648_v58 }
 0x1e7   : >> { %v2263_v36 = vrot.slane %v4701_v13, %v4612_v24  ;;  %v2171_v3 = vrot.slane %v4631_v55, %v4648_v58  ;;  %v2998_v39 = vrot.slane %v4651_v20, %v4615_v52  ;;  %v2564_v35 = vrot.slane %v4653_v4, %v4615_v52  ;;  %v1512_v55 = vld [vmem:[%s1511_s17] sm:$0xff] }
 0x1e8   : >> { %2124 = vbcast.lane.b32.xlu1 %v2122_v42, 256  ;;  %1711 = vbcast.lane.b32.xlu0 %v1709_v57, 256  ;;  %v2270_v23 = vrot.slane %v4701_v13, %v4629_v49  ;;  %v1829_v1 = vrot.slane %v4695_v56, %v4629_v49  ;;  %v2277_v31 = vrot.slane %v4701_v13, %v4641_v53  ;;  %v4745_v57 = vld [vmem:[%s3332_s28 + $0xc0] sm:$0xff]  ;;  %vm1932_vm4 = vcmask 1043459  }
 0x1e9   : >> { %v1836_v16 = vrot.slane %v4695_v56, %v4641_v53  ;;  %v4732_v30 = vsub.s32 %v1517_v19, %v5555_v6  ;;  %v2284_v40 = vrot.slane %v4701_v13, %v4660_v37  ;;  %v1843_v33 = vrot.slane %v4695_v56, %v4660_v37 }
 0x1ea   : >> { %vm1934_vm5 = vcmask 1044484   ;;  %vm1936_vm6 = vcmask 1045509   ;;  %vm1938_vm7 = vcmask 1046534   ;;  %vm1940_vm8 = vcmask 1047559  }
 0x1eb   : >> { %v1521_v42 = vrot.slane %v1506_v29, %v4732_v30 }
 0x1ec   : >> { %2131 = vbcast.lane.b32.xlu1 %v2129_v15, 256  ;;  %1718 = vbcast.lane.b32.xlu0 %v1716_v25, 256  ;;  %v4748_v15 = vld [vmem:[%s3328_s29 + $0x80] sm:$0xff]  ;;  %v2291_v25 = vrot.slane %v4701_v13, %v4648_v58  ;;  %v2705_v13 = vrot.slane %v4742_v8, %v4629_v49 }
 0x1f0   : >> { %3042 = vbcast.lane.b32.xlu1 %v3040_v44, 256  ;;  %2608 = vbcast.lane.b32.xlu0 %v2606_v43, 256  ;;  %v1850_v44 = vrot.slane %v4695_v56, %v4648_v58  ;;  %v2991_v43 = vrot.slane %v4651_v20, %v5556_v63  ;;  %v3118_v20 = vrot.slane %v4745_v57, %v4615_v52 }
 0x1f1   : >> { %v3139_v56 = vrot.slane %v4745_v57, %v4629_v49 }
 0x1f4   : >> { %2601 = vbcast.lane.b32.xlu1 %v2599_v61, 256  ;;  %2138 = vbcast.lane.b32.xlu0 %v2136_v62, 256  ;;  %v3468_v61 = vld [vmem:[%s1505_s27 + $0x40] sm:$0xff] }
 0x1f5   : >> { %v4756_v62 = vld [vmem:[%s3328_s29 + $0xc0] sm:$0xff] }
 0x1f8   : >> { %2145 = vbcast.lane.b32.xlu1 %v2143_v22, 256  ;;  %3035 = vbcast.lane.b32.xlu0 %v3033_v34, 256  ;;  %v2557_v22 = vrot.slane %v4653_v4, %v5556_v63  ;;  %v2684_v34 = vrot.slane %v4742_v8, %v4615_v52  ;;  %v2390_v4 = vcombine.high %v4748_v15, %v4748_v15 }
 0x1fc   : >> { %3028 = vbcast.lane.b32.xlu1 %v3026_v27, 256  ;;  %2594 = vbcast.lane.b32.xlu0 %v2592_v11, 256  ;;  %v2677_v27 = vrot.slane %v4742_v8, %v5556_v63  ;;  %v4764_v11 = vmul.f32 %v1512_v55, %v1506_v29 }
 0x200   : >> { %2587 = vbcast.lane.b32.xlu1 %v2585_v59, 256  ;;  %2152 = vbcast.lane.b32.xlu0 %v2150_v26, 256  ;;  %v4769_v59 = vrot.slane %v1521_v42, %v4732_v30  ;;  %v3111_v26 = vrot.slane %v4745_v57, %v5556_v63 }
 0x204   : >> { %2159 = vbcast.lane.b32.xlu1 %v2157_v18, 256  ;;  %3021 = vbcast.lane.b32.xlu0 %v3019_v7, 256  ;;  %v3125_v18 = vrot.slane %v4745_v57, %v4606_v17  ;;  %v1962_v7 = vrot.slane %v3468_v61, %v4732_v30 }
 0x208   : >> { %3014 = vbcast.lane.b32.xlu1 %v3012_v5, 256  ;;  %2580 = vbcast.lane.b32.xlu0 %v2578_v32, 256  ;;  %v2824_v5 = vcombine.high %v4756_v62, %v4756_v62  ;;  %v2691_v32 = vrot.slane %v4742_v8, %v4606_v17 }
 0x20c   : >> { %2166 = vbcast.lane.b32.xlu1 %v2164_v10, 256  ;;  %1725 = vbcast.lane.b32.xlu0 %v1723_v60, 256  ;;  %v3132_v10 = vrot.slane %v4745_v57, %v4612_v24  ;;  %v1514_v60 = vcombine.high %v1506_v29, %v1506_v29 }
 0x210   : >> { %3007 = vbcast.lane.b32.xlu1 %v3005_v21, 256  ;;  %2573 = vbcast.lane.b32.xlu0 %v2571_v9, 256  ;;  %v1529_v21 = vcombine.high %v1521_v42, %v1521_v42  ;;  %v2698_v9 = vrot.slane %v4742_v8, %v4612_v24  ;;  %v1970_v42 = vcombine.high %v1962_v7, %v1962_v7 }
 0x214   : >> { %1810 = vbcast.lane.b32.xlu1 %v1808_v46, 256  ;;  %1803 = vbcast.lane.b32.xlu0 %v1801_v14, 256  ;;  %v1636_v46 = vrot.slane %v4764_v11, %v4732_v30  ;;  %v1955_v14 = vcombine.high %v3468_v61, %v3468_v61 }
 0x216   : >> { %v1644_v51 = vcombine.high %v1636_v46, %v1636_v46  ;;  %v4821_v19 = vrot.slane %v1955_v14, %v4732_v30 }
 0x218   : >> { %2251 = vbcast.lane.b32.xlu1 %v2249_v47, 256  ;;  %2244 = vbcast.lane.b32.xlu0 %v2242_v50, 256  ;;  %v1566_v47 = vrot.slane %v4769_v59, %v5556_v63  ;;  %v1953_v50 = vld [vmem:[%s1952_s8] sm:$0xff]  ;;  %v4857_v14 = vrot.slane %v4821_v19, %v4732_v30 }
 0x21c   : >> { %2258 = vbcast.lane.b32.xlu1 %v2256_v12, 256  ;;  %1817 = vbcast.lane.b32.xlu0 %v1815_v48, 256  ;;  %v2404_v12 = vrot.slane %v2390_v4, %v4732_v30  ;;  %v1559_v4 = vcombine.high %v4769_v59, %v4769_v59 }
 0x220   : >> { %1824 = vbcast.lane.b32.xlu1 %v1822_v0, 256  ;;  %1732 = vbcast.lane.b32.xlu0 %v1730_v45, 256  ;;  %v4804_v45 = vrot.slane %v1962_v7, %v4732_v30 }
 0x224   : >> { %2265 = vbcast.lane.b32.xlu1 %v2263_v36, 256  ;;  %2173 = vbcast.lane.b32.xlu0 %v2171_v3, 256  ;;  %v2822_v36 = vld [vmem:[%s2821_s9] sm:$0xff]  ;;  %v4807_v3 = vrot.slane %v2824_v5, %v4732_v30 }
 0x228   : >> { %3000 = vbcast.lane.b32.xlu1 %v2998_v39, 256  ;;  %2566 = vbcast.lane.b32.xlu0 %v2564_v35, 256  ;;  %v4810_v39 = vrot.slane %v1514_v60, %v4732_v30  ;;  %v1551_v35 = vrot.slane %v1529_v21, %v4732_v30 }
 0x22a   : >> { %v1530_v55 = vcombine.high %v4810_v39, %v4810_v39  ;;  %v1561_v54 = vcombine.high %v1551_v35, %v1551_v35 }
 0x22c   : >> { %2272 = vbcast.lane.b32.xlu1 %v2270_v23, 256  ;;  %1831 = vbcast.lane.b32.xlu0 %v1829_v1, 256  ;;  %v4816_v23 = vrot.slane %v1636_v46, %v4732_v30 }
 0x22e   : >> { %v1674_v7 = vcombine.high %v4816_v23, %v4816_v23 }
 0x230   : >> { %2279 = vbcast.lane.b32.xlu1 %v2277_v31, 256  ;;  %1838 = vbcast.lane.b32.xlu0 %v1836_v16, 256  ;;  %v4823_v31 = vmul.f32 %v3468_v61, %v1953_v50  ;;  %v5557_v16 = vld [vmem:[#allocation5_spill] sm:$0xff]  ;;  %v4840_v61 = vrot.slane %v1644_v51, %v4732_v30  ;;  %v4865_v50 = vrot.slane %v1970_v42, %v4732_v30 }
 0x231   : >> { %v1603_v29 = vmul.f32 %v1566_v47, %v5557_v16  ;;  %v4878_v42 = vrot.slane %v1674_v7, %v5556_v63 }
 0x232   : >> { %v2077_v21 = vrot.slane %v4823_v31, %v4732_v30  ;;  %v1676_v60 = vcombine.high %v4840_v61, %v4840_v61 }
 0x233   : >> { %v1611_v46 = vmul.f32 1.442695, %v1603_v29  ;;  %v2388_v29 = vld [vmem:[%s2387_s10] sm:$0xff] }
 0x234   : >> { %2286 = vbcast.lane.b32.xlu1 %v2284_v40, 256  ;;  %1845 = vbcast.lane.b32.xlu0 %v1843_v33, 256  ;;  %v4827_v40 = vmul.f32 %v4756_v62, %v2822_v36  ;;  %v2406_v33 = vcombine.high %v2404_v12, %v2404_v12  ;;  %v5558_v36 = vld [vmem:[#allocation6_spill] sm:$0xff] }
 0x235   : >> { %3748 = vpow2.f32 %v1611_v46 }
 0x236   : >> { %v2939_v59 = vcombine.high %v4827_v40, %v4827_v40  ;;  %v4862_v47 = vrot.slane %v2406_v33, %v4732_v30  ;;  %v1574_v33 = vrot.slane %v1559_v4, %v5556_v63  ;;  %v4899_v4 = vmul.f32 %v4748_v15, %v2388_v29 }
 0x238   : >> { %2293 = vbcast.lane.b32.xlu1 %v2291_v25, 256  ;;  %1852 = vbcast.lane.b32.xlu0 %v1850_v44, 256  ;;  %v2007_v25 = vrot.slane %v4804_v45, %v5556_v63  ;;  %v2840_v44 = vcombine.high %v4807_v3, %v4807_v3 }
 0x23a   : >> { %v2044_v51 = vmul.f32 %v5558_v36, %v2007_v25  ;;  %v1578_v25 = vrot.slane %v1561_v54, %v5556_v63 }
 0x23c   : >> { %2993 = vbcast.lane.b32.xlu1 %v2991_v43, 256  ;;  %2559 = vbcast.lane.b32.xlu0 %v2557_v22, 256  ;;  %v4837_v43 = vrot.slane %v4810_v39, %v4732_v30  ;;  %v1570_v22 = vrot.slane %v1551_v35, %v5556_v63  ;;  %v4894_v35 = vrot.slane %v2939_v59, %v4732_v30  ;;  %v2052_v7 = vmul.f32 1.442695, %v2044_v51 }
 0x23d   : >> { %v1605_v59 = vmul.f32 %v1574_v33, %v5557_v16 }
 0x23e   : >> { %v1604_v1 = vmul.f32 %v1570_v22, %v5557_v16  ;;  %v2438_v22 = vcombine.high %v4862_v47, %v4862_v47  ;;  %3750 = vpow2.f32 %v2052_v7  ;;  %v1582_v33 = vrot.slane %v4837_v43, %v5556_v63 }
 0x23f   : >> { %v1615_v17 = vmul.f32 1.442695, %v1605_v59  ;;  %v3749_v24 = vpop.eup %3748 }
 0x240   : >> { %2686 = vbcast.lane.b32.xlu1 %v2684_v34, 256  ;;  %2679 = vbcast.lane.b32.xlu0 %v2677_v27, 256  ;;  %v1629_v34 = vcombine.high %v4764_v11, %v4764_v11  ;;  %v4871_v27 = vrot.slane %v2840_v44, %v4732_v30  ;;  %v4885_v44 = vrot.slane %v2077_v21, %v4732_v30  ;;  %v1613_v46 = vmul.f32 1.442695, %v1604_v1 }
 0x241   : >> { %v2470_v54 = vrot.slane %v2438_v22, %v5556_v63  ;;  %v2505_v1 = vcombine.high %v4899_v4, %v4899_v4 }
 0x242   : >> { %v1643_v11 = vrot.slane %v1629_v34, %v4732_v30  ;;  %v2872_v52 = vcombine.high %v4871_v27, %v4871_v27  ;;  %v2085_v34 = vcombine.high %v2077_v21, %v2077_v21  ;;  %3752 = vpow2.f32 %v1613_v46  ;;  %v5560_v46 = vld [vmem:[#allocation8_spill] sm:$0xff] }
 0x243   : >> { %3754 = vpow2.f32 %v1615_v17 }
 0x244   : >> { %3120 = vbcast.lane.b32.xlu1 %v3118_v20, 256  ;;  %3113 = vbcast.lane.b32.xlu0 %v3111_v26, 256  ;;  %v4905_v20 = vrot.slane %v2404_v12, %v4732_v30  ;;  %v4908_v26 = vrot.slane %v1676_v60, %v5556_v63  ;;  %v1645_v0 = vcombine.high %v1643_v11, %v1643_v11 }
 0x245   : >> { %v2955_v12 = vcombine.high %v4894_v35, %v4894_v35  ;;  %v2904_v60 = vrot.slane %v2872_v52, %v5556_v63  ;;  %v4938_v22 = vrot.slane %v1643_v11, %v4732_v30  ;;  %v4945_v52 = vrot.slane %v4756_v62, %v4732_v30 }
 0x246   : >> { %v2436_v21 = vcombine.high %v4905_v20, %v4905_v20  ;;  %v4941_v7 = vrot.slane %v1645_v0, %v4732_v30  ;;  %v2519_v11 = vrot.slane %v2505_v1, %v4732_v30 }
 0x247   : >> { %v4960_v0 = vrot.slane %v2955_v12, %v4732_v30  ;;  %v2920_v59 = vmul.f32 %v5560_v46, %v2904_v60  ;;  %v2839_v39 = vcombine.high %v4945_v52, %v4945_v52 }
 0x248   : >> { %3127 = vbcast.lane.b32.xlu1 %v3125_v18, 256  ;;  %2693 = vbcast.lane.b32.xlu0 %v2691_v32, 256  ;;  %v4932_v18 = vrot.slane %v4807_v3, %v4732_v30  ;;  %v1606_v32 = vmul.f32 %v1578_v25, %v5557_v16  ;;  %v4951_v3 = vrot.slane %v1530_v55, %v4732_v30  ;;  %v5559_v25 = vld [vmem:[#allocation7_spill] sm:$0xff]  ;;  %v3751_v5 = vpop.eup %3750 }
 0x249   : >> { %v2486_v62 = vmul.f32 %v5559_v25, %v2470_v54  ;;  %v4967_v55 = vrot.slane %v2085_v34, %v4732_v30  ;;  %v1607_v54 = vmul.f32 %v1582_v33, %v5557_v16  ;;  %v4980_v34 = vrot.slane %v4748_v15, %v4732_v30 }
 0x24a   : >> { %v1617_v12 = vmul.f32 1.442695, %v1606_v32  ;;  %v1586_v60 = vrot.slane %v4951_v3, %v5556_v63  ;;  %v2987_v17 = vcombine.high %v4960_v0, %v4960_v0  ;;  %v2521_v15 = vcombine.high %v2519_v11, %v2519_v11 }
 0x24b   : >> { %v2501_v32 = vmul.f32 1.442695, %v2486_v62  ;;  %v1782_v33 = vmul.f32 %v3854_v2, %v3749_v24  ;;  %v2935_v1 = vmul.f32 1.442695, %v2920_v59  ;;  %v4996_v51 = vrot.slane %v2519_v11, %v4732_v30 }
 0x24c   : >> { %3134 = vbcast.lane.b32.xlu1 %v3132_v10, 256  ;;  %2700 = vbcast.lane.b32.xlu0 %v2698_v9, 256  ;;  %v2870_v10 = vcombine.high %v4932_v18, %v4932_v18  ;;  %v2466_v9 = vrot.slane %v2436_v21, %v5556_v63  ;;  %3756 = vpow2.f32 %v1617_v12  ;;  %v1619_v21 = vmul.f32 1.442695, %v1607_v54  ;;  %v3753_v24 = vpop.eup %3752 }
 0x24d   : >> { %v5561_v62 = vrot.slane %v4816_v23, %v5556_v63  ;;  %v2405_v11 = vcombine.high %v4980_v34, %v4980_v34  ;;  %v5009_v59 = vrot.slane %v4894_v35, %v4732_v30  ;;  %3758 = vpow2.f32 %v2501_v32 }
 0x24e   : >> { %v2485_v49 = vmul.f32 %v5559_v25, %v2466_v9  ;;  %v5563_v9 = vrot.slane %v4742_v8, %v4641_v53  ;;  %v5022_v23 = vrot.slane %v2521_v15, %v4732_v30  ;;  %v2462_v35 = vrot.slane %v4862_v47, %v5556_v63 }
 0x24f   : >> { %3760 = vpow2.f32 %v2935_v1  ;;  %v2551_v54 = vcombine.high %v4996_v51, %v4996_v51  ;;  %v5033_v32 = vrot.slane %v2839_v39, %v4732_v30  ;;  %v5564_v47 = vrot.slane %v4840_v61, %v5556_v63 }
 0x250   : >> { %3141 = vbcast.lane.b32.xlu1 %v3139_v56, 256  ;;  %2707 = vbcast.lane.b32.xlu0 %v2705_v13, 256  ;;  %v2900_v56 = vrot.slane %v2870_v10, %v5556_v63  ;;  %v2896_v13 = vrot.slane %v4871_v27, %v5556_v63  ;;  %v1608_v10 = vmul.f32 %v1586_v60, %v5557_v16  ;;  %3762 = vpow2.f32 %v1619_v21 }
 0x251   : >> { %v5562_v27 = vrot.slane %v4745_v57, %v4641_v53  ;;  %v5039_v1 = vmul.f32 %v3850_v28, %v3751_v5  ;;  %v5566_v39 = vrot.slane %v4742_v8, %v4660_v37  ;;  %v2484_v21 = vmul.f32 %v5559_v25, %v2462_v35 }
 0x252   : >> { %v1698_v29 = vpop.permute.xlu1 %1697  ;;  %v1684_v48 = vpop.permute.xlu0 %1683  ;;  %v2919_v60 = vmul.f32 %v5560_v46, %v2900_v56  ;;  %v2458_v61 = vrot.slane %v4905_v20, %v5556_v63  ;;  %v5052_v28 = vrot.slane %v2405_v11, %v4732_v30  ;;  %v2553_v5 = vcombine.high %v5022_v23, %v5022_v23 }
 0x253   : >> { %v1774_v2 = vmul.f32 %v5561_v62, %v1684_v48  ;;  %v5019_v48 = vrot.slane %v2987_v17, %v5556_v63  ;;  %v2918_v17 = vmul.f32 %v5560_v46, %v2896_v13  ;;  %v3755_v56 = vpop.eup %3754  ;;  %v2985_v35 = vcombine.high %v5009_v59, %v5009_v59 }
 0x254   : >> { %3148 = vbcast.lane.b32.xlu1 %v5562_v27, 256  ;;  %2714 = vbcast.lane.b32.xlu0 %v5563_v9, 256  ;;  %v2499_v27 = vmul.f32 1.442695, %v2485_v49  ;;  %v5565_v49 = vrot.slane %v4745_v57, %v4660_v37  ;;  %v2933_v13 = vmul.f32 1.442695, %v2919_v60  ;;  %v2871_v11 = vcombine.high %v5033_v32, %v5033_v32 }
 0x255   : >> { %v5026_v12 = vadd.f32 %v1782_v33, %v1774_v2  ;;  %v1621_v2 = vmul.f32 1.442695, %v1608_v10  ;;  %v2931_v20 = vmul.f32 1.442695, %v2918_v17  ;;  %v2892_v60 = vrot.slane %v4932_v18, %v5556_v63 }
 0x256   : >> { %v1705_v53 = vpop.permute.xlu1 %1704  ;;  %v1691_v62 = vpop.permute.xlu0 %1690  ;;  %3764 = vpow2.f32 %v2499_v27  ;;  %v5568_v27 = vrot.slane %v4742_v8, %v4648_v58  ;;  %v2637_v17 = vrot.slane %v2551_v54, %v5556_v63  ;;  %v2641_v18 = vrot.slane %v2553_v5, %v5556_v63 }
 0x257   : >> { %v1775_v15 = vmul.f32 %v5564_v47, %v1691_v62  ;;  %v1784_v33 = vmul.f32 %v3753_v24, %v5026_v12  ;;  %v2011_v24 = vrot.slane %v4865_v50, %v5556_v63  ;;  %v1776_v62 = vmul.f32 %v4878_v42, %v1698_v29 }
 0x258   : >> { %3155 = vbcast.lane.b32.xlu1 %v5565_v49, 256  ;;  %2721 = vbcast.lane.b32.xlu0 %v5566_v39, 256  ;;  %3766 = vpow2.f32 %v1621_v2  ;;  %v2497_v49 = vmul.f32 1.442695, %v2484_v21  ;;  %v2483_v42 = vmul.f32 %v5559_v25, %v2458_v61  ;;  %v2437_v29 = vcombine.high %v5052_v28, %v5052_v28 }
 0x259   : >> { %v5056_v10 = vadd.f32 %v1784_v33, %v1775_v15  ;;  %v3757_v15 = vpop.eup %3756  ;;  %v5567_v33 = vrot.slane %v4745_v57, %v4648_v58  ;;  %3768 = vpow2.f32 %v2933_v13  ;;  %v2045_v2 = vmul.f32 %v5558_v36, %v2011_v24 }
 0x25a   : >> { %v5060_v9 = vpop.permute.xlu1 %2124  ;;  %v1712_v37 = vpop.permute.xlu0 %1711  ;;  %v5087_v8 = vrot.slane %v2985_v35, %v5556_v63  ;;  %3770 = vpow2.f32 %v2931_v20  ;;  %v2888_v21 = vrot.slane %v2871_v11, %v5556_v63  ;;  %v1777_v5 = vmul.f32 %v4908_v26, %v1705_v53 }
 0x25b   : >> { %v1786_v47 = vmul.f32 %v3755_v56, %v5056_v10  ;;  %v3759_v57 = vpop.eup %3758  ;;  %v2917_v13 = vmul.f32 %v5560_v46, %v2892_v60  ;;  %v5096_v24 = vrot.slane %v4827_v40, %v4732_v30  ;;  %3772 = vpow2.f32 %v2497_v49 }
 0x25c   : >> { %3162 = vbcast.lane.b32.xlu1 %v5567_v33, 256  ;;  %2728 = vbcast.lane.b32.xlu0 %v5568_v27, 256  ;;  %v3761_v61 = vpop.eup %3760  ;;  %v2495_v35 = vmul.f32 1.442695, %v2483_v42  ;;  %v2454_v20 = vrot.slane %v2437_v29, %v5556_v63  ;;  %v5102_v33 = vrot.slane %v4945_v52, %v4732_v30  ;;  %v2658_v11 = vmul.f32 %v3846_v38, %v3759_v57 }
 0x25d   : >> { %v5082_v56 = vadd.f32 %v1786_v47, %v1776_v62  ;;  %v3763_v47 = vpop.eup %3762  ;;  %v2054_v26 = vmul.f32 1.442695, %v2045_v2  ;;  %v5569_v53 = vcombine.high %v4804_v45, %v4804_v45  ;;  %v3092_v27 = vmul.f32 %v3842_v41, %v3761_v61 }
 0x25e   : >> { %v5084_v39 = vpop.permute.xlu1 %2131  ;;  %v1719_v58 = vpop.permute.xlu0 %1718  ;;  %v2916_v42 = vmul.f32 %v5560_v46, %v2888_v21  ;;  %v5115_v52 = vrot.slane %v4980_v34, %v4732_v30  ;;  %v2002_v38 = vcombine.high %v4865_v50, %v4865_v50  ;;  %v5570_v29 = vrot.slane %v4938_v22, %v5556_v63 }
 0x25f   : >> { %v1788_v62 = vmul.f32 %v3757_v15, %v5082_v56  ;;  %v2015_v40 = vrot.slane %v5569_v53, %v5556_v63  ;;  %v2929_v61 = vmul.f32 1.442695, %v2917_v13  ;;  %v2482_v21 = vmul.f32 %v5559_v25, %v2454_v20 }
 0x260   : >> { %v1778_v45 = vmul.f32 %v5570_v29, %v1712_v37  ;;  %v3765_v41 = vpop.eup %3764  ;;  %v5127_v34 = vrot.slane %v4899_v4, %v4732_v30  ;;  %v2869_v50 = vcombine.high %v5102_v33, %v5102_v33  ;;  %3774 = vpow2.f32 %v2054_v26 }
 0x261   : >> { %v5109_v60 = vadd.f32 %v1788_v62, %v1777_v5  ;;  %3776 = vpow2.f32 %v2495_v35  ;;  %v2954_v13 = vcombine.high %v5096_v24, %v5096_v24  ;;  %v2435_v4 = vcombine.high %v5115_v52, %v5115_v52 }
 0x262   : >> { %v3043_v15 = vpop.permute.xlu1 %3042  ;;  %v2609_v49 = vpop.permute.xlu0 %2608  ;;  %v2019_v20 = vrot.slane %v2002_v38, %v5556_v63  ;;  %3778 = vpow2.f32 %v2929_v61  ;;  %v2520_v38 = vcombine.high %v5127_v34, %v5127_v34 }
 0x263   : >> { %v3091_v2 = vmul.f32 %v5019_v48, %v3043_v15  ;;  %v2657_v57 = vmul.f32 %v2641_v18, %v2609_v49  ;;  %v1790_v5 = vmul.f32 %v3763_v47, %v5109_v60  ;;  %v3767_v62 = vpop.eup %3766  ;;  %v2046_v48 = vmul.f32 %v5558_v36, %v2015_v40 }
 0x264   : >> { %v3769_v15 = vpop.eup %3768  ;;  %v2927_v49 = vmul.f32 1.442695, %v2916_v42  ;;  %v5574_v42 = vrot.slane %v4885_v44, %v5556_v63  ;;  %v2450_v61 = vrot.slane %v2435_v4, %v5556_v63  ;;  %v5174_v4 = vrot.slane %v2954_v13, %v4732_v30 }
 0x265   : >> { %v5131_v53 = vadd.f32 %v2658_v11, %v2657_v57  ;;  %v5134_v37 = vadd.f32 %v1790_v5, %v1778_v45  ;;  %v5143_v11 = vadd.f32 %v3092_v27, %v3091_v2  ;;  %v3771_v29 = vpop.eup %3770  ;;  %v5573_v45 = vrot.slane %v4941_v7, %v5556_v63 }
 0x266   : >> { %v2602_v18 = vpop.permute.xlu1 %2601  ;;  %v5136_v47 = vpop.permute.xlu0 %2138  ;;  %v2493_v57 = vmul.f32 1.442695, %v2482_v21  ;;  %v2884_v27 = vrot.slane %v2869_v50, %v5556_v63  ;;  %v2047_v21 = vmul.f32 %v5558_v36, %v2019_v20  ;;  %3780 = vpow2.f32 %v2927_v49 }
 0x267   : >> { %5571 = vst [vmem:[#allocation13_spill] sm:$0xff] %v5131_v53  ;;  %5572 = vst [vmem:[#allocation14_spill] sm:$0xff] %v5143_v11  ;;  %v2656_v26 = vmul.f32 %v2637_v17, %v2602_v18  ;;  %v2660_v40 = vmul.f32 %v3765_v41, %v5131_v53  ;;  %v1779_v35 = vmul.f32 %v5573_v45, %v1719_v58  ;;  %v2056_v17 = vmul.f32 1.442695, %v2046_v48  ;;  %v3773_v2 = vpop.eup %3772 }
 0x268   : >> { %v1792_v5 = vmul.f32 %v3767_v62, %v5134_v37  ;;  %v2215_v41 = vmul.f32 %v5574_v42, %v5060_v9  ;;  %v3094_v50 = vmul.f32 %v3769_v15, %v5143_v11  ;;  %v2633_v48 = vrot.slane %v5022_v23, %v5556_v63 }
 0x269   : >> { %v5150_v54 = vadd.f32 %v2660_v40, %v2656_v26  ;;  %v2182_v9 = vrot.slane %v4967_v55, %v5556_v63  ;;  %v2629_v40 = vrot.slane %v4996_v51, %v5556_v63  ;;  %3782 = vpow2.f32 %v2493_v57 }
 0x26a   : >> { %v5159_v18 = vpop.permute.xlu1 %2145  ;;  %v3036_v58 = vpop.permute.xlu0 %3035  ;;  %v5163_v62 = vadd.f32 %v1792_v5, %v1779_v35  ;;  %v2915_v15 = vmul.f32 %v5560_v46, %v2884_v27  ;;  %3784 = vpow2.f32 %v2056_v17  ;;  %v5183_v23 = vadd.f32 %v5039_v1, %v2215_v41 }
 0x26b   : >> { %v3090_v26 = vmul.f32 %v5087_v8, %v3036_v58  ;;  %v5179_v8 = vrot.slane %v2520_v38, %v4732_v30  ;;  %v2481_v35 = vmul.f32 %v5559_v25, %v2450_v61  ;;  %v2058_v51 = vmul.f32 1.442695, %v2047_v21  ;;  %v3775_v57 = vpop.eup %3774 }
 0x26c   : >> { %v2023_v13 = vrot.slane %v4857_v14, %v5556_v63  ;;  %v5575_v5 = vrot.slane %v4960_v0, %v5556_v63  ;;  %v2662_v17 = vmul.f32 %v3773_v2, %v5150_v54  ;;  %v3777_v1 = vpop.eup %3776  ;;  %v2115_v41 = vcombine.high %v4885_v44, %v4885_v44 }
 0x26d   : >> { %v5176_v20 = vadd.f32 %v3094_v50, %v3090_v26  ;;  %v2070_v58 = vcombine.high %v4823_v31, %v4823_v31  ;;  %v3063_v61 = vrot.slane %v5009_v59, %v5556_v63  ;;  %v2986_v21 = vcombine.high %v5174_v4, %v5174_v4  ;;  %v3779_v44 = vpop.eup %3778 }
 0x26e   : >> { %v3029_v49 = vpop.permute.xlu1 %3028  ;;  %v2595_v45 = vpop.permute.xlu0 %2594  ;;  %v5576_v2 = vcombine.high %v4821_v19, %v4821_v19  ;;  %v2216_v31 = vmul.f32 %v2182_v9, %v5084_v39  ;;  %v2491_v59 = vmul.f32 1.442695, %v2481_v35  ;;  %3786 = vpow2.f32 %v2058_v51 }
 0x26f   : >> { %v3089_v38 = vmul.f32 %v5575_v5, %v3029_v49  ;;  %v3096_v42 = vmul.f32 %v3771_v29, %v5176_v20  ;;  %v2655_v27 = vmul.f32 %v2633_v48, %v2595_v45  ;;  %v2925_v29 = vmul.f32 1.442695, %v2915_v15 }
 0x270   : >> { %v5209_v50 = vrot.slane %v5576_v2, %v4732_v30  ;;  %v2225_v45 = vmul.f32 %v3775_v57, %v5183_v23  ;;  %v2048_v5 = vmul.f32 %v5558_v36, %v2023_v13  ;;  %v2186_v19 = vrot.slane %v2115_v41, %v5556_v63  ;;  %v3781_v39 = vpop.eup %3780 }
 0x271   : >> { %v5201_v0 = vadd.f32 %v3096_v42, %v3089_v38  ;;  %v5203_v26 = vadd.f32 %v2662_v17, %v2655_v27  ;;  %v2552_v42 = vcombine.high %v5179_v8, %v5179_v8  ;;  %v2084_v27 = vrot.slane %v2070_v58, %v4732_v30 }
 0x272   : >> { %v2588_v48 = vpop.permute.xlu1 %2587  ;;  %v5212_v49 = vpop.permute.xlu0 %2152  ;;  %3788 = vpow2.f32 %v2925_v29  ;;  %v5225_v35 = vrot.slane %v5096_v24, %v4732_v30  ;;  %v5233_v51 = vrot.slane %v5127_v34, %v4732_v30  ;;  %v2060_v41 = vmul.f32 1.442695, %v2048_v5 }
 0x273   : >> { %v2654_v38 = vmul.f32 %v2629_v40, %v2588_v48  ;;  %v2664_v15 = vmul.f32 %v3777_v1, %v5203_v26  ;;  %v2027_v40 = vrot.slane %v5209_v50, %v5556_v63  ;;  %v3783_v13 = vpop.eup %3782  ;;  %3790 = vpow2.f32 %v2491_v59 }
 0x274   : >> { %v5235_v1 = vadd.f32 %v2225_v45, %v2216_v31  ;;  %v3785_v58 = vpop.eup %3784  ;;  %v3098_v24 = vmul.f32 %v3779_v44, %v5201_v0  ;;  %v3059_v2 = vrot.slane %v2986_v21, %v5556_v63  ;;  %v2625_v48 = vrot.slane %v2552_v42, %v5556_v63 }
 0x275   : >> { %v5221_v9 = vadd.f32 %v2664_v15, %v2654_v38  ;;  %v2217_v38 = vmul.f32 %v2186_v19, %v5136_v47  ;;  %v2117_v59 = vcombine.high %v4967_v55, %v4967_v55  ;;  %v2001_v34 = vcombine.high %v4857_v14, %v4857_v14 }
 0x276   : >> { %v5229_v57 = vpop.permute.xlu1 %2159  ;;  %v3022_v17 = vpop.permute.xlu0 %3021  ;;  %v2100_v31 = vrot.slane %v2084_v27, %v4732_v30  ;;  %v2049_v44 = vmul.f32 %v5558_v36, %v2027_v40  ;;  %v2550_v47 = vcombine.high %v5233_v51, %v5233_v51  ;;  %v2227_v15 = vmul.f32 %v3785_v58, %v5235_v1 }
 0x277   : >> { %v3088_v29 = vmul.f32 %v3063_v61, %v3022_v17  ;;  %v2984_v61 = vcombine.high %v5225_v35, %v5225_v35  ;;  %3792 = vpow2.f32 %v2060_v41  ;;  %v1560_v14 = vcombine.high %v4837_v43, %v4837_v43 }
 0x278   : >> { %v2666_v17 = vmul.f32 %v3783_v13, %v5221_v9  ;;  %v5259_v40 = vadd.f32 %v2227_v15, %v2217_v38  ;;  %v3787_v6 = vpop.eup %3786  ;;  %v2086_v53 = vcombine.high %v2084_v27, %v2084_v27  ;;  %v2062_v58 = vmul.f32 1.442695, %v2049_v44 }
 0x279   : >> { %v5246_v45 = vadd.f32 %v3098_v24, %v3088_v29  ;;  %v2190_v29 = vrot.slane %v2117_v59, %v5556_v63  ;;  %v2031_v24 = vrot.slane %v2001_v34, %v5556_v63  ;;  %v2003_v13 = vcombine.high %v5209_v50, %v5209_v50 }
 0x27a   : >> { %v3015_v21 = vpop.permute.xlu1 %3014  ;;  %v2581_v5 = vpop.permute.xlu0 %2580  ;;  %v2194_v27 = vrot.slane %v2100_v31, %v5556_v63  ;;  %v3055_v59 = vrot.slane %v2984_v61, %v5556_v63  ;;  %v2621_v34 = vrot.slane %v2550_v47, %v5556_v63  ;;  %v2446_v50 = vrot.slane %v5052_v28, %v5556_v63 }
 0x27b   : >> { %v3087_v55 = vmul.f32 %v3059_v2, %v3015_v21  ;;  %v3100_v42 = vmul.f32 %v3781_v39, %v5246_v45  ;;  %v2653_v19 = vmul.f32 %v2625_v48, %v2581_v5  ;;  %v1590_v39 = vrot.slane %v1560_v14, %v5556_v63 }
 0x27c   : >> { %v1562_v48 = vcombine.high %v4951_v3, %v4951_v3  ;;  %v3789_v38 = vpop.eup %3788  ;;  %v2218_v21 = vmul.f32 %v2190_v29, %v5159_v18  ;;  %v2229_v5 = vmul.f32 %v3787_v6, %v5259_v40  ;;  %v2050_v15 = vmul.f32 %v5558_v36, %v2031_v24 }
 0x27d   : >> { %v5262_v11 = vadd.f32 %v3100_v42, %v3087_v55  ;;  %v5264_v41 = vadd.f32 %v2666_v17, %v2653_v19  ;;  %v3791_v44 = vpop.eup %3790  ;;  %v5284_v14 = vrot.slane %v2086_v53, %v4732_v30  ;;  %v2116_v3 = vcombine.high %v2100_v31, %v2100_v31 }
 0x27e   : >> { %v5266_v43 = vpop.permute.xlu1 %2166  ;;  %v5268_v2 = vpop.permute.xlu0 %1725  ;;  %3794 = vpow2.f32 %v2062_v58  ;;  %v2880_v61 = vrot.slane %v5033_v32, %v5556_v63  ;;  %v1675_v47 = vcombine.high %v4938_v22, %v4938_v22  ;;  %v1609_v6 = vmul.f32 %v1590_v39, %v5557_v16 }
 0x27f   : >> { %v2035_v42 = vrot.slane %v2003_v13, %v5556_v63  ;;  %v1594_v19 = vrot.slane %v1562_v48, %v5556_v63  ;;  %v3102_v30 = vmul.f32 %v3789_v38, %v5262_v11  ;;  %v2668_v31 = vmul.f32 %v3791_v44, %v5264_v41 }
 0x280   : >> { %v1677_v32 = vcombine.high %v4941_v7, %v4941_v7  ;;  %v5297_v29 = vadd.f32 %v2229_v5, %v2218_v21  ;;  %v2064_v22 = vmul.f32 1.442695, %v2050_v15  ;;  %v2480_v24 = vmul.f32 %v5559_v25, %v2446_v50 }
 0x281   : >> { %v3793_v17 = vpop.eup %3792  ;;  %v2198_v58 = vrot.slane %v5284_v14, %v5556_v63  ;;  %v2914_v48 = vmul.f32 %v5560_v46, %v2880_v61  ;;  %v2219_v38 = vmul.f32 %v2194_v27, %v5212_v49  ;;  %v5312_v7 = vrot.slane %v1675_v47, %v5556_v63 }
 0x282   : >> { %v3008_v55 = vpop.permute.xlu1 %3007  ;;  %v2574_v18 = vpop.permute.xlu0 %2573  ;;  %v1623_v21 = vmul.f32 1.442695, %v1609_v6  ;;  %v2051_v50 = vmul.f32 %v5558_v36, %v2035_v42  ;;  %v5319_v61 = vrot.slane %v1677_v32, %v5556_v63  ;;  %v2231_v49 = vmul.f32 %v3793_v17, %v5297_v29 }
 0x283   : >> { %v3086_v28 = vmul.f32 %v3055_v59, %v3008_v55  ;;  %v2652_v53 = vmul.f32 %v2621_v34, %v2574_v18  ;;  %v5309_v59 = vrot.slane %v2116_v3, %v5556_v63  ;;  %v1610_v55 = vmul.f32 %v1594_v19, %v5557_v16 }
 0x284   : >> { %3796 = vpow2.f32 %v2064_v22  ;;  %v2489_v27 = vmul.f32 1.442695, %v2480_v24  ;;  %v2923_v18 = vmul.f32 1.442695, %v2914_v48  ;;  %v5326_v19 = vadd.f32 %v2231_v49, %v2219_v38 }
 0x285   : >> { %v5302_v39 = vadd.f32 %v3102_v30, %v3086_v28  ;;  %v5304_v13 = vadd.f32 %v2668_v31, %v2652_v53  ;;  %3798 = vpow2.f32 %v1623_v21  ;;  %v2066_v17 = vmul.f32 1.442695, %v2051_v50 }
 0x286   : >> { %v1811_v34 = vpop.permute.xlu1 %1810  ;;  %v1804_v44 = vpop.permute.xlu0 %1803  ;;  %v1625_v32 = vmul.f32 1.442695, %v1610_v55  ;;  %3800 = vpow2.f32 %v2489_v27  ;;  %v2118_v49 = vcombine.high %v5284_v14, %v5284_v14  ;;  %v2617_v14 = vrot.slane %v5179_v8, %v5556_v63 }
 0x287   : >> { %v1855_v5 = vmul.f32 %v1811_v34, %v5056_v10  ;;  %v1854_v15 = vmul.f32 %v1804_v44, %v5026_v12  ;;  %v2442_v10 = vrot.slane %v5115_v52, %v5556_v63  ;;  %v2876_v52 = vrot.slane %v5102_v33, %v5556_v63 }
 0x288   : >> { %v3795_v30 = vpop.eup %3794  ;;  %3802 = vpow2.f32 %v2923_v18  ;;  %v2220_v44 = vmul.f32 %v2198_v58, %v5229_v57 }
 0x289   : >> { %v1869_v3 = vsel %vm346_vm0, %v1855_v5, 0.0  ;;  %v1862_v47 = vsel %vm346_vm0, %v1854_v15, 0.0  ;;  %v2479_v38 = vmul.f32 %v5559_v25, %v2442_v10  ;;  %v2233_v15 = vmul.f32 %v3795_v30, %v5326_v19 }
 0x28a   : >> { %v1870_v12 = vrot.slane %v1869_v3, 4  ;;  %v1863_v6 = vrot.slane %v1862_v47, 4  ;;  %v2252_v42 = vpop.permute.xlu1 %2251  ;;  %v2245_v28 = vpop.permute.xlu0 %2244  ;;  %3804 = vpow2.f32 %v2066_v17  ;;  %v2913_v57 = vmul.f32 %v5560_v46, %v2876_v52 }
 0x28b   : >> { %v2296_v53 = vmul.f32 %v2252_v42, %v5235_v1  ;;  %v2295_v31 = vmul.f32 %v2245_v28, %v5183_v23  ;;  %3806 = vpow2.f32 %v1625_v32  ;;  %v2487_v10 = vmul.f32 1.442695, %v2479_v38 }
 0x28c   : >> { %v1871_v22 = vadd.f32 %v1870_v12, %v1869_v3  ;;  %v1864_v24 = vadd.f32 %v1863_v6, %v1862_v47  ;;  %v3051_v3 = vrot.slane %v5174_v4, %v5556_v63  ;;  %v5350_v42 = vadd.f32 %v2233_v15, %v2220_v44 }
 0x28d   : >> { %v2310_v48 = vsel %vm346_vm0, %v2296_v53, 0.0  ;;  %v2303_v34 = vsel %vm346_vm0, %v2295_v31, 0.0  ;;  %v5354_v53 = vrot.slane %v2118_v49, %v5556_v63  ;;  %v2221_v17 = vmul.f32 %v5309_v59, %v5266_v43 }
 0x28e   : >> { %v1872_v1 = vrot.slane %v1871_v22, 2  ;;  %v2311_v21 = vrot.slane %v2310_v48, 4  ;;  %v2259_v23 = vpop.permute.xlu1 %2258  ;;  %v1818_v5 = vpop.permute.xlu0 %1817  ;;  %v2304_v50 = vrot.slane %v2303_v34, 4  ;;  %v1865_v27 = vrot.slane %v1864_v24, 2 }
 0x28f   : >> { %v2297_v55 = vmul.f32 %v2259_v23, %v5259_v40  ;;  %v1856_v33 = vmul.f32 %v1818_v5, %v5082_v56  ;;  %v3797_v18 = vpop.eup %3796  ;;  %v2921_v52 = vmul.f32 1.442695, %v2913_v57  ;;  %3808 = vpow2.f32 %v2487_v10 }
 0x290   : >> { %v1873_v40 = vadd.f32 %v1872_v1, %v1871_v22  ;;  %v2312_v12 = vadd.f32 %v2311_v21, %v2310_v48  ;;  %v2305_v4 = vadd.f32 %v2304_v50, %v2303_v34  ;;  %v3799_v31 = vpop.eup %3798  ;;  %v1866_v32 = vadd.f32 %v1865_v27, %v1864_v24 }
 0x291   : >> { %v2317_v58 = vsel %vm346_vm0, %v2297_v55, 0.0  ;;  %v1876_v47 = vsel %vm346_vm0, %v1856_v33, 0.0  ;;  %v1780_v48 = vmul.f32 %v5312_v7, %v5268_v2  ;;  %v3801_v38 = vpop.eup %3800  ;;  %v2235_v43 = vmul.f32 %v3797_v18, %v5350_v42 }
 0x292   : >> { %v1825_v56 = vpop.permute.xlu1 %1824  ;;  %v5346_v6 = vpop.permute.xlu0 %1732  ;;  %v1877_v28 = vrot.slane %v1876_v47, 4  ;;  %v2318_v22 = vrot.slane %v2317_v58, 4  ;;  %v2313_v44 = vrot.slane %v2312_v12, 2  ;;  %v2306_v24 = vrot.slane %v2305_v4, 2 }
 0x293   : >> { %v1857_v30 = vmul.f32 %v1825_v56, %v5109_v60  ;;  %v1874_v60 = vrot.slane %v1873_v40, 1  ;;  %v3803_v59 = vpop.eup %3802  ;;  %v1794_v7 = vmul.f32 %v3799_v31, %v5163_v62  ;;  %v1867_v15 = vrot.slane %v1866_v32, 1 }
 0x294   : >> { %v1878_v8 = vadd.f32 %v1877_v28, %v1876_v47  ;;  %v2319_v50 = vadd.f32 %v2318_v22, %v2317_v58  ;;  %v5364_v33 = vadd.f32 %v2235_v43, %v2221_v17  ;;  %v2670_v47 = vmul.f32 %v3801_v38, %v5304_v13  ;;  %v3805_v10 = vpop.eup %3804 }
 0x295   : >> { %v1883_v34 = vsel %vm346_vm0, %v1857_v30, 0.0  ;;  %v5367_v57 = vadd.f32 %v1794_v7, %v1780_v48  ;;  %v1875_v18 = vadd.f32 %v1874_v60, %v1873_v40  ;;  %v2314_v56 = vadd.f32 %v2313_v44, %v2312_v12 }
 0x296   : >> { %v1884_v1 = vrot.slane %v1883_v34, 4  ;;  %v2266_v21 = vpop.permute.xlu1 %2265  ;;  %v2174_v23 = vpop.permute.xlu0 %2173  ;;  %v1879_v5 = vrot.slane %v1878_v8, 2  ;;  %v3104_v31 = vmul.f32 %v3803_v59, %v5302_v39  ;;  %v2307_v58 = vadd.f32 %v2306_v24, %v2305_v4 }
 0x297   : >> { %v2298_v2 = vmul.f32 %v2266_v21, %v5297_v29  ;;  %v3807_v21 = vpop.eup %3806  ;;  %v3047_v38 = vrot.slane %v5225_v35, %v5556_v63  ;;  %v2237_v4 = vmul.f32 %v3805_v10, %v5364_v33  ;;  %3810 = vpow2.f32 %v2921_v52 }
 0x298   : >> { %v1885_v55 = vadd.f32 %v1884_v1, %v1883_v34  ;;  %v1880_v49 = vadd.f32 %v1879_v5, %v1878_v8  ;;  %v1868_v8 = vadd.f32 %v1867_v15, %v1866_v32  ;;  %v2320_v1 = vrot.slane %v2319_v50, 2 }
 0x299   : >> { %v2324_v27 = vsel %vm346_vm0, %v2298_v2, 0.0  ;;  %v2315_v32 = vrot.slane %v2314_v56, 1  ;;  %v2308_v24 = vrot.slane %v2307_v58, 1  ;;  %v1781_v10 = vmul.f32 %v5319_v61, %v5346_v6 }
 0x29a   : >> { %v1886_v28 = vrot.slane %v1885_v55, 2  ;;  %v3001_v30 = vpop.permute.xlu1 %3000  ;;  %v2567_v29 = vpop.permute.xlu0 %2566  ;;  %v1881_v22 = vrot.slane %v1880_v49, 1  ;;  %v2325_v48 = vrot.slane %v2324_v27, 4  ;;  %v1929_v15 = vsel %vm1928_vm2, %v1875_v18, %v1868_v8 }
 0x29b   : >> { %v3085_v17 = vmul.f32 %v3051_v3, %v3001_v30  ;;  %v2651_v34 = vmul.f32 %v2617_v14, %v2567_v29  ;;  %v1796_v3 = vmul.f32 %v3807_v21, %v5367_v57  ;;  %v3809_v14 = vpop.eup %3808 }
 0x29c   : >> { %v1887_v43 = vadd.f32 %v1886_v28, %v1885_v55  ;;  %v1882_v5 = vadd.f32 %v1881_v22, %v1880_v49  ;;  %v2321_v55 = vadd.f32 %v2320_v1, %v2319_v50  ;;  %v2316_v50 = vadd.f32 %v2315_v32, %v2314_v56 }
 0x29d   : >> { %v5373_v40 = vadd.f32 %v2670_v47, %v2651_v34  ;;  %v5375_v12 = vadd.f32 %v3104_v31, %v3085_v17  ;;  %v2326_v47 = vadd.f32 %v2325_v48, %v2324_v27  ;;  %v2309_v22 = vadd.f32 %v2308_v24, %v2307_v58 }
 0x29e   : >> { %v1888_v60 = vrot.slane %v1887_v43, 1  ;;  %v2273_v44 = vpop.permute.xlu1 %2272  ;;  %v1832_v59 = vpop.permute.xlu0 %1831  ;;  %v1931_v28 = vsel %vm1930_vm3, %v1882_v5, %v1929_v15  ;;  %v2322_v61 = vrot.slane %v2321_v55, 1 }
 0x29f   : >> { %v2299_v2 = vmul.f32 %v2273_v44, %v5326_v19  ;;  %v1858_v7 = vmul.f32 %v1832_v59, %v5134_v37  ;;  %v2222_v19 = vmul.f32 %v5354_v53, %v2174_v23  ;;  %v2327_v6 = vrot.slane %v2326_v47, 2 }
 0x2a0   : >> { %v1889_v49 = vadd.f32 %v1888_v60, %v1887_v43  ;;  %v2613_v53 = vrot.slane %v5233_v51, %v5556_v63 }
 0x2a1   : >> { %v2331_v30 = vsel %vm346_vm0, %v2299_v2, 0.0  ;;  %v1890_v52 = vsel %vm346_vm0, %v1858_v7, 0.0  ;;  %v5393_v2 = vadd.f32 %v1796_v3, %v1781_v10   ;;  %v3811_v59 = vpop.eup %3810  ;;  %v2323_v3 = vadd.f32 %v2322_v61, %v2321_v55 }
 0x2a2   : >> { %v1933_v29 = vsel %vm1932_vm4, %v1889_v49, %v1931_v28  ;;  %v2332_v31 = vrot.slane %v2331_v30, 4  ;;  %v1891_v37 = vrot.slane %v1890_v52, 4  ;;  %v2280_v21 = vpop.permute.xlu1 %2279  ;;  %v1839_v18 = vpop.permute.xlu0 %1838  ;;  %v5397_v28 = vadd.f32 %v2237_v4, %v2222_v19  }
 0x2a3   : >> { %v2300_v27 = vmul.f32 %v2280_v21, %v5350_v42  ;;  %v1859_v17 = vmul.f32 %v1839_v18, %v5163_v62  ;;  %v5400_v62 = vsel %vm1928_vm2, %v2316_v50, %v2309_v22  ;;  %v2328_v32 = vadd.f32 %v2327_v6, %v2326_v47 }
 0x2a4   : >> { %v2333_v34 = vadd.f32 %v2332_v31, %v2331_v30  ;;  %v1892_v8 = vadd.f32 %v1891_v37, %v1890_v52  ;;  %v2672_v49 = vmul.f32 %v3809_v14, %v5373_v40  ;;  %v3106_v22 = vmul.f32 %v3811_v59, %v5375_v12 }
 0x2a5   : >> { %v2338_v1 = vsel %vm346_vm0, %v2300_v27, 0.0  ;;  %v1897_v43 = vsel %vm346_vm0, %v1859_v17, 0.0  ;;  %v2329_v6 = vrot.slane %v2328_v32, 1 }
 0x2a6   : >> { %v2334_v23 = vrot.slane %v2333_v34, 2  ;;  %v1893_v56 = vrot.slane %v1892_v8, 2  ;;  %v2339_v58 = vrot.slane %v2338_v1, 4  ;;  %v2287_v48 = vpop.permute.xlu1 %2286  ;;  %v1846_v42 = vpop.permute.xlu0 %1845  ;;  %v1898_v5 = vrot.slane %v1897_v43, 4 }
 0x2a7   : >> { %v2301_v60 = vmul.f32 %v2287_v48, %v5364_v33  ;;  %v1860_v44 = vmul.f32 %v1846_v42, %v5367_v57 }
 0x2a8   : >> { %v1894_v24 = vadd.f32 %v1893_v56, %v1892_v8  ;;  %v2340_v51 = vadd.f32 %v2339_v58, %v2338_v1  ;;  %v1899_v7 = vadd.f32 %v1898_v5, %v1897_v43  ;;  %v2335_v10 = vadd.f32 %v2334_v23, %v2333_v34 }
 0x2a9   : >> { %v2345_v15 = vsel %vm346_vm0, %v2301_v60, 0.0  ;;  %v1904_v4 = vsel %vm346_vm0, %v1860_v44, 0.0 }
 0x2aa   : >> { %v1895_v30 = vrot.slane %v1894_v24, 1  ;;  %v2341_v52 = vrot.slane %v2340_v51, 2  ;;  %v2346_v19 = vrot.slane %v2345_v15, 4  ;;  %v2294_v33 = vpop.permute.xlu1 %2293  ;;  %v1853_v31 = vpop.permute.xlu0 %1852  ;;  %v1900_v57 = vrot.slane %v1899_v7, 2 }
 0x2ab   : >> { %v1905_v37 = vrot.slane %v1904_v4, 4  ;;  %v2302_v55 = vmul.f32 %v2294_v33, %v5397_v28  ;;  %v1861_v47 = vmul.f32 %v1853_v31, %v5393_v2  ;;  %v2336_v34 = vrot.slane %v2335_v10, 1 }
 0x2ac   : >> { %v1896_v21 = vadd.f32 %v1895_v30, %v1894_v24  ;;  %v2342_v18 = vadd.f32 %v2341_v52, %v2340_v51  ;;  %v2347_v50 = vadd.f32 %v2346_v19, %v2345_v15  ;;  %v1901_v27 = vadd.f32 %v1900_v57, %v1899_v7 }
 0x2ad   : >> { %v1906_v14 = vadd.f32 %v1905_v37, %v1904_v4  ;;  %v2352_v17 = vsel %vm346_vm0, %v2302_v55, 0.0  ;;  %v1911_v61 = vsel %vm346_vm0, %v1861_v47, 0.0  ;;  %v2370_v57 = vsel %vm1930_vm3, %v2323_v3, %v5400_v62 }
 0x2ae   : >> { %v1935_v8 = vsel %vm1934_vm5, %v1896_v21, %v1933_v29  ;;  %v2348_v1 = vrot.slane %v2347_v50, 2  ;;  %v2994_v43 = vpop.permute.xlu1 %2993  ;;  %v2560_v23 = vpop.permute.xlu0 %2559  ;;  %v1902_v56 = vrot.slane %v1901_v27, 1  ;;  %v2353_v48 = vrot.slane %v2352_v17, 4 }
 0x2af   : >> { %v1907_v58 = vrot.slane %v1906_v14, 2  ;;  %v1912_v42 = vrot.slane %v1911_v61, 4  ;;  %v2343_v5 = vrot.slane %v2342_v18, 1  ;;  %v3084_v44 = vmul.f32 %v3047_v38, %v2994_v43 }
 0x2b0   : >> { %v2349_v60 = vadd.f32 %v2348_v1, %v2347_v50  ;;  %v2650_v59 = vmul.f32 %v2613_v53, %v2560_v23  ;;  %v1903_v24 = vadd.f32 %v1902_v56, %v1901_v27  ;;  %v2354_v7 = vadd.f32 %v2353_v48, %v2352_v17  ;;  %v2360_v23 = vld [vmem:[%s5428_s11] sm:$0xff] }
 0x2b1   : >> { %v1908_v51 = vadd.f32 %v1907_v58, %v1906_v14  ;;  %v1913_v15 = vadd.f32 %v1912_v42, %v1911_v61  ;;  %v2330_v29 = vadd.f32 %v2329_v6, %v2328_v32  ;;  %v5418_v19 = vadd.f32 %v3106_v22, %v3084_v44   ;;  %v1919_v58 = vld [vmem:[%s5432_s13] sm:$0xff] }
 0x2b2   : >> { %v2350_v4 = vrot.slane %v2349_v60, 1  ;;  %v2687_v30 = vpop.permute.xlu1 %2686  ;;  %v2680_v52 = vpop.permute.xlu0 %2679  ;;  %v5416_v38 = vadd.f32 %v2672_v49, %v2650_v59   ;;  %v1937_v35 = vsel %vm1936_vm6, %v1903_v24, %v1935_v8  ;;  %v2355_v53 = vrot.slane %v2354_v7, 2 }
 0x2b3   : >> { %v1909_v33 = vrot.slane %v1908_v51, 1  ;;  %v1914_v31 = vrot.slane %v1913_v15, 2  ;;  %v2337_v32 = vadd.f32 %v2336_v34, %v2335_v10  ;;  %v2731_v37 = vmul.f32 %v2687_v30, %v5373_v40 }
 0x2b4   : >> { %v2730_v49 = vmul.f32 %v2680_v52, %v5416_v38  ;;  %v2344_v55 = vadd.f32 %v2343_v5, %v2342_v18  ;;  %v2356_v21 = vadd.f32 %v2355_v53, %v2354_v7  ;;  %v2371_v22 = vsel %vm1932_vm4, %v2330_v29, %v2370_v57 }
 0x2b5   : >> { %v1910_v47 = vadd.f32 %v1909_v33, %v1908_v51  ;;  %v1915_v50 = vadd.f32 %v1914_v31, %v1913_v15  ;;  %v2351_v27 = vadd.f32 %v2350_v4, %v2349_v60  ;;  %v2745_v62 = vsel %vm346_vm0, %v2731_v37, 0.0 }
 0x2b6   : >> { %v2738_v3 = vsel %vm346_vm0, %v2730_v49, 0.0  ;;  %v3121_v40 = vpop.permute.xlu1 %3120  ;;  %v3114_v10 = vpop.permute.xlu0 %3113  ;;  %v2357_v14 = vrot.slane %v2356_v21, 1  ;;  %v2746_v61 = vrot.slane %v2745_v62, 4  ;;  %v2372_v6 = vsel %vm1934_vm5, %v2337_v32, %v2371_v22 }
 0x2b7   : >> { %v1939_v18 = vsel %vm1938_vm7, %v1910_v47, %v1937_v35  ;;  %v1916_v17 = vrot.slane %v1915_v50, 1  ;;  %v2739_v34 = vrot.slane %v2738_v3, 4  ;;  %v3165_v8 = vmul.f32 %v3121_v40, %v5375_v12 }
 0x2b8   : >> { %v3164_v1 = vmul.f32 %v3114_v10, %v5418_v19  ;;  %v2373_v43 = vsel %vm1936_vm6, %v2344_v55, %v2372_v6  ;;  %v2358_v56 = vadd.f32 %v2357_v14, %v2356_v21  ;;  %v2747_v42 = vadd.f32 %v2746_v61, %v2745_v62 }
 0x2b9   : >> { %v1917_v48 = vadd.f32 %v1916_v17, %v1915_v50  ;;  %v2374_v5 = vsel %vm1938_vm7, %v2351_v27, %v2373_v43  ;;  %v2740_v60 = vadd.f32 %v2739_v34, %v2738_v3  ;;  %v3179_v44 = vsel %vm346_vm0, %v3165_v8, 0.0 }
 0x2ba   : >> { %v3172_v59 = vsel %vm346_vm0, %v3164_v1, 0.0  ;;  %v3128_v24 = vpop.permute.xlu1 %3127  ;;  %v2694_v12 = vpop.permute.xlu0 %2693  ;;  %v2375_v51 = vsel %vm1940_vm8, %v2358_v56, %v2374_v5  ;;  %v2748_v15 = vrot.slane %v2747_v42, 2  ;;  %v3180_v29 = vrot.slane %v3179_v44, 4 }
 0x2bb   : >> { %v1941_v7 = vsel %vm1940_vm8, %v1917_v48, %v1939_v18  ;;  %v2377_v4 = vadd.f32 %v2375_v51, %v2360_v23  ;;  %v2741_v52 = vrot.slane %v2740_v60, 2  ;;  %v3173_v35 = vrot.slane %v3172_v59, 4 }
 0x2bc   : >> { %v1943_v30 = vadd.f32 %v1941_v7, %v1919_v58  ;;  %v2749_v33 = vadd.f32 %v2748_v15, %v2747_v42  ;;  %v3181_v53 = vadd.f32 %v3180_v29, %v3179_v44  ;;  %v3166_v31 = vmul.f32 %v3128_v24, %v5302_v39 }
 0x2bd   : >> { %v2732_v57 = vmul.f32 %v2694_v12, %v5304_v13  ;;  %2378 = vst.msk [vmem:[%s5428_s11] sm:$0xff] %vm346_vm0, %v2377_v4  ;;  %v2742_v32 = vadd.f32 %v2741_v52, %v2740_v60  ;;  %v3174_v37 = vadd.f32 %v3173_v35, %v3172_v59 }
 0x2be   : >> { %1944 = vst.msk [vmem:[%s5432_s13] sm:$0xff] %vm346_vm0, %v1943_v30  ;;  %v3135_v49 = vpop.permute.xlu1 %3134  ;;  %v2701_v55 = vpop.permute.xlu0 %2700  ;;  %v2750_v47 = vrot.slane %v2749_v33, 1  ;;  %v3182_v21 = vrot.slane %v3181_v53, 2  ;;  %v3186_v50 = vsel %vm346_vm0, %v3166_v31, 0.0 }
 0x2bf   : >> { %v2752_v22 = vsel %vm346_vm0, %v2732_v57, 0.0  ;;  %v2743_v27 = vrot.slane %v2742_v32, 1  ;;  %v3175_v62 = vrot.slane %v3174_v37, 2  ;;  %v3187_v3 = vrot.slane %v3186_v50, 4 }
 0x2c0   : >> { %v2753_v39 = vrot.slane %v2752_v22, 4  ;;  %v2751_v40 = vadd.f32 %v2750_v47, %v2749_v33  ;;  %v3183_v13 = vadd.f32 %v3182_v21, %v3181_v53  ;;  %v3167_v10 = vmul.f32 %v3135_v49, %v5262_v11 }
 0x2c1   : >> { %v2733_v18 = vmul.f32 %v2701_v55, %v5264_v41  ;;  %v2744_v14 = vadd.f32 %v2743_v27, %v2742_v32  ;;  %v3176_v17 = vadd.f32 %v3175_v62, %v3174_v37  ;;  %v3188_v61 = vadd.f32 %v3187_v3, %v3186_v50 }
 0x2c2   : >> { %v2754_v6 = vadd.f32 %v2753_v39, %v2752_v22  ;;  %v3142_v34 = vpop.permute.xlu1 %3141  ;;  %v2708_v8 = vpop.permute.xlu0 %2707  ;;  %v3184_v1 = vrot.slane %v3183_v13, 1  ;;  %v3193_v43 = vsel %vm346_vm0, %v3167_v10, 0.0 }
 0x2c3   : >> { %v2759_v23 = vsel %vm346_vm0, %v2733_v18, 0.0  ;;  %v3168_v56 = vmul.f32 %v3142_v34, %v5246_v45  ;;  %v2804_v58 = vsel %vm1928_vm2, %v2751_v40, %v2744_v14  ;;  %v3177_v48 = vrot.slane %v3176_v17, 1 }
 0x2c4   : >> { %v3189_v42 = vrot.slane %v3188_v61, 2  ;;  %v2755_v11 = vrot.slane %v2754_v6, 2  ;;  %v3185_v5 = vadd.f32 %v3184_v1, %v3183_v13  ;;  %v3194_v41 = vrot.slane %v3193_v43, 4 }
 0x2c5   : >> { %v2760_v60 = vrot.slane %v2759_v23, 4  ;;  %v3200_v44 = vsel %vm346_vm0, %v3168_v56, 0.0  ;;  %v3178_v59 = vadd.f32 %v3177_v48, %v3176_v17  ;;  %v2734_v45 = vmul.f32 %v2708_v8, %v5221_v9 }
 0x2c6   : >> { %v3190_v24 = vadd.f32 %v3189_v42, %v3188_v61  ;;  %v2756_v12 = vadd.f32 %v2755_v11, %v2754_v6  ;;  %v3201_v51 = vrot.slane %v3200_v44, 4  ;;  %v3149_v7 = vpop.permute.xlu1 %3148  ;;  %v2715_v15 = vpop.permute.xlu0 %2714  ;;  %v3195_v29 = vadd.f32 %v3194_v41, %v3193_v43 }
 0x2c7   : >> { %v2761_v4 = vadd.f32 %v2760_v60, %v2759_v23  ;;  %v3169_v30 = vmul.f32 %v3149_v7, %v5201_v0  ;;  %v3238_v52 = vsel %vm1928_vm2, %v3185_v5, %v3178_v59  ;;  %v2766_v32 = vsel %vm346_vm0, %v2734_v45, 0.0 }
 0x2c8   : >> { %v3191_v35 = vrot.slane %v3190_v24, 1  ;;  %v2757_v33 = vrot.slane %v2756_v12, 1  ;;  %v3202_v53 = vadd.f32 %v3201_v51, %v3200_v44  ;;  %v3196_v31 = vrot.slane %v3195_v29, 2 }
 0x2c9   : >> { %v2762_v57 = vrot.slane %v2761_v4, 2  ;;  %v3207_v37 = vsel %vm346_vm0, %v3169_v30, 0.0  ;;  %v2767_v21 = vrot.slane %v2766_v32, 4  ;;  %v2735_v0 = vmul.f32 %v2715_v15, %v5203_v26 }
 0x2ca   : >> { %v3192_v49 = vadd.f32 %v3191_v35, %v3190_v24  ;;  %v2758_v55 = vadd.f32 %v2757_v33, %v2756_v12  ;;  %v3203_v47 = vrot.slane %v3202_v53, 2  ;;  %v3156_v50 = vpop.permute.xlu1 %3155  ;;  %v3197_v22 = vadd.f32 %v3196_v31, %v3195_v29  ;;  %v2722_v62 = vpop.permute.xlu0 %2721  ;;  %v5577_v29 = vld [vmem:[#allocation14_spill] sm:$0xff] }
 0x2cb   : >> { %v2763_v9 = vadd.f32 %v2762_v57, %v2761_v4  ;;  %v3208_v27 = vrot.slane %v3207_v37, 4  ;;  %v2768_v13 = vadd.f32 %v2767_v21, %v2766_v32  ;;  %v2773_v17 = vsel %vm346_vm0, %v2735_v0, 0.0 }
 0x2cc   : >> { %v3239_v3 = vsel %vm1930_vm3, %v3192_v49, %v3238_v52  ;;  %v2805_v39 = vsel %vm1930_vm3, %v2758_v55, %v2804_v58  ;;  %v3204_v40 = vadd.f32 %v3203_v47, %v3202_v53  ;;  %v3198_v10 = vrot.slane %v3197_v22, 1  ;;  %v5578_v52 = vld [vmem:[#allocation13_spill] sm:$0xff] }
 0x2cd   : >> { %v2764_v18 = vrot.slane %v2763_v9, 1  ;;  %v3209_v14 = vadd.f32 %v3208_v27, %v3207_v37  ;;  %v2769_v6 = vrot.slane %v2768_v13, 2  ;;  %v2774_v34 = vrot.slane %v2773_v17, 4 }
 0x2ce   : >> { %v3205_v61 = vrot.slane %v3204_v40, 1  ;;  %v3170_v8 = vmul.f32 %v3156_v50, %v5176_v20  ;;  %v3199_v1 = vadd.f32 %v3198_v10, %v3197_v22  ;;  %v2736_v23 = vmul.f32 %v2722_v62, %v5150_v54  ;;  %v3163_v11 = vpop.permute.xlu1 %3162  ;;  %v2729_v59 = vpop.permute.xlu0 %2728 }
 0x2cf   : >> { %v2765_v43 = vadd.f32 %v2764_v18, %v2763_v9  ;;  %v3210_v26 = vrot.slane %v3209_v14, 2  ;;  %v2770_v48 = vadd.f32 %v2769_v6, %v2768_v13  ;;  %v2775_v58 = vadd.f32 %v2774_v34, %v2773_v17 }
 0x2d0   : >> { %v3206_v56 = vadd.f32 %v3205_v61, %v3204_v40  ;;  %v3214_v42 = vsel %vm346_vm0, %v3170_v8, 0.0  ;;  %v3240_v5 = vsel %vm1932_vm4, %v3199_v1, %v3239_v3  ;;  %v2780_v51 = vsel %vm346_vm0, %v2736_v23, 0.0  ;;  %v3229_v23 = vld [vmem:[%s3228_s14] sm:$0xff] }
 0x2d1   : >> { %v2806_v41 = vsel %vm1932_vm4, %v2765_v43, %v2805_v39  ;;  %v3211_v60 = vadd.f32 %v3210_v26, %v3209_v14  ;;  %v3215_v44 = vrot.slane %v3214_v42, 4  ;;  %v2771_v24 = vrot.slane %v2770_v48, 1 }
 0x2d2   : >> { %v3241_v20 = vsel %vm1934_vm5, %v3206_v56, %v3240_v5  ;;  %v2776_v12 = vrot.slane %v2775_v58, 2  ;;  %v2781_v15 = vrot.slane %v2780_v51, 4  ;;  %v3171_v4 = vmul.f32 %v3163_v11, %v5577_v29 }
 0x2d3   : >> { %v3212_v54 = vrot.slane %v3211_v60, 1  ;;  %v3216_v7 = vadd.f32 %v3215_v44, %v3214_v42  ;;  %v2772_v45 = vadd.f32 %v2771_v24, %v2770_v48  ;;  %v2737_v35 = vmul.f32 %v2729_v59, %v5578_v52 }
 0x2d4   : >> { %v2777_v30 = vadd.f32 %v2776_v12, %v2775_v58  ;;  %v2782_v31 = vadd.f32 %v2781_v15, %v2780_v51  ;;  %v3221_v57 = vsel %vm346_vm0, %v3171_v4, 0.0  ;;  %v2795_v58 = vld [vmem:[%s2794_s15] sm:$0xff] }
 0x2d5   : >> { %v3213_v33 = vadd.f32 %v3212_v54, %v3211_v60  ;;  %v3217_v53 = vrot.slane %v3216_v7, 2  ;;  %v2807_v32 = vsel %vm1934_vm5, %v2772_v45, %v2806_v41  ;;  %v3222_v49 = vrot.slane %v3221_v57, 4 }
 0x2d6   : >> { %v2778_v37 = vrot.slane %v2777_v30, 1  ;;  %v2787_v55 = vsel %vm346_vm0, %v2737_v35, 0.0  ;;  %v2783_v50 = vrot.slane %v2782_v31, 2  ;;  %v5579_v41 = vmov %v5418_v19 }
 0x2d7   : >> { %v3242_v47 = vsel %vm1936_vm6, %v3213_v33, %v3241_v20  ;;  %v3218_v21 = vadd.f32 %v3217_v53, %v3216_v7  ;;  %v2788_v22 = vrot.slane %v2787_v55, 4  ;;  %v3223_v27 = vadd.f32 %v3222_v49, %v3221_v57 }
 0x2d8   : >> { %v2779_v9 = vadd.f32 %v2778_v37, %v2777_v30  ;;  %v2784_v62 = vadd.f32 %v2783_v50, %v2782_v31 }
 0x2d9   : >> { %v3219_v0 = vrot.slane %v3218_v21, 1  ;;  %v2789_v3 = vadd.f32 %v2788_v22, %v2787_v55  ;;  %v3224_v40 = vrot.slane %v3223_v27, 2 }
 0x2da   : >> { %v2808_v39 = vsel %vm1936_vm6, %v2779_v9, %v2807_v32  ;;  %v2785_v10 = vrot.slane %v2784_v62, 1 }
 0x2db   : >> { %v3220_v13 = vadd.f32 %v3219_v0, %v3218_v21  ;;  %v2790_v18 = vrot.slane %v2789_v3, 2  ;;  %v3225_v14 = vadd.f32 %v3224_v40, %v3223_v27 }
 0x2dc   : >> { %v2786_v61 = vadd.f32 %v2785_v10, %v2784_v62 }
 0x2dd   : >> { %v3243_v17 = vsel %vm1938_vm7, %v3220_v13, %v3242_v47  ;;  %v2791_v6 = vadd.f32 %v2790_v18, %v2789_v3  ;;  %v3226_v34 = vrot.slane %v3225_v14, 1 }
 0x2de   : >> { %v2809_v8 = vsel %vm1938_vm7, %v2786_v61, %v2808_v39 }
 0x2df   : >> { %v2792_v1 = vrot.slane %v2791_v6, 1  ;;  %v3227_v43 = vadd.f32 %v3226_v34, %v3225_v14 }
 0x2e0   : > { %1498 = sbr.rel (!%p1496_p4) target bundleno = 475 (0x1db), region = 137 }
 0x2e1   : >> { %v2793_v26 = vadd.f32 %v2792_v1, %v2791_v6  ;;  %v3244_v56 = vsel %vm1940_vm8, %v3227_v43, %v3243_v17 }
 0x2e2   : >> { %v3246_v48 = vadd.f32 %v3244_v56, %v3229_v23 }
 0x2e3   : >> { %v2810_v42 = vsel %vm1940_vm8, %v2793_v26, %v2809_v8 }
 0x2e4   : >> { %v2812_v11 = vadd.f32 %v2810_v42, %v2795_v58  ;;  %3247 = vst.msk [vmem:[%s3228_s14] sm:$0xff] %vm346_vm0, %v3246_v48 }
 0x2e6   : >> { %2813 = vst.msk [vmem:[%s2794_s15] sm:$0xff] %vm346_vm0, %v2812_v11 }
 0x2e7 PF: > { %s18_s24 = sadd.s32 1, %s3838_s24  }
 0x2e8   : > { %p15_p5 = scmp.ge.s32.totalorder %s18_s24, 4  }
 0x2ea   :  { %17 = sbr.rel (!%p15_p5) target bundleno = 1 (0x1), region = 148 }

</bundles_post_ra>
